<compile_context>
chip_gen: v5e
topology: v5e:2x2
jax: 0.10.0
libtpu: 0.0.40
codegen_flags: <defaults>
</compile_context>

<pallas_src>
import jax
import jax.numpy as jnp
from jax.experimental import pallas as pl
from jax.experimental.pallas import tpu as pltpu


_OUT_ROWS = 8      # sublane-dense output tile
_OUT_LANES = 128   # lane-dense output tile


# ----------------------------- in-kernel building blocks ---------------------------

def _conv5x5_prelu(x, w, b, alpha, W, stride):
    """5x5 'valid' conv + bias + PReLU as a single MXU matmul.

    x      : (Cin, R) f32, R = W*W.  The layer's feature map lives on the
             `stride`-strided row-major lattice of the original WxW grid
             (row stride*(i*W + j) holds pixel (i, j)); all other rows are finite
             don't-care values that never reach a valid output.
    w      : (Cout, 25*Cin) bf16, columns ordered (kh, kw, cin).
    b      : (Cout, 1) f32.
    alpha  : (1, 1) f32 PReLU slope.
    Returns (Cout, R) f32 on the same lattice.
    """
    Cin, R = x.shape
    S = stride * (4 * W + 4)                                      # largest tap shift
    xp = jnp.concatenate([x, jnp.zeros((Cin, S), x.dtype)], axis=1)
    taps = [xp[:, stride * (di * W + dj):stride * (di * W + dj) + R]
            for di in range(5) for dj in range(5)]
    patches = jnp.concatenate(taps, axis=0).astype(jnp.bfloat16)  # (25*Cin, R) in VMEM
    y = jnp.dot(w, patches, preferred_element_type=jnp.float32)   # MXU, f32 accumulate
    y = y + b
    return jnp.where(y > 0.0, y, alpha * y)                       # PReLU (VPU)


def _maxpool2x2(y, W, stride):
    """2x2 / stride-2 max pool on the stride lattice; result lives on the 2*stride lattice."""
    C, R = y.shape
    pad = jnp.zeros((C, stride * (W + 1)), y.dtype)
    yp = jnp.concatenate([y, pad], axis=1)
    t = jnp.maximum(yp[:, 0:R], yp[:, stride:stride + R])               # pool along W
    tp = jnp.concatenate([t, pad], axis=1)
    return jnp.maximum(tp[:, 0:R], tp[:, stride * W:stride * W + R])    # pool along H


def _make_lenet5_kernel(W, n_classes):
    def kernel(x_ref, alpha_ref, w1_ref, b1_ref, w3_ref, b3_ref,
               w5_ref, b5_ref, w6_ref, b6_ref, w7_ref, b7_ref, o_ref):
        al = alpha_ref[...]                                             # (1, 4) f32
        a1, a3, a5, a6 = al[:, 0:1], al[:, 1:2], al[:, 2:3], al[:, 3:4]

        x = x_ref[0]                                                    # (3, W*W) f32
        y = _conv5x5_prelu(x, w1_ref[...], b1_ref[...], a1, W, 1)       # c1 + prelu1
        y = _maxpool2x2(y, W, 1)                                        # s2 (valid 14x14)
        y = _conv5x5_prelu(y, w3_ref[...], b3_ref[...], a3, W, 2)       # c3 + prelu3
        y = _maxpool2x2(y, W, 2)                                        # s4 (valid 5x5)
        y = _conv5x5_prelu(y, w5_ref[...], b5_ref[...], a5, W, 4)       # c5 + prelu5

        feat = y[:, 0:1]                  # (120, 1): c5 is 1x1, equals torch's view(N,-1)
        h = jnp.dot(w6_ref[...], feat.astype(jnp.bfloat16),
                    preferred_element_type=jnp.float32) + b6_ref[...]   # f6
        h = jnp.where(h > 0.0, h, a6 * h)                               # prelu6
        logits = jnp.dot(w7_ref[...], h.astype(jnp.bfloat16),
                         preferred_element_type=jnp.float32) + b7_ref[...]  # f7

        # single lane/sublane-dense (8, 128) store; logits live in column 0
        out = jnp.concatenate(
            [logits, jnp.zeros((_OUT_ROWS - n_classes, 1), jnp.float32)], axis=0)
        out = jnp.concatenate(
            [out, jnp.zeros((_OUT_ROWS, _OUT_LANES - 1), jnp.float32)], axis=1)
        o_ref[0] = out

    return kernel


# ----------------------------- wrapper ---------------------------------------------

def _replicated(arr):
    zeros = (0,) * arr.ndim
    return pl.BlockSpec(arr.shape, lambda n, _z=zeros: _z)


@jax.jit
def lenet5_forward(x_nchw, kp):
    N, Cin, H, W = x_nchw.shape
    assert (H, W) == (32, 32), "kernel is specialized to 32x32 LeNet inputs"
    n_classes = kp["w7"].shape[0]
    assert n_classes <= _OUT_ROWS
    R = H * W
    x2 = x_nchw.reshape(N, Cin, R).astype(jnp.float32)   # NCHW flatten, no transpose

    kernel = _make_lenet5_kernel(W, n_classes)
    out = pl.pallas_call(
        kernel,
        out_shape=jax.ShapeDtypeStruct((N, _OUT_ROWS, _OUT_LANES), jnp.float32),
        grid_spec=pltpu.PrefetchScalarGridSpec(
            num_scalar_prefetch=0,
            grid=(N,),                                    # one sample per grid step
            in_specs=[
                pl.BlockSpec((1, Cin, R), lambda n: (n, 0, 0)),
                _replicated(kp["alphas"]),
                _replicated(kp["w1"]), _replicated(kp["b1"]),
                _replicated(kp["w3"]), _replicated(kp["b3"]),
                _replicated(kp["w5"]), _replicated(kp["b5"]),
                _replicated(kp["w6"]), _replicated(kp["b6"]),
                _replicated(kp["w7"]), _replicated(kp["b7"]),
            ],
            out_specs=pl.BlockSpec((1, _OUT_ROWS, _OUT_LANES), lambda n: (n, 0, 0)),
        ),
        compiler_params=pltpu.CompilerParams(
            dimension_semantics=("parallel",),            # shard batch across TCs on v7x
        ),
    )(x2, kp["alphas"], kp["w1"], kp["b1"], kp["w3"], kp["b3"],
      kp["w5"], kp["b5"], kp["w6"], kp["b6"], kp["w7"], kp["b7"])
    return out[:, :n_classes, 0]


# ----------------------------- parameters ------------------------------------------

def init_params(key, n_classes=2, flat_dim=120):
    """PyTorch-layout parameters with PyTorch default init (U(-1/sqrt(fan_in), ...))."""
    def uniform(k, shape, fan_in):
        bound = 1.0 / float(fan_in) ** 0.5
        return jax.random.uniform(k, shape, jnp.float32, -bound, bound)

    ks = jax.random.split(key, 10)
    p = {}
    p["w1"], p["b1"] = uniform(ks[0], (6, 3, 5, 5), 75), uniform(ks[1], (6,), 75)
    p["w3"], p["b3"] = uniform(ks[2], (16, 6, 5, 5), 150), uniform(ks[3], (16,), 150)
    p["w5"], p["b5"] = uniform(ks[4], (120, 16, 5, 5), 400), uniform(ks[5], (120,), 400)
    p["w6"], p["b6"] = uniform(ks[6], (84, flat_dim), flat_dim), uniform(ks[7], (84,), flat_dim)
    p["w7"], p["b7"] = uniform(ks[8], (n_classes, 84), 84), uniform(ks[9], (n_classes,), 84)
    p["a1"] = jnp.float32(0.25)   # PReLU default init (single shared slope)
    p["a3"] = jnp.float32(0.25)
    p["a5"] = jnp.float32(0.25)
    p["a6"] = jnp.float32(0.25)
    return p


def prepare_params(p):
    """One-time repack of PyTorch-layout params into the kernel layout (outside jit):
    conv (Cout,Cin,5,5) -> (Cout, 25*Cin) bf16 with columns ordered (kh, kw, cin) to
    match the in-kernel shifted-tap patch build; FC weights kept (out, in) bf16
    (column-vector matmuls); biases as (Cout, 1) f32; PReLU slopes packed as (1, 4)."""
    def conv_w(w):
        co, ci, kh, kw = w.shape
        return jnp.transpose(w, (0, 2, 3, 1)).reshape(co, kh * kw * ci).astype(jnp.bfloat16)

    col = lambda b: b.reshape(-1, 1).astype(jnp.float32)
    return {
        "w1": conv_w(p["w1"]), "b1": col(p["b1"]),
        "w3": conv_w(p["w3"]), "b3": col(p["b3"]),
        "w5": conv_w(p["w5"]), "b5": col(p["b5"]),
        "w6": p["w6"].astype(jnp.bfloat16), "b6": col(p["b6"]),
        "w7": p["w7"].astype(jnp.bfloat16), "b7": col(p["b7"]),
        "alphas": jnp.stack([p["a1"], p["a3"], p["a5"], p["a6"]]).reshape(1, 4).astype(jnp.float32),
    }


# ----------------------------- pure-JAX reference (for checking) -------------------

@jax.jit
def lenet5_reference(x, p):
    """XLA reference mirroring the kernel's bf16-input / f32-accumulate rounding."""
    q = lambda a: a.astype(jnp.bfloat16).astype(jnp.float32)
    prelu = lambda y, a: jnp.where(y > 0, y, a * y)

    def conv(x, w, b):
        y = jax.lax.conv_general_dilated(
            q(x), q(w), window_strides=(1, 1), padding="VALID",
            dimension_numbers=("NCHW", "OIHW", "NCHW"))
        return y + b.reshape(1, -1, 1, 1)

    def pool(y):
        return jax.lax.reduce_window(y, -jnp.inf, jax.lax.max,
                                     (1, 1, 2, 2), (1, 1, 2, 2), "VALID")

    y = pool(prelu(conv(x, p["w1"], p["b1"]), p["a1"]))
    y = pool(prelu(conv(y, p["w3"], p["b3"]), p["a3"]))
    y = prelu(conv(y, p["w5"], p["b5"]), p["a5"])
    f = y.reshape(x.shape[0], -1)
    h = prelu(q(f) @ q(p["w6"]).T + p["b6"], p["a6"])
    return q(h) @ q(p["w7"]).T + p["b7"]


# ----------------------------- demo -------------------------------------------------

if __name__ == "__main__":
    key = jax.random.PRNGKey(0)
    k_x, k_p = jax.random.split(key)

    # classic LeNet-sized input, PyTorch NCHW: batch=2, 3x32x32
    x = jax.random.normal(k_x, (2, 3, 32, 32), dtype=jnp.float32)
    params = init_params(k_p, n_classes=2)
    kparams = prepare_params(params)

    out = lenet5_forward(x, kparams)
    out = jax.block_until_ready(out)
    assert out.shape == (2, 2) and out.dtype == jnp.float32

    ref = jax.block_until_ready(lenet5_reference(x, params))
    err = float(jnp.max(jnp.abs(out - ref)))
    assert err < 2e-2, f"kernel/reference mismatch: max abs err = {err}"

    print("KERNEL_OK")
</pallas_src>

<mosaic_0001>
module attributes {stable_mosaic.version = 11 : i64} {
  func.func @kernel(%arg0: i32, %arg1: memref<1x3x1024xf32, #tpu.memory_space<vmem>>, %arg2: memref<1x4xf32, #tpu.memory_space<vmem>>, %arg3: memref<6x75xbf16, #tpu.memory_space<vmem>>, %arg4: memref<6x1xf32, #tpu.memory_space<vmem>>, %arg5: memref<16x150xbf16, #tpu.memory_space<vmem>>, %arg6: memref<16x1xf32, #tpu.memory_space<vmem>>, %arg7: memref<120x400xbf16, #tpu.memory_space<vmem>>, %arg8: memref<120x1xf32, #tpu.memory_space<vmem>>, %arg9: memref<84x120xbf16, #tpu.memory_space<vmem>>, %arg10: memref<84x1xf32, #tpu.memory_space<vmem>>, %arg11: memref<2x84xbf16, #tpu.memory_space<vmem>>, %arg12: memref<2x1xf32, #tpu.memory_space<vmem>>, %arg13: memref<1x8x128xf32, #tpu.memory_space<vmem>>) attributes {dimension_semantics = [#tpu.dimension_semantics<parallel>], iteration_bounds = array<i64: 2>, scalar_prefetch = 0 : i64, scratch_operands = 0 : i64, tpu.core_type = #tpu.core_type<tc>, window_params = [{transform_indices = @transform_0, window_bounds = array<i64: 1, 3, 1024>}, {pipeline_mode = #tpu.pipeline_mode<synchronous>, transform_indices = @transform_1, window_bounds = array<i64: 1, 4>}, {pipeline_mode = #tpu.pipeline_mode<synchronous>, transform_indices = @transform_2, window_bounds = array<i64: 6, 75>}, {pipeline_mode = #tpu.pipeline_mode<synchronous>, transform_indices = @transform_3, window_bounds = array<i64: 6, 1>}, {pipeline_mode = #tpu.pipeline_mode<synchronous>, transform_indices = @transform_4, window_bounds = array<i64: 16, 150>}, {pipeline_mode = #tpu.pipeline_mode<synchronous>, transform_indices = @transform_5, window_bounds = array<i64: 16, 1>}, {pipeline_mode = #tpu.pipeline_mode<synchronous>, transform_indices = @transform_6, window_bounds = array<i64: 120, 400>}, {pipeline_mode = #tpu.pipeline_mode<synchronous>, transform_indices = @transform_7, window_bounds = array<i64: 120, 1>}, {pipeline_mode = #tpu.pipeline_mode<synchronous>, transform_indices = @transform_8, window_bounds = array<i64: 84, 120>}, {pipeline_mode = #tpu.pipeline_mode<synchronous>, transform_indices = @transform_9, window_bounds = array<i64: 84, 1>}, {pipeline_mode = #tpu.pipeline_mode<synchronous>, transform_indices = @transform_10, window_bounds = array<i64: 2, 84>}, {pipeline_mode = #tpu.pipeline_mode<synchronous>, transform_indices = @transform_11, window_bounds = array<i64: 2, 1>}, {transform_indices = @transform_12, window_bounds = array<i64: 1, 8, 128>}]} {
    %c0 = arith.constant 0 : index
    %c0_0 = arith.constant 0 : index
    %0 = vector.load %arg2[%c0, %c0_0] : memref<1x4xf32, #tpu.memory_space<vmem>>, vector<1x4xf32>
    %1 = vector.extract_strided_slice %0 {offsets = [0, 0], sizes = [1, 1], strides = [1, 1]} : vector<1x4xf32> to vector<1x1xf32>
    %2 = vector.extract_strided_slice %0 {offsets = [0, 1], sizes = [1, 1], strides = [1, 1]} : vector<1x4xf32> to vector<1x1xf32>
    %3 = vector.extract_strided_slice %0 {offsets = [0, 2], sizes = [1, 1], strides = [1, 1]} : vector<1x4xf32> to vector<1x1xf32>
    %4 = vector.extract_strided_slice %0 {offsets = [0, 3], sizes = [1, 1], strides = [1, 1]} : vector<1x4xf32> to vector<1x1xf32>
    %c0_1 = arith.constant 0 : index
    %c0_2 = arith.constant 0 : index
    %c0_3 = arith.constant 0 : index
    %5 = vector.load %arg1[%c0_1, %c0_2, %c0_3] : memref<1x3x1024xf32, #tpu.memory_space<vmem>>, vector<1x3x1024xf32>
    %6 = vector.shape_cast %5 : vector<1x3x1024xf32> to vector<3x1024xf32>
    %c0_4 = arith.constant 0 : index
    %c0_5 = arith.constant 0 : index
    %7 = vector.load %arg3[%c0_4, %c0_5] : memref<6x75xbf16, #tpu.memory_space<vmem>>, vector<6x75xbf16>
    %c0_6 = arith.constant 0 : index
    %c0_7 = arith.constant 0 : index
    %8 = vector.load %arg4[%c0_6, %c0_7] : memref<6x1xf32, #tpu.memory_space<vmem>>, vector<6x1xf32>
    %cst = arith.constant 0.000000e+00 : f32
    %9 = vector.broadcast %cst : f32 to vector<3x132xf32>
    %10 = tpu.concatenate %6, %9 in 1 : vector<3x1024xf32>, vector<3x132xf32> -> vector<3x1156xf32>
    %11 = vector.extract_strided_slice %10 {offsets = [0, 0], sizes = [3, 1024], strides = [1, 1]} : vector<3x1156xf32> to vector<3x1024xf32>
    %12 = vector.extract_strided_slice %10 {offsets = [0, 1], sizes = [3, 1024], strides = [1, 1]} : vector<3x1156xf32> to vector<3x1024xf32>
    %13 = vector.extract_strided_slice %10 {offsets = [0, 2], sizes = [3, 1024], strides = [1, 1]} : vector<3x1156xf32> to vector<3x1024xf32>
    %14 = vector.extract_strided_slice %10 {offsets = [0, 3], sizes = [3, 1024], strides = [1, 1]} : vector<3x1156xf32> to vector<3x1024xf32>
    %15 = vector.extract_strided_slice %10 {offsets = [0, 4], sizes = [3, 1024], strides = [1, 1]} : vector<3x1156xf32> to vector<3x1024xf32>
    %16 = vector.extract_strided_slice %10 {offsets = [0, 32], sizes = [3, 1024], strides = [1, 1]} : vector<3x1156xf32> to vector<3x1024xf32>
    %17 = vector.extract_strided_slice %10 {offsets = [0, 33], sizes = [3, 1024], strides = [1, 1]} : vector<3x1156xf32> to vector<3x1024xf32>
    %18 = vector.extract_strided_slice %10 {offsets = [0, 34], sizes = [3, 1024], strides = [1, 1]} : vector<3x1156xf32> to vector<3x1024xf32>
    %19 = vector.extract_strided_slice %10 {offsets = [0, 35], sizes = [3, 1024], strides = [1, 1]} : vector<3x1156xf32> to vector<3x1024xf32>
    %20 = vector.extract_strided_slice %10 {offsets = [0, 36], sizes = [3, 1024], strides = [1, 1]} : vector<3x1156xf32> to vector<3x1024xf32>
    %21 = vector.extract_strided_slice %10 {offsets = [0, 64], sizes = [3, 1024], strides = [1, 1]} : vector<3x1156xf32> to vector<3x1024xf32>
    %22 = vector.extract_strided_slice %10 {offsets = [0, 65], sizes = [3, 1024], strides = [1, 1]} : vector<3x1156xf32> to vector<3x1024xf32>
    %23 = vector.extract_strided_slice %10 {offsets = [0, 66], sizes = [3, 1024], strides = [1, 1]} : vector<3x1156xf32> to vector<3x1024xf32>
    %24 = vector.extract_strided_slice %10 {offsets = [0, 67], sizes = [3, 1024], strides = [1, 1]} : vector<3x1156xf32> to vector<3x1024xf32>
    %25 = vector.extract_strided_slice %10 {offsets = [0, 68], sizes = [3, 1024], strides = [1, 1]} : vector<3x1156xf32> to vector<3x1024xf32>
    %26 = vector.extract_strided_slice %10 {offsets = [0, 96], sizes = [3, 1024], strides = [1, 1]} : vector<3x1156xf32> to vector<3x1024xf32>
    %27 = vector.extract_strided_slice %10 {offsets = [0, 97], sizes = [3, 1024], strides = [1, 1]} : vector<3x1156xf32> to vector<3x1024xf32>
    %28 = vector.extract_strided_slice %10 {offsets = [0, 98], sizes = [3, 1024], strides = [1, 1]} : vector<3x1156xf32> to vector<3x1024xf32>
    %29 = vector.extract_strided_slice %10 {offsets = [0, 99], sizes = [3, 1024], strides = [1, 1]} : vector<3x1156xf32> to vector<3x1024xf32>
    %30 = vector.extract_strided_slice %10 {offsets = [0, 100], sizes = [3, 1024], strides = [1, 1]} : vector<3x1156xf32> to vector<3x1024xf32>
    %31 = vector.extract_strided_slice %10 {offsets = [0, 128], sizes = [3, 1024], strides = [1, 1]} : vector<3x1156xf32> to vector<3x1024xf32>
    %32 = vector.extract_strided_slice %10 {offsets = [0, 129], sizes = [3, 1024], strides = [1, 1]} : vector<3x1156xf32> to vector<3x1024xf32>
    %33 = vector.extract_strided_slice %10 {offsets = [0, 130], sizes = [3, 1024], strides = [1, 1]} : vector<3x1156xf32> to vector<3x1024xf32>
    %34 = vector.extract_strided_slice %10 {offsets = [0, 131], sizes = [3, 1024], strides = [1, 1]} : vector<3x1156xf32> to vector<3x1024xf32>
    %35 = vector.extract_strided_slice %10 {offsets = [0, 132], sizes = [3, 1024], strides = [1, 1]} : vector<3x1156xf32> to vector<3x1024xf32>
    %36 = tpu.concatenate %11, %12, %13, %14, %15, %16, %17, %18, %19, %20, %21, %22, %23, %24, %25, %26 in 0 : vector<3x1024xf32>, vector<3x1024xf32>, vector<3x1024xf32>, vector<3x1024xf32>, vector<3x1024xf32>, vector<3x1024xf32>, vector<3x1024xf32>, vector<3x1024xf32>, vector<3x1024xf32>, vector<3x1024xf32>, vector<3x1024xf32>, vector<3x1024xf32>, vector<3x1024xf32>, vector<3x1024xf32>, vector<3x1024xf32>, vector<3x1024xf32> -> vector<48x1024xf32>
    %37 = tpu.concatenate %27, %28, %29, %30, %31, %32, %33, %34, %35 in 0 : vector<3x1024xf32>, vector<3x1024xf32>, vector<3x1024xf32>, vector<3x1024xf32>, vector<3x1024xf32>, vector<3x1024xf32>, vector<3x1024xf32>, vector<3x1024xf32>, vector<3x1024xf32> -> vector<27x1024xf32>
    %38 = tpu.concatenate %36, %37 in 0 : vector<48x1024xf32>, vector<27x1024xf32> -> vector<75x1024xf32>
    %39 = arith.truncf %38 : vector<75x1024xf32> to vector<75x1024xbf16>
    %cst_8 = arith.constant dense<0.000000e+00> : vector<6x1024xf32>
    %40 = tpu.matmul %7, %39, %cst_8 {dimension_numbers = #tpu.dot_dimension_numbers<[1], [0], [0], [1], [0, 0, 1, 1], [], []>} : vector<6x75xbf16>, vector<75x1024xbf16>, vector<6x1024xf32> -> vector<6x1024xf32>
    %41 = vector.broadcast %8 : vector<6x1xf32> to vector<6x1024xf32>
    %42 = arith.addf %40, %41 : vector<6x1024xf32>
    %cst_9 = arith.constant 0.000000e+00 : f32
    %43 = vector.broadcast %cst_9 : f32 to vector<6x1024xf32>
    %44 = arith.cmpf ogt, %42, %43 : vector<6x1024xf32>
    %45 = vector.broadcast %1 : vector<1x1xf32> to vector<6x1024xf32>
    %46 = arith.mulf %45, %42 : vector<6x1024xf32>
    %47 = arith.select %44, %42, %46 : vector<6x1024xi1>, vector<6x1024xf32>
    %cst_10 = arith.constant 0.000000e+00 : f32
    %48 = vector.broadcast %cst_10 : f32 to vector<6x33xf32>
    %49 = tpu.concatenate %47, %48 in 1 : vector<6x1024xf32>, vector<6x33xf32> -> vector<6x1057xf32>
    %50 = vector.extract_strided_slice %49 {offsets = [0, 0], sizes = [6, 1024], strides = [1, 1]} : vector<6x1057xf32> to vector<6x1024xf32>
    %51 = vector.extract_strided_slice %49 {offsets = [0, 1], sizes = [6, 1024], strides = [1, 1]} : vector<6x1057xf32> to vector<6x1024xf32>
    %52 = arith.maximumf %50, %51 : vector<6x1024xf32>
    %53 = tpu.concatenate %52, %48 in 1 : vector<6x1024xf32>, vector<6x33xf32> -> vector<6x1057xf32>
    %54 = vector.extract_strided_slice %53 {offsets = [0, 0], sizes = [6, 1024], strides = [1, 1]} : vector<6x1057xf32> to vector<6x1024xf32>
    %55 = vector.extract_strided_slice %53 {offsets = [0, 32], sizes = [6, 1024], strides = [1, 1]} : vector<6x1057xf32> to vector<6x1024xf32>
    %56 = arith.maximumf %54, %55 : vector<6x1024xf32>
    %c0_11 = arith.constant 0 : index
    %c0_12 = arith.constant 0 : index
    %57 = vector.load %arg5[%c0_11, %c0_12] : memref<16x150xbf16, #tpu.memory_space<vmem>>, vector<16x150xbf16>
    %c0_13 = arith.constant 0 : index
    %c0_14 = arith.constant 0 : index
    %58 = vector.load %arg6[%c0_13, %c0_14] : memref<16x1xf32, #tpu.memory_space<vmem>>, vector<16x1xf32>
    %cst_15 = arith.constant 0.000000e+00 : f32
    %59 = vector.broadcast %cst_15 : f32 to vector<6x264xf32>
    %60 = tpu.concatenate %56, %59 in 1 : vector<6x1024xf32>, vector<6x264xf32> -> vector<6x1288xf32>
    %61 = vector.extract_strided_slice %60 {offsets = [0, 0], sizes = [6, 1024], strides = [1, 1]} : vector<6x1288xf32> to vector<6x1024xf32>
    %62 = vector.extract_strided_slice %60 {offsets = [0, 2], sizes = [6, 1024], strides = [1, 1]} : vector<6x1288xf32> to vector<6x1024xf32>
    %63 = vector.extract_strided_slice %60 {offsets = [0, 4], sizes = [6, 1024], strides = [1, 1]} : vector<6x1288xf32> to vector<6x1024xf32>
    %64 = vector.extract_strided_slice %60 {offsets = [0, 6], sizes = [6, 1024], strides = [1, 1]} : vector<6x1288xf32> to vector<6x1024xf32>
    %65 = vector.extract_strided_slice %60 {offsets = [0, 8], sizes = [6, 1024], strides = [1, 1]} : vector<6x1288xf32> to vector<6x1024xf32>
    %66 = vector.extract_strided_slice %60 {offsets = [0, 64], sizes = [6, 1024], strides = [1, 1]} : vector<6x1288xf32> to vector<6x1024xf32>
    %67 = vector.extract_strided_slice %60 {offsets = [0, 66], sizes = [6, 1024], strides = [1, 1]} : vector<6x1288xf32> to vector<6x1024xf32>
    %68 = vector.extract_strided_slice %60 {offsets = [0, 68], sizes = [6, 1024], strides = [1, 1]} : vector<6x1288xf32> to vector<6x1024xf32>
    %69 = vector.extract_strided_slice %60 {offsets = [0, 70], sizes = [6, 1024], strides = [1, 1]} : vector<6x1288xf32> to vector<6x1024xf32>
    %70 = vector.extract_strided_slice %60 {offsets = [0, 72], sizes = [6, 1024], strides = [1, 1]} : vector<6x1288xf32> to vector<6x1024xf32>
    %71 = vector.extract_strided_slice %60 {offsets = [0, 128], sizes = [6, 1024], strides = [1, 1]} : vector<6x1288xf32> to vector<6x1024xf32>
    %72 = vector.extract_strided_slice %60 {offsets = [0, 130], sizes = [6, 1024], strides = [1, 1]} : vector<6x1288xf32> to vector<6x1024xf32>
    %73 = vector.extract_strided_slice %60 {offsets = [0, 132], sizes = [6, 1024], strides = [1, 1]} : vector<6x1288xf32> to vector<6x1024xf32>
    %74 = vector.extract_strided_slice %60 {offsets = [0, 134], sizes = [6, 1024], strides = [1, 1]} : vector<6x1288xf32> to vector<6x1024xf32>
    %75 = vector.extract_strided_slice %60 {offsets = [0, 136], sizes = [6, 1024], strides = [1, 1]} : vector<6x1288xf32> to vector<6x1024xf32>
    %76 = vector.extract_strided_slice %60 {offsets = [0, 192], sizes = [6, 1024], strides = [1, 1]} : vector<6x1288xf32> to vector<6x1024xf32>
    %77 = vector.extract_strided_slice %60 {offsets = [0, 194], sizes = [6, 1024], strides = [1, 1]} : vector<6x1288xf32> to vector<6x1024xf32>
    %78 = vector.extract_strided_slice %60 {offsets = [0, 196], sizes = [6, 1024], strides = [1, 1]} : vector<6x1288xf32> to vector<6x1024xf32>
    %79 = vector.extract_strided_slice %60 {offsets = [0, 198], sizes = [6, 1024], strides = [1, 1]} : vector<6x1288xf32> to vector<6x1024xf32>
    %80 = vector.extract_strided_slice %60 {offsets = [0, 200], sizes = [6, 1024], strides = [1, 1]} : vector<6x1288xf32> to vector<6x1024xf32>
    %81 = vector.extract_strided_slice %60 {offsets = [0, 256], sizes = [6, 1024], strides = [1, 1]} : vector<6x1288xf32> to vector<6x1024xf32>
    %82 = vector.extract_strided_slice %60 {offsets = [0, 258], sizes = [6, 1024], strides = [1, 1]} : vector<6x1288xf32> to vector<6x1024xf32>
    %83 = vector.extract_strided_slice %60 {offsets = [0, 260], sizes = [6, 1024], strides = [1, 1]} : vector<6x1288xf32> to vector<6x1024xf32>
    %84 = vector.extract_strided_slice %60 {offsets = [0, 262], sizes = [6, 1024], strides = [1, 1]} : vector<6x1288xf32> to vector<6x1024xf32>
    %85 = vector.extract_strided_slice %60 {offsets = [0, 264], sizes = [6, 1024], strides = [1, 1]} : vector<6x1288xf32> to vector<6x1024xf32>
    %86 = tpu.concatenate %61, %62, %63, %64, %65, %66, %67, %68, %69, %70, %71, %72, %73, %74, %75, %76 in 0 : vector<6x1024xf32>, vector<6x1024xf32>, vector<6x1024xf32>, vector<6x1024xf32>, vector<6x1024xf32>, vector<6x1024xf32>, vector<6x1024xf32>, vector<6x1024xf32>, vector<6x1024xf32>, vector<6x1024xf32>, vector<6x1024xf32>, vector<6x1024xf32>, vector<6x1024xf32>, vector<6x1024xf32>, vector<6x1024xf32>, vector<6x1024xf32> -> vector<96x1024xf32>
    %87 = tpu.concatenate %77, %78, %79, %80, %81, %82, %83, %84, %85 in 0 : vector<6x1024xf32>, vector<6x1024xf32>, vector<6x1024xf32>, vector<6x1024xf32>, vector<6x1024xf32>, vector<6x1024xf32>, vector<6x1024xf32>, vector<6x1024xf32>, vector<6x1024xf32> -> vector<54x1024xf32>
    %88 = tpu.concatenate %86, %87 in 0 : vector<96x1024xf32>, vector<54x1024xf32> -> vector<150x1024xf32>
    %89 = arith.truncf %88 : vector<150x1024xf32> to vector<150x1024xbf16>
    %cst_16 = arith.constant dense<0.000000e+00> : vector<16x1024xf32>
    %90 = tpu.matmul %57, %89, %cst_16 {dimension_numbers = #tpu.dot_dimension_numbers<[1], [0], [0], [1], [0, 0, 1, 1], [], []>} : vector<16x150xbf16>, vector<150x1024xbf16>, vector<16x1024xf32> -> vector<16x1024xf32>
    %91 = vector.broadcast %58 : vector<16x1xf32> to vector<16x1024xf32>
    %92 = arith.addf %90, %91 : vector<16x1024xf32>
    %cst_17 = arith.constant 0.000000e+00 : f32
    %93 = vector.broadcast %cst_17 : f32 to vector<16x1024xf32>
    %94 = arith.cmpf ogt, %92, %93 : vector<16x1024xf32>
    %95 = vector.broadcast %2 : vector<1x1xf32> to vector<16x1024xf32>
    %96 = arith.mulf %95, %92 : vector<16x1024xf32>
    %97 = arith.select %94, %92, %96 : vector<16x1024xi1>, vector<16x1024xf32>
    %cst_18 = arith.constant 0.000000e+00 : f32
    %98 = vector.broadcast %cst_18 : f32 to vector<16x66xf32>
    %99 = tpu.concatenate %97, %98 in 1 : vector<16x1024xf32>, vector<16x66xf32> -> vector<16x1090xf32>
    %100 = vector.extract_strided_slice %99 {offsets = [0, 0], sizes = [16, 1024], strides = [1, 1]} : vector<16x1090xf32> to vector<16x1024xf32>
    %101 = vector.extract_strided_slice %99 {offsets = [0, 2], sizes = [16, 1024], strides = [1, 1]} : vector<16x1090xf32> to vector<16x1024xf32>
    %102 = arith.maximumf %100, %101 : vector<16x1024xf32>
    %103 = tpu.concatenate %102, %98 in 1 : vector<16x1024xf32>, vector<16x66xf32> -> vector<16x1090xf32>
    %104 = vector.extract_strided_slice %103 {offsets = [0, 0], sizes = [16, 1024], strides = [1, 1]} : vector<16x1090xf32> to vector<16x1024xf32>
    %105 = vector.extract_strided_slice %103 {offsets = [0, 64], sizes = [16, 1024], strides = [1, 1]} : vector<16x1090xf32> to vector<16x1024xf32>
    %106 = arith.maximumf %104, %105 : vector<16x1024xf32>
    %c0_19 = arith.constant 0 : index
    %c0_20 = arith.constant 0 : index
    %107 = vector.load %arg7[%c0_19, %c0_20] : memref<120x400xbf16, #tpu.memory_space<vmem>>, vector<120x400xbf16>
    %c0_21 = arith.constant 0 : index
    %c0_22 = arith.constant 0 : index
    %108 = vector.load %arg8[%c0_21, %c0_22] : memref<120x1xf32, #tpu.memory_space<vmem>>, vector<120x1xf32>
    %cst_23 = arith.constant 0.000000e+00 : f32
    %109 = vector.broadcast %cst_23 : f32 to vector<16x528xf32>
    %110 = tpu.concatenate %106, %109 in 1 : vector<16x1024xf32>, vector<16x528xf32> -> vector<16x1552xf32>
    %111 = vector.extract_strided_slice %110 {offsets = [0, 0], sizes = [16, 1024], strides = [1, 1]} : vector<16x1552xf32> to vector<16x1024xf32>
    %112 = vector.extract_strided_slice %110 {offsets = [0, 4], sizes = [16, 1024], strides = [1, 1]} : vector<16x1552xf32> to vector<16x1024xf32>
    %113 = vector.extract_strided_slice %110 {offsets = [0, 8], sizes = [16, 1024], strides = [1, 1]} : vector<16x1552xf32> to vector<16x1024xf32>
    %114 = vector.extract_strided_slice %110 {offsets = [0, 12], sizes = [16, 1024], strides = [1, 1]} : vector<16x1552xf32> to vector<16x1024xf32>
    %115 = vector.extract_strided_slice %110 {offsets = [0, 16], sizes = [16, 1024], strides = [1, 1]} : vector<16x1552xf32> to vector<16x1024xf32>
    %116 = vector.extract_strided_slice %110 {offsets = [0, 128], sizes = [16, 1024], strides = [1, 1]} : vector<16x1552xf32> to vector<16x1024xf32>
    %117 = vector.extract_strided_slice %110 {offsets = [0, 132], sizes = [16, 1024], strides = [1, 1]} : vector<16x1552xf32> to vector<16x1024xf32>
    %118 = vector.extract_strided_slice %110 {offsets = [0, 136], sizes = [16, 1024], strides = [1, 1]} : vector<16x1552xf32> to vector<16x1024xf32>
    %119 = vector.extract_strided_slice %110 {offsets = [0, 140], sizes = [16, 1024], strides = [1, 1]} : vector<16x1552xf32> to vector<16x1024xf32>
    %120 = vector.extract_strided_slice %110 {offsets = [0, 144], sizes = [16, 1024], strides = [1, 1]} : vector<16x1552xf32> to vector<16x1024xf32>
    %121 = vector.extract_strided_slice %110 {offsets = [0, 256], sizes = [16, 1024], strides = [1, 1]} : vector<16x1552xf32> to vector<16x1024xf32>
    %122 = vector.extract_strided_slice %110 {offsets = [0, 260], sizes = [16, 1024], strides = [1, 1]} : vector<16x1552xf32> to vector<16x1024xf32>
    %123 = vector.extract_strided_slice %110 {offsets = [0, 264], sizes = [16, 1024], strides = [1, 1]} : vector<16x1552xf32> to vector<16x1024xf32>
    %124 = vector.extract_strided_slice %110 {offsets = [0, 268], sizes = [16, 1024], strides = [1, 1]} : vector<16x1552xf32> to vector<16x1024xf32>
    %125 = vector.extract_strided_slice %110 {offsets = [0, 272], sizes = [16, 1024], strides = [1, 1]} : vector<16x1552xf32> to vector<16x1024xf32>
    %126 = vector.extract_strided_slice %110 {offsets = [0, 384], sizes = [16, 1024], strides = [1, 1]} : vector<16x1552xf32> to vector<16x1024xf32>
    %127 = vector.extract_strided_slice %110 {offsets = [0, 388], sizes = [16, 1024], strides = [1, 1]} : vector<16x1552xf32> to vector<16x1024xf32>
    %128 = vector.extract_strided_slice %110 {offsets = [0, 392], sizes = [16, 1024], strides = [1, 1]} : vector<16x1552xf32> to vector<16x1024xf32>
    %129 = vector.extract_strided_slice %110 {offsets = [0, 396], sizes = [16, 1024], strides = [1, 1]} : vector<16x1552xf32> to vector<16x1024xf32>
    %130 = vector.extract_strided_slice %110 {offsets = [0, 400], sizes = [16, 1024], strides = [1, 1]} : vector<16x1552xf32> to vector<16x1024xf32>
    %131 = vector.extract_strided_slice %110 {offsets = [0, 512], sizes = [16, 1024], strides = [1, 1]} : vector<16x1552xf32> to vector<16x1024xf32>
    %132 = vector.extract_strided_slice %110 {offsets = [0, 516], sizes = [16, 1024], strides = [1, 1]} : vector<16x1552xf32> to vector<16x1024xf32>
    %133 = vector.extract_strided_slice %110 {offsets = [0, 520], sizes = [16, 1024], strides = [1, 1]} : vector<16x1552xf32> to vector<16x1024xf32>
    %134 = vector.extract_strided_slice %110 {offsets = [0, 524], sizes = [16, 1024], strides = [1, 1]} : vector<16x1552xf32> to vector<16x1024xf32>
    %135 = vector.extract_strided_slice %110 {offsets = [0, 528], sizes = [16, 1024], strides = [1, 1]} : vector<16x1552xf32> to vector<16x1024xf32>
    %136 = tpu.concatenate %111, %112, %113, %114, %115, %116, %117, %118, %119, %120, %121, %122, %123, %124, %125, %126 in 0 : vector<16x1024xf32>, vector<16x1024xf32>, vector<16x1024xf32>, vector<16x1024xf32>, vector<16x1024xf32>, vector<16x1024xf32>, vector<16x1024xf32>, vector<16x1024xf32>, vector<16x1024xf32>, vector<16x1024xf32>, vector<16x1024xf32>, vector<16x1024xf32>, vector<16x1024xf32>, vector<16x1024xf32>, vector<16x1024xf32>, vector<16x1024xf32> -> vector<256x1024xf32>
    %137 = tpu.concatenate %127, %128, %129, %130, %131, %132, %133, %134, %135 in 0 : vector<16x1024xf32>, vector<16x1024xf32>, vector<16x1024xf32>, vector<16x1024xf32>, vector<16x1024xf32>, vector<16x1024xf32>, vector<16x1024xf32>, vector<16x1024xf32>, vector<16x1024xf32> -> vector<144x1024xf32>
    %138 = tpu.concatenate %136, %137 in 0 : vector<256x1024xf32>, vector<144x1024xf32> -> vector<400x1024xf32>
    %139 = arith.truncf %138 : vector<400x1024xf32> to vector<400x1024xbf16>
    %cst_24 = arith.constant dense<0.000000e+00> : vector<120x1024xf32>
    %140 = tpu.matmul %107, %139, %cst_24 {dimension_numbers = #tpu.dot_dimension_numbers<[1], [0], [0], [1], [0, 0, 1, 1], [], []>} : vector<120x400xbf16>, vector<400x1024xbf16>, vector<120x1024xf32> -> vector<120x1024xf32>
    %141 = vector.broadcast %108 : vector<120x1xf32> to vector<120x1024xf32>
    %142 = arith.addf %140, %141 : vector<120x1024xf32>
    %cst_25 = arith.constant 0.000000e+00 : f32
    %143 = vector.broadcast %cst_25 : f32 to vector<120x1024xf32>
    %144 = arith.cmpf ogt, %142, %143 : vector<120x1024xf32>
    %145 = vector.broadcast %3 : vector<1x1xf32> to vector<120x1024xf32>
    %146 = arith.mulf %145, %142 : vector<120x1024xf32>
    %147 = arith.select %144, %142, %146 : vector<120x1024xi1>, vector<120x1024xf32>
    %148 = vector.extract_strided_slice %147 {offsets = [0, 0], sizes = [120, 1], strides = [1, 1]} : vector<120x1024xf32> to vector<120x1xf32>
    %c0_26 = arith.constant 0 : index
    %c0_27 = arith.constant 0 : index
    %149 = vector.load %arg9[%c0_26, %c0_27] : memref<84x120xbf16, #tpu.memory_space<vmem>>, vector<84x120xbf16>
    %150 = arith.truncf %148 : vector<120x1xf32> to vector<120x1xbf16>
    %cst_28 = arith.constant dense<0.000000e+00> : vector<84x1xf32>
    %151 = tpu.matmul %149, %150, %cst_28 {dimension_numbers = #tpu.dot_dimension_numbers<[1], [0], [0], [1], [0, 0, 1, 1], [], []>} : vector<84x120xbf16>, vector<120x1xbf16>, vector<84x1xf32> -> vector<84x1xf32>
    %c0_29 = arith.constant 0 : index
    %c0_30 = arith.constant 0 : index
    %152 = vector.load %arg10[%c0_29, %c0_30] : memref<84x1xf32, #tpu.memory_space<vmem>>, vector<84x1xf32>
    %153 = arith.addf %151, %152 : vector<84x1xf32>
    %cst_31 = arith.constant 0.000000e+00 : f32
    %154 = vector.broadcast %cst_31 : f32 to vector<84x1xf32>
    %155 = arith.cmpf ogt, %153, %154 : vector<84x1xf32>
    %156 = vector.broadcast %4 : vector<1x1xf32> to vector<84x1xf32>
    %157 = arith.mulf %156, %153 : vector<84x1xf32>
    %158 = arith.select %155, %153, %157 : vector<84x1xi1>, vector<84x1xf32>
    %c0_32 = arith.constant 0 : index
    %c0_33 = arith.constant 0 : index
    %159 = vector.load %arg11[%c0_32, %c0_33] : memref<2x84xbf16, #tpu.memory_space<vmem>>, vector<2x84xbf16>
    %160 = arith.truncf %158 : vector<84x1xf32> to vector<84x1xbf16>
    %cst_34 = arith.constant dense<0.000000e+00> : vector<2x1xf32>
    %161 = tpu.matmul %159, %160, %cst_34 {dimension_numbers = #tpu.dot_dimension_numbers<[1], [0], [0], [1], [0, 0, 1, 1], [], []>} : vector<2x84xbf16>, vector<84x1xbf16>, vector<2x1xf32> -> vector<2x1xf32>
    %c0_35 = arith.constant 0 : index
    %c0_36 = arith.constant 0 : index
    %162 = vector.load %arg12[%c0_35, %c0_36] : memref<2x1xf32, #tpu.memory_space<vmem>>, vector<2x1xf32>
    %163 = arith.addf %161, %162 : vector<2x1xf32>
    %cst_37 = arith.constant 0.000000e+00 : f32
    %164 = vector.broadcast %cst_37 : f32 to vector<6x1xf32>
    %165 = tpu.concatenate %163, %164 in 0 : vector<2x1xf32>, vector<6x1xf32> -> vector<8x1xf32>
    %cst_38 = arith.constant 0.000000e+00 : f32
    %166 = vector.broadcast %cst_38 : f32 to vector<8x127xf32>
    %167 = tpu.concatenate %165, %166 in 1 : vector<8x1xf32>, vector<8x127xf32> -> vector<8x128xf32>
    %c0_39 = arith.constant 0 : index
    %c0_40 = arith.constant 0 : index
    %c0_41 = arith.constant 0 : index
    %168 = vector.load %arg13[%c0_39, %c0_40, %c0_41] : memref<1x8x128xf32, #tpu.memory_space<vmem>>, vector<1x8x128xf32>
    %169 = vector.shape_cast %168 : vector<1x8x128xf32> to vector<8x128xf32>
    %170 = vector.shape_cast %167 : vector<8x128xf32> to vector<1x8x128xf32>
    tpu.vector_store %arg13[%c0_39, %c0_40, %c0_41], %170 {strides = array<i32>} : memref<1x8x128xf32, #tpu.memory_space<vmem>>, vector<1x8x128xf32>,
    return
  }
  func.func @transform_0(%arg0: i32) -> (i32, i32, i32) {
    %c0_i32 = arith.constant 0 : i32
    %c0_i32_0 = arith.constant 0 : i32
    %c0_i32_1 = arith.constant 0 : i32
    return %arg0, %c0_i32, %c0_i32_0 : i32, i32, i32
  }
  func.func @transform_1(%arg0: i32) -> (i32, i32) {
    %c0_i32 = arith.constant 0 : i32
    %c0_i32_0 = arith.constant 0 : i32
    %c0_i32_1 = arith.constant 0 : i32
    return %c0_i32, %c0_i32_0 : i32, i32
  }
  func.func @transform_2(%arg0: i32) -> (i32, i32) {
    %c0_i32 = arith.constant 0 : i32
    %c0_i32_0 = arith.constant 0 : i32
    %c0_i32_1 = arith.constant 0 : i32
    return %c0_i32, %c0_i32_0 : i32, i32
  }
  func.func @transform_3(%arg0: i32) -> (i32, i32) {
    %c0_i32 = arith.constant 0 : i32
    %c0_i32_0 = arith.constant 0 : i32
    %c0_i32_1 = arith.constant 0 : i32
    return %c0_i32, %c0_i32_0 : i32, i32
  }
  func.func @transform_4(%arg0: i32) -> (i32, i32) {
    %c0_i32 = arith.constant 0 : i32
    %c0_i32_0 = arith.constant 0 : i32
    %c0_i32_1 = arith.constant 0 : i32
    return %c0_i32, %c0_i32_0 : i32, i32
  }
  func.func @transform_5(%arg0: i32) -> (i32, i32) {
    %c0_i32 = arith.constant 0 : i32
    %c0_i32_0 = arith.constant 0 : i32
    %c0_i32_1 = arith.constant 0 : i32
    return %c0_i32, %c0_i32_0 : i32, i32
  }
  func.func @transform_6(%arg0: i32) -> (i32, i32) {
    %c0_i32 = arith.constant 0 : i32
    %c0_i32_0 = arith.constant 0 : i32
    %c0_i32_1 = arith.constant 0 : i32
    return %c0_i32, %c0_i32_0 : i32, i32
  }
  func.func @transform_7(%arg0: i32) -> (i32, i32) {
    %c0_i32 = arith.constant 0 : i32
    %c0_i32_0 = arith.constant 0 : i32
    %c0_i32_1 = arith.constant 0 : i32
    return %c0_i32, %c0_i32_0 : i32, i32
  }
  func.func @transform_8(%arg0: i32) -> (i32, i32) {
    %c0_i32 = arith.constant 0 : i32
    %c0_i32_0 = arith.constant 0 : i32
    %c0_i32_1 = arith.constant 0 : i32
    return %c0_i32, %c0_i32_0 : i32, i32
  }
  func.func @transform_9(%arg0: i32) -> (i32, i32) {
    %c0_i32 = arith.constant 0 : i32
    %c0_i32_0 = arith.constant 0 : i32
    %c0_i32_1 = arith.constant 0 : i32
    return %c0_i32, %c0_i32_0 : i32, i32
  }
  func.func @transform_10(%arg0: i32) -> (i32, i32) {
    %c0_i32 = arith.constant 0 : i32
    %c0_i32_0 = arith.constant 0 : i32
    %c0_i32_1 = arith.constant 0 : i32
    return %c0_i32, %c0_i32_0 : i32, i32
  }
  func.func @transform_11(%arg0: i32) -> (i32, i32) {
    %c0_i32 = arith.constant 0 : i32
    %c0_i32_0 = arith.constant 0 : i32
    %c0_i32_1 = arith.constant 0 : i32
    return %c0_i32, %c0_i32_0 : i32, i32
  }
  func.func @transform_12(%arg0: i32) -> (i32, i32, i32) {
    %c0_i32 = arith.constant 0 : i32
    %c0_i32_0 = arith.constant 0 : i32
    %c0_i32_1 = arith.constant 0 : i32
    return %arg0, %c0_i32, %c0_i32_0 : i32, i32, i32
  }
}

</mosaic_0001>

<bundles_post_ra>
// kernel: lenet5_forward.1
= control target key start
LH: loop header
LB: loop body
LE: loop exit
PB: predicated region body
PF: predicated region fallthrough
CT: control target
= control target key end

     0   :  { %s5903_s21 = smov 0   ;;  %s10154_s0 = inlined_call_operand.vmem [shape: f32[2,3,1024], index: 0, kind: input, shape index: {}]   ;;  %s10155_s1 = inlined_call_operand.vmem [shape: f32[1,4], index: 1, kind: input, shape index: {}]   ;;  %s10156_s2 = inlined_call_operand.vmem [shape: bf16[6,75], index: 2, kind: input, shape index: {}]   ;;  %s10157_s3 = inlined_call_operand.vmem [shape: f32[6,1], index: 3, kind: input, shape index: {}]   ;;  %s10158_s4 = inlined_call_operand.vmem [shape: bf16[16,150], index: 4, kind: input, shape index: {}]   ;;  %s10159_s5 = inlined_call_operand.vmem [shape: f32[16,1], index: 5, kind: input, shape index: {}]   ;;  %s10160_s6 = inlined_call_operand.vmem [shape: bf16[120,400], index: 6, kind: input, shape index: {}]   ;;  %s10161_s7 = inlined_call_operand.vmem [shape: f32[120,1], index: 7, kind: input, shape index: {}]   ;;  %s10162_s8 = inlined_call_operand.vmem [shape: bf16[84,120], index: 8, kind: input, shape index: {}]   ;;  %s10163_s9 = inlined_call_operand.vmem [shape: f32[84,1], index: 9, kind: input, shape index: {}]   ;;  %s10164_s10 = inlined_call_operand.vmem [shape: bf16[2,84], index: 10, kind: input, shape index: {}]   ;;  %s10165_s11 = inlined_call_operand.vmem [shape: f32[2,1], index: 11, kind: input, shape index: {}]   ;;  %s10166_s12 = inlined_call_operand.vmem [shape: f32[2,8,128], index: 12, kind: output, shape index: {}]  }
   0x1 LB: > { %s4352_s22 = sadd.s32 4294967295, %s5805_s21   ;;  %p4356_p0 = scmp.ge.s32.totalorder %s5805_s21, 1  ;;  %s5805_s21 = sphi %s5903_s21, %s22_s21  }
   0x2   : > { %p362_p1 = scmp.lt.s32.totalorder %s5805_s21, 3 }
   0x4   : > { %p363_p2 = pnand %p4356_p0, %p362_p1 }
   0x6   : > { %366 = sbr.rel (%p363_p2) target bundleno = 2911 (0xb5f), region = 68 }
   0xb   : > { %p403_p3 = scmp.lt.s32.totalorder %s4352_s22, 1  ;;  %v10167_v0 = vmov 0.0   ;;  %s5808_s23 = smov 127   ;;  %vm10230_vm0 = vcmask 1039360   ;;  %vm10259_vm1 = vcmask 1042432   ;;  %vm10228_vm2 = vcmask 1031168  }
   0xc   : > { %v456_v1 = vrot.slane %v10167_v0, 5  ;;  %s5809_s28 = smov 126   ;;  %s5810_s29 = smov 96   ;;  %vm1045_vm3 = vcmask 1045504   ;;  %vm10246_vm4 = vcmask 760832   ;;  %vm10239_vm5 = vcmask 785408  }
   0xd   : > { %s10996_s22 = smov (!%p403_p3, %s4352_s22), 1  ;;  %s5811_s30 = smov 95   ;;  %vm10242_vm6 = vcmask 777216   ;;  %vm1081_vm7 = vcmask 1041408   ;;  %vm10231_vm8 = vcmask 769024   ;;  %vm1090_vm9 = vcmask 1044480  }
   0xe   : > { %473 = vrot.lane.b32.xlu2 %v456_v1, %s5808_s23  ;;  %s4533_s24 = sshll.u32 %s10996_s22, 5  ;;  %s5812_s13 = smov 93   ;;  %vm563_vm10 = vcmask 1022976   ;;  %vm1054_vm11 = vcmask 1040384   ;;  %vm1174_vm12 = vcmask 793600   ;;  %vm1063_vm13 = vcmask 1043456  }
   0xf   : > { %s407_s27 = scalar_lea.vmem %s10154_s0, %s4533_s24  ;;  %s5813_s14 = smov 94   ;;  %vm1072_vm14 = vcmask 1046528   ;;  %vm879_vm15 = vcmask 515072  }
  0x10   : > { %v417_v2 = vld [vmem:[%s407_s27 + $0x18] sm:$0x77]  ;;  %v416_v3 = vld [vmem:[%s407_s27 + $0x10] sm:$0x77]  ;;  %v414_v4 = vld [vmem:[%s407_s27] sm:$0x77] }
  0x11   : > { %430 = vst [vmem:[#allocation1 + $0x30] ss:$2 sm:$0xff] %v417_v2  ;;  %v415_v5 = vld [vmem:[%s407_s27 + $0x8] sm:$0x77]  ;;  %s5814_s15 = smov 125   ;;  %s5815_s16 = smov 97  }
  0x12   : > { %428 = vst [vmem:[#allocation1 + $0x20] ss:$2 sm:$0xff] %v416_v3  ;;  %s5816_s17 = smov 63   ;;  %s5817_s18 = smov 64  }
  0x13   : > { %424 = vst [vmem:[#allocation1] ss:$2 sm:$0xff] %v414_v4  ;;  %s5818_s19 = smov 62   ;;  %s5819_s20 = smov 60  }
  0x14   : > { %426 = vst [vmem:[#allocation1 + $0x10] ss:$2 sm:$0xff] %v415_v5  ;;  %s5820_s24 = smov 61   ;;  %s5821_s25 = smov 32  }
  0x15   : > { %s5822_s26 = smov 124   ;;  %s5823_s27 = smov 92  }
  0x18   : > { %v5919_v6 = vld.sshfl [vmem:[#allocation1 + $0x38] sm:$0xff pattern:$0x75316420]  ;;  %v5927_v11 = vld.sshfl [vmem:[#allocation1 + $0x30] sm:$0xff pattern:$0x75316420] }
  0x19   : > { %v455_v7 = vrot.slane %v5919_v6, 5  ;;  %v5922_v8 = vld.sshfl [vmem:[#allocation1 + $0x20] sm:$0xff pattern:$0x75316420]  ;;  %v10177_v25 = vrot.slane %v5927_v11, 5  ;;  %v630_v61 = vrot.slane %v5927_v11, 1 }
  0x1a   : > { %v5924_v9 = vld.sshfl [vmem:[#allocation1 + $0x28] sm:$0xff pattern:$0x75316420]  ;;  %v10188_v10 = vrot.slane %v5922_v8, 5  ;;  %v496_v33 = vrot.slane %v5922_v8, 2  ;;  %v10182_v35 = vrot.slane %v5922_v8, 6 }
  0x1b   : > { %v5929_v12 = vpack.i.bf16 %v456_v1, %v455_v7  ;;  %v10170_v13 = vrot.slane %v5924_v9, 5  ;;  %v5932_v14 = vld.sshfl [vmem:[#allocation1] sm:$0xff pattern:$0x75316420]  ;;  %v4623_v30 = vpack.i.bf16 %v455_v7, %v10177_v25  ;;  %v10171_v34 = vrot.slane %v5924_v9, 2 }
  0x1c   : > { %v5934_v15 = vld.sshfl [vmem:[#allocation1 + $0x8] sm:$0xff pattern:$0x75316420]  ;;  %v492_v16 = vrot.slane %v5932_v14, 2  ;;  %v10187_v17 = vrot.slane %v5932_v14, 5  ;;  %v10173_v36 = vrot.slane %v5924_v9, 6  ;;  %v4678_v1 = vpack.i.bf16 %v5924_v9, %v5922_v8 }
  0x1d   : > { %v4618_v18 = vpack.i.bf16 %v10170_v13, %v10188_v10  ;;  %v10184_v19 = vrot.slane %v5934_v15, 2  ;;  %v10178_v20 = vrot.slane %v5934_v15, 5  ;;  %v5944_v21 = vld.sshfl [vmem:[#allocation1 + $0x10] sm:$0xff pattern:$0x75316420]  ;;  %v4638_v39 = vpack.i.bf16 %v10171_v34, %v496_v33 }
  0x1e   : > { %v5946_v22 = vld.sshfl [vmem:[#allocation1 + $0x18] sm:$0xff pattern:$0x75316420]  ;;  %v626_v26 = vrot.slane %v5944_v21, 1  ;;  %v450_v28 = vrot.slane %v5944_v21, 5  ;;  %v494_v37 = vrot.slane %v5944_v21, 2  ;;  %v4658_v40 = vpack.i.bf16 %v10173_v36, %v10182_v35 }
  0x1f   : > { %4619 = vrot.lane.b32.xlu1 %v4618_v18, %s5808_s23  ;;  %v4628_v23 = vpack.i.bf16 %v10184_v19, %v492_v16  ;;  %v4608_v24 = vpack.i.bf16 %v10178_v20, %v10187_v17  ;;  %v627_v27 = vrot.slane %v5946_v22, 1  ;;  %v451_v29 = vrot.slane %v5946_v22, 5 }
  0x20   : > { %v495_v38 = vrot.slane %v5946_v22, 2  ;;  %v670_v42 = vrot.slane %v5944_v21, 6  ;;  %v671_v43 = vrot.slane %v5946_v22, 6  ;;  %v10191_v44 = vrot.slane %v5922_v8, 1 }
  0x21   : > { %4629 = vrot.lane.b32.xlu2 %v4628_v23, %s5809_s28  ;;  %4609 = vrot.lane.b32.xlu0 %v4608_v24, %s5808_s23  ;;  %v5966_v31 = vpack.i.bf16 %v627_v27, %v626_v26  ;;  %v5968_v32 = vpack.i.bf16 %v451_v29, %v450_v28  ;;  %v10169_v45 = vrot.slane %v5924_v9, 1  ;;  %v4673_v47 = vpack.i.bf16 %v5946_v22, %v5944_v21 }
  0x22   : > { %v5989_v41 = vpack.i.bf16 %v495_v38, %v494_v37  ;;  %v5999_v46 = vpack.i.bf16 %v671_v43, %v670_v42  ;;  %v10189_v49 = vrot.slane %v5922_v8, 3  ;;  %v10172_v50 = vrot.slane %v5924_v9, 3 }
  0x23   : > { %v4648_v48 = vpack.i.bf16 %v10169_v45, %v10191_v44  ;;  %v10186_v51 = vrot.slane %v5922_v8, 7  ;;  %v10174_v52 = vrot.slane %v5924_v9, 7  ;;  %v714_v53 = vrot.slane %v5944_v21, 3 }
  0x24   : > { %v715_v54 = vrot.slane %v5946_v22, 3  ;;  %v4668_v55 = vpack.i.bf16 %v10172_v50, %v10189_v49  ;;  %v538_v58 = vrot.slane %v5944_v21, 7  ;;  %v539_v59 = vrot.slane %v5946_v22, 7 }
  0x25   : > { %v4688_v56 = vpack.i.bf16 %v10174_v52, %v10186_v51  ;;  %v625_v60 = vrot.slane %v5934_v15, 1  ;;  %v10194_v2 = vrot.slane %v5922_v8, 4  ;;  %v6045_v3 = vrot.slane %v5924_v9, 4 }
  0x26   : > { %v6025_v57 = vpack.i.bf16 %v715_v54, %v714_v53  ;;  %v6035_v62 = vpack.i.bf16 %v539_v59, %v538_v58  ;;  %v582_v4 = vrot.slane %v5944_v21, 4  ;;  %v583_v5 = vrot.slane %v5946_v22, 4 }
  0x27   : > { %4624 = vrot.lane.b32.xlu1 %v4623_v30, %s5808_s23  ;;  %v6037_v63 = vpack.i.bf16 %v630_v61, %v625_v60  ;;  %v4698_v7 = vpack.i.bf16 %v6045_v3, %v10194_v2  ;;  %v4718_v18 = vpack.i.bf16 %v5927_v11, %v5934_v15  ;;  %v713_v24 = vrot.slane %v5934_v15, 3 }
  0x28   : > { %v6057_v23 = vpack.i.bf16 %v583_v5, %v582_v4  ;;  %v718_v26 = vrot.slane %v5927_v11, 3  ;;  %v631_v27 = vrot.slane %v5919_v6, 1  ;;  %v632_v28 = vrot.slane %v10167_v0, 1 }
  0x29   : > { %4644 = vrot.lane.b32.xlu2 %v5966_v31, %s5810_s29  ;;  %4614 = vrot.lane.b32.xlu0 %v5968_v32, %s5808_s23  ;;  %v669_v29 = vrot.slane %v5934_v15, 6  ;;  %v674_v30 = vrot.slane %v5927_v11, 6  ;;  %v586_v42 = vrot.slane %v5927_v11, 4  ;;  %v10185_v43 = vrot.slane %v5932_v14, 7 }
  0x2a   : > { %v6069_v37 = vpack.i.bf16 %v718_v26, %v713_v24  ;;  %v6071_v38 = vpack.i.bf16 %v632_v28, %v631_v27  ;;  %v4748_v53 = vpack.i.bf16 0.0, %v5919_v6  ;;  %v10179_v58 = vrot.slane %v5927_v11, 7 }
  0x2b   : > { %v10176_v59 = vrot.slane %v5919_v6, 7  ;;  %v675_v60 = vrot.slane %v5919_v6, 6  ;;  %v6102_v61 = vrot.slane %v10167_v0, 6  ;;  %v6121_v24 = vrot.slane %v10167_v0, 2 }
  0x2c   : > { %v587_v27 = vrot.slane %v5919_v6, 4  ;;  %v6131_v28 = vrot.slane %v10167_v0, 4 }
  0x2d   : > { %10412 = vst [vmem:[#allocation2_spill] sm:$0xff] %v6102_v61  ;;  %v4758_v4 = vpack.i.bf16 %v10176_v59, %v10179_v58  ;;  %v6111_v5 = vpack.i.bf16 %v6102_v61, %v675_v60 }
  0x2e   : > { %10413 = vst [vmem:[#allocation3_spill] sm:$0xff] %v6121_v24 }
  0x2f   : > { %4639 = vrot.lane.b32.xlu1 %v4638_v39, %s5809_s28  ;;  %v6073_v39 = vpack.i.bf16 %v674_v30, %v669_v29  ;;  %10414 = vst [vmem:[#allocation4_spill] sm:$0xff] %v6131_v28  ;;  %v6137_v30 = vpack.i.bf16 %v6131_v28, %v587_v27 }
  0x31   : > { %4659 = vrot.lane.b32.xlu2 %v4658_v40, %s5811_s30  ;;  %4634 = vrot.lane.b32.xlu0 %v5989_v41, %s5809_s28  ;;  %v581_v40 = vrot.slane %v5934_v15, 4 }
  0x37   : > { %4654 = vrot.lane.b32.xlu1 %v5999_v46, %s5811_s30 }
  0x39   : > { %4674 = vrot.lane.b32.xlu2 %v4673_v47, %s5812_s13  ;;  %4649 = vrot.lane.b32.xlu0 %v4648_v48, %s5810_s29  ;;  %v10180_v47 = vrot.slane %v5934_v15, 7  ;;  %v6085_v48 = vpack.i.bf16 %v586_v42, %v581_v40  ;;  %v6140_v40 = vrot.slane %v10167_v0, 7 }
  0x3b   : > { %v4723_v54 = vpack.i.bf16 %v10180_v47, %v10185_v43 }
  0x3f   : > { %4669 = vrot.lane.b32.xlu1 %v4668_v55, %s5813_s14  ;;  %v719_v55 = vrot.slane %v5919_v6, 3 }
  0x41   : > { %4689 = vrot.lane.b32.xlu2 %v4688_v56, %s5814_s15  ;;  %4664 = vrot.lane.b32.xlu0 %v6025_v57, %s5813_s14  ;;  %v720_v56 = vrot.slane %v10167_v0, 3 }
  0x47   : > { %4684 = vrot.lane.b32.xlu1 %v6035_v62, %s5814_s15 }
  0x49   : > { %4704 = vrot.lane.b32.xlu2 %v6037_v63, %s5810_s29  ;;  %4679 = vrot.lane.b32.xlu0 %v4678_v1, %s5812_s13  ;;  %v6104_v1 = vpack.i.bf16 %v720_v56, %v719_v55 }
  0x4f   : > { %4699 = vrot.lane.b32.xlu1 %v4698_v7, %s5815_s16  ;;  %v10183_v7 = vrot.slane %v5927_v11, 2 }
  0x51   : > { %4719 = vrot.lane.b32.xlu2 %v4718_v18, %s5812_s13  ;;  %4694 = vrot.lane.b32.xlu0 %v6057_v23, %s5815_s16  ;;  %v10175_v18 = vrot.slane %v5919_v6, 2 }
  0x53   : > { %v4753_v26 = vpack.i.bf16 %v10175_v18, %v10183_v7 }
  0x57   : > { %4714 = vrot.lane.b32.xlu1 %v6069_v37, %s5813_s14 }
  0x59   : > { %4734 = vrot.lane.b32.xlu2 %v6071_v38, %s5810_s29  ;;  %4709 = vrot.lane.b32.xlu0 %v6073_v39, %s5811_s30 }
  0x5f   : > { %4729 = vrot.lane.b32.xlu1 %v6085_v48, %s5815_s16 }
  0x61   : > { %4749 = vrot.lane.b32.xlu2 %v4748_v53, %s5812_s13  ;;  %4724 = vrot.lane.b32.xlu0 %v4723_v54, %s5814_s15 }
  0x67   : > { %4744 = vrot.lane.b32.xlu1 %v6104_v1, %s5813_s14 }
  0x68   : > { %v6134_v29 = vpop.permute.xlu2 %473 }
  0x69   : > { %4759 = vrot.lane.b32.xlu2 %v4758_v4, %s5814_s15  ;;  %4739 = vrot.lane.b32.xlu0 %v6111_v5, %s5811_s30 }
  0x6f   : > { %517 = vrot.lane.b32.xlu1 %v6121_v24, %s5809_s28 }
  0x71   : > { %4754 = vrot.lane.b32.xlu0 %v4753_v26, %s5809_s28  ;;  %4779 = vrot.lane.b32.xlu2 %v6057_v23, %s5818_s19 }
  0x77   : > { %4764 = vrot.lane.b32.xlu1 %v6137_v30, %s5815_s16  ;;  %s5824_s16 = smov 31  }
  0x79   : > { %561 = vrot.lane.b32.xlu0 %v6140_v40, %s5814_s15  ;;  %4794 = vrot.lane.b32.xlu2 %v6025_v57, %s5821_s25 }
  0x7b   : > { %v6146_v42 = vpop.permute.xlu2 %4629 }
  0x7f   : > { %4774 = vrot.lane.b32.xlu1 %v6035_v62, %s5816_s17 }
  0x81   : > { %4769 = vrot.lane.b32.xlu0 %v5989_v41, %s5817_s18 }
  0x83   : > { %v6154_v53 = vpop.permute.xlu2 %4644 }
  0x87   : > { %4789 = vrot.lane.b32.xlu1 %v5999_v46, %s5819_s20 }
  0x89   : > { %4784 = vrot.lane.b32.xlu0 %v5966_v31, %s5820_s24  ;;  %v4808_v31 = vpack.i.bf16 %v492_v16, %v496_v33 }
  0x8b   : > { %v6162_v62 = vpop.permute.xlu2 %4659 }
  0x8c   : > { %v10197_v44 = vunpack.i.h.bf16 %v6162_v62 }
  0x8f   : > { %4804 = vrot.lane.b32.xlu1 %v6057_v23, %s5822_s26 }
  0x91   : > { %4799 = vrot.lane.b32.xlu0 %v5968_v32, %s5823_s27  ;;  %v6168_v41 = vpop.permute.xlu1 %4619 }
  0x92   : > { %v10198_v60 = vunpack.i.l.bf16 %v6168_v41 }
  0x93   : > { %v6170_v46 = vpop.permute.xlu2 %4674  ;;  %v6172_v54 = vpop.permute.xlu0 %4609 }
  0x99   : > { %v6178_v57 = vpop.permute.xlu1 %4624  ;;  %4809 = vrot.lane.b32.xlu0 %v4808_v31, %s5817_s18 }
  0x9b   : > { %v6181_v23 = vpop.permute.xlu2 %4689  ;;  %v6183_v55 = vpop.permute.xlu0 %4614 }
  0x9c   : > { %v4617_v32 = vunpack.i.h.bf16 %v6183_v55  ;;  %v10181_v56 = vunpack.i.l.bf16 %v6183_v55 }
  0x9e   : > { %v479_v16 = vsel %vm10230_vm0, %v4617_v32, %v10198_v60  ;;  %v478_v33 = vsel %vm10230_vm0, %v10181_v56, %v4617_v32 }
  0x9f   : > { %v1039_v34 = vsel %vm10259_vm1, %v5944_v21, %v478_v33  ;;  %v1040_v50 = vsel %vm10259_vm1, %v5946_v22, %v479_v16  ;;  %v10193_v16 = vunpack.i.l.bf16 %v6154_v53  ;;  %v4661_v33 = vunpack.i.l.bf16 %v6162_v62 }
  0xa1   : > { %v6188_v4 = vpop.permute.xlu1 %4639 }
  0xa2   : > { %v10196_v26 = vunpack.i.l.bf16 %v6188_v4  ;;  %v10428_v61 = vunpack.i.l.bf16 %v6188_v4 }
  0xa3   : > { %v6197_v27 = vpop.permute.xlu2 %4704  ;;  %v6199_v31 = vpop.permute.xlu0 %4634 }
  0xa4   : > { %v4637_v0 = vunpack.i.h.bf16 %v6199_v31  ;;  %v10190_v45 = vunpack.i.l.bf16 %v6199_v31 }
  0xa6   : > { %v6206_v13 = vsel %vm10228_vm2, %v10190_v45, %v4637_v0  ;;  %v6211_v32 = vsel %vm10228_vm2, %v4637_v0, %v10196_v26  ;;  %v4676_v0 = vunpack.i.l.bf16 %v6170_v46 }
  0xa7   : > { %v6219_v36 = vsel %vm1045_vm3, %v1039_v34, %v6206_v13  ;;  %v6223_v52 = vsel %vm1045_vm3, %v1040_v50, %v6211_v32  ;;  %v4647_v50 = vunpack.i.h.bf16 %v6154_v53 }
  0xa8   : > { %10415 = vst [vmem:[#allocation5_spill] sm:$0xff] %v6219_v36  ;;  %v4828_v18 = vpack.i.bf16 %v6223_v52, %v6219_v36  ;;  %v10432_v36 = vrot.slane %v5922_v8, 4 }
  0xa9   : > { %10416 = vst [vmem:[#allocation6_spill] sm:$0xff] %v6223_v52  ;;  %v6227_v59 = vpop.permute.xlu1 %4654  ;;  %v6256_v35 = vsel %vm10239_vm5, %v10193_v16, %v4647_v50 }
  0xaa   : > { %4829 = vrot.lane.b32.xlu1 %v4828_v18, %s5824_s16  ;;  %v4657_v18 = vunpack.i.h.bf16 %v6227_v59  ;;  %v10192_v20 = vunpack.i.l.bf16 %v6227_v59 }
  0xab   : > { %v6231_v21 = vpop.permute.xlu2 %4719  ;;  %v6233_v22 = vpop.permute.xlu0 %4649 }
  0xac   : > { %v6236_v34 = vunpack.i.l.bf16 %v6231_v21  ;;  %v4651_v58 = vunpack.i.l.bf16 %v6233_v22  ;;  %v698_v19 = vsel %vm10242_vm6, %v10192_v20, %v4657_v18  ;;  %v699_v43 = vsel %vm10242_vm6, %v4657_v18, %v4661_v33 }
  0xad   : > { %v1084_v18 = vsel %vm1081_vm7, %v6256_v35, %v698_v19  ;;  %v10199_v20 = vunpack.i.h.bf16 %v6233_v22  ;;  %v4677_v19 = vunpack.i.h.bf16 %v6170_v46 }
  0xae   : > { %10417 = vst [vmem:[#allocation7_spill] sm:$0xff] %v6236_v34  ;;  %v6243_v25 = vsel %vm10246_vm4, %v6236_v34, %v4676_v0  ;;  %v6264_v51 = vsel %vm10239_vm5, %v4647_v50, %v4651_v58 }
  0xaf   : > { %10418 = vst [vmem:[#allocation8_spill] sm:$0xff] %v6243_v25  ;;  %v4818_v47 = vpack.i.bf16 %v6243_v25, %v6236_v34  ;;  %v1085_v50 = vsel %vm1081_vm7, %v6264_v51, %v699_v43  ;;  %v700_v43 = vsel %vm10242_vm6, %v4661_v33, %v10197_v44 }
  0xb1   : > { %4819 = vrot.lane.b32.xlu2 %v4818_v47, %s5824_s16  ;;  %v6251_v56 = vpop.permute.xlu1 %4669 }
  0xb2   : > { %v4671_v7 = vunpack.i.l.bf16 %v6251_v56 }
  0xb3   : > { %v6266_v47 = vpop.permute.xlu0 %4664 }
  0xb4   : > { %v4667_v17 = vunpack.i.h.bf16 %v6266_v47  ;;  %v10195_v10 = vunpack.i.l.bf16 %v6266_v47 }
  0xb6   : > { %v742_v49 = vsel %vm10231_vm8, %v10195_v10, %v4667_v17  ;;  %v743_v45 = vsel %vm10231_vm8, %v4667_v17, %v4671_v7  ;;  %v10200_v10 = vunpack.i.h.bf16 %v6251_v56 }
  0xb7   : > { %v6281_v16 = vsel %vm1090_vm9, %v1084_v18, %v742_v49  ;;  %v6284_v2 = vsel %vm1090_vm9, %v1085_v50, %v743_v45  ;;  %v6299_v45 = vsel %vm10239_vm5, %v4651_v58, %v10199_v20  ;;  %v4691_v50 = vunpack.i.l.bf16 %v6181_v23 }
  0xb8   : > { %10419 = vst [vmem:[#allocation9_spill] sm:$0xff] %v6284_v2  ;;  %v4823_v17 = vpack.i.bf16 %v6284_v2, %v6281_v16  ;;  %v6313_v58 = vsel %vm10246_vm4, %v4676_v0, %v4677_v19  ;;  %v1086_v20 = vsel %vm1081_vm7, %v6299_v45, %v700_v43  ;;  %v10425_v0 = vunpack.i.l.bf16 %v6168_v41 }
  0xb9   : > { %v6290_v26 = vpop.permute.xlu1 %4684  ;;  %10420 = vst [vmem:[#allocation10_spill] sm:$0xff] %v6299_v45  ;;  %v10426_v43 = vunpack.i.h.bf16 %v6181_v23 }
  0xba   : > { %4824 = vrot.lane.b32.xlu2 %v4823_v17, %s5824_s16  ;;  %v744_v17 = vsel %vm10231_vm8, %v4671_v7, %v10200_v10  ;;  %v10424_v10 = vunpack.i.h.bf16 %v6168_v41  ;;  %v10431_v52 = vunpack.i.l.bf16 %v6290_v26 }
  0xbb   : > { %v6301_v49 = vpop.permute.xlu0 %4679  ;;  %v6326_v7 = vsel %vm1090_vm9, %v1086_v20, %v744_v17  ;;  %v580_v17 = vrot.slane %v5932_v14, 4 }
  0xbc   : > { %v10203_v44 = vunpack.i.h.bf16 %v6301_v49  ;;  %v4681_v60 = vunpack.i.l.bf16 %v6301_v49  ;;  %10423 = vst [vmem:[#allocation13_spill] sm:$0xff] %v6326_v7  ;;  %v480_v33 = vsel %vm10230_vm0, %v10425_v0, %v10424_v10  ;;  %v4687_v0 = vunpack.i.h.bf16 %v6290_v26 }
  0xbe   : > { %v6318_v46 = vsel %vm10246_vm4, %v4677_v19, %v4681_v60  ;;  %v6323_v18 = vsel %vm10246_vm4, %v4681_v60, %v10203_v44  ;;  %v568_v19 = vsel %vm563_vm10, %v4691_v50, %v10426_v43  ;;  %v10427_v44 = vunpack.i.h.bf16 %v6188_v4 }
  0xbf   : > { %10421 = vst [vmem:[#allocation11_spill] sm:$0xff] %v6318_v46  ;;  %v4813_v28 = vpack.i.bf16 %v6318_v46, %v6313_v58  ;;  %v4833_v60 = vpack.i.bf16 %v6323_v18, %v6326_v7  ;;  %v566_v2 = vsel %vm563_vm10, %v10431_v52, %v4687_v0  ;;  %v567_v46 = vsel %vm563_vm10, %v4687_v0, %v4691_v50 }
  0xc0   : > { %10422 = vst [vmem:[#allocation12_spill] sm:$0xff] %v6323_v18  ;;  %v524_v10 = vsel %vm10228_vm2, %v10428_v61, %v10427_v44  ;;  %v1041_v61 = vsel %vm10259_vm1, %v5922_v8, %v480_v33  ;;  %v6375_v33 = vpack.i.bf16 %v580_v17, %v10432_v36  ;;  %v6390_v36 = vsel %vm1054_vm11, %v6206_v13, %v566_v2 }
  0xc1   : > { %v6340_v20 = vpop.permute.xlu1 %4699  ;;  %4814 = vrot.lane.b32.xlu0 %v4813_v28, %s5824_s16  ;;  %v6361_v43 = vsel %vm1054_vm11, %v524_v10, %v568_v19  ;;  %v6394_v50 = vsel %vm1054_vm11, %v6211_v32, %v567_v46  ;;  %v10434_v46 = vunpack.i.h.bf16 %v6233_v22 }
  0xc2   : > { %4834 = vrot.lane.b32.xlu2 %v4833_v60, %s5824_s16  ;;  %v4702_v7 = vunpack.i.h.bf16 %v6340_v20  ;;  %v4701_v18 = vunpack.i.l.bf16 %v6340_v20  ;;  %10429 = vst [vmem:[#allocation14_spill] sm:$0xff] %v6361_v43  ;;  %v6365_v60 = vsel %vm1045_vm3, %v1041_v61, %v524_v10 }
  0xc3   : > { %v6354_v34 = vpop.permute.xlu0 %4694  ;;  %10430 = vst [vmem:[#allocation15_spill] sm:$0xff] %v6365_v60 }
  0xc4   : > { %v1178_v25 = vsel %vm1174_vm12, %v4701_v18, %v4702_v7  ;;  %v4697_v44 = vunpack.i.h.bf16 %v6354_v34  ;;  %v4696_v28 = vunpack.i.l.bf16 %v6354_v34 }
  0xc5   : > { %v1204_v20 = vsel %vm1063_vm13, %v6361_v43, %v1178_v25  ;;  %v10214_v25 = vunpack.i.h.bf16 %v6197_v27  ;;  %v6384_v43 = vunpack.i.l.bf16 %v6197_v27 }
  0xc6   : > { %v1213_v19 = vsel %vm1072_vm14, %v1204_v20, %v6299_v45  ;;  %v1177_v34 = vsel %vm1174_vm12, %v4697_v44, %v4701_v18  ;;  %v1176_v10 = vsel %vm1174_vm12, %v4696_v28, %v4697_v44  ;;  %v10437_v18 = vunpack.i.h.bf16 %v6251_v56 }
  0xc7   : > { %v4858_v61 = vpack.i.bf16 %v1213_v19, %v6365_v60  ;;  %v1202_v13 = vsel %vm1063_vm13, %v6390_v36, %v1176_v10  ;;  %v1203_v2 = vsel %vm1063_vm13, %v6394_v50, %v1177_v34  ;;  %v6415_v44 = vsel %vm10239_vm5, %v10434_v46, %v10214_v25 }
  0xc8   : > { %v1211_v34 = vsel %vm1072_vm14, %v1202_v13, %v6256_v35  ;;  %v1212_v22 = vsel %vm1072_vm14, %v1203_v2, %v6264_v51  ;;  %v10436_v46 = vunpack.i.l.bf16 %v6266_v47  ;;  %v10439_v60 = vunpack.i.l.bf16 %v6227_v59 }
  0xc9   : > { %v6386_v52 = vpop.permute.xlu1 %4714  ;;  %4859 = vrot.lane.b32.xlu0 %v4858_v61, %s5824_s16  ;;  %v10435_v61 = vunpack.i.l.bf16 %v6154_v53  ;;  %v10440_v2 = vrot.slane %v5922_v8, 1 }
  0xca   : > { %4849 = vrot.lane.b32.xlu2 %v6375_v33, %s5818_s19  ;;  %v10217_v17 = vunpack.i.h.bf16 %v6386_v52  ;;  %v6401_v0 = vunpack.i.l.bf16 %v6386_v52 }
  0xcb   : > { %v6408_v32 = vpop.permute.xlu0 %4709  ;;  %v6425_v10 = vsel %vm10239_vm5, %v6384_v43, %v10435_v61  ;;  %v10438_v61 = vunpack.i.h.bf16 %v6162_v62 }
  0xcc   : > { %10433 = vst [vmem:[#allocation16_spill] sm:$0xff] %v6401_v0  ;;  %v10218_v20 = vunpack.i.h.bf16 %v6408_v32  ;;  %v6419_v19 = vunpack.i.l.bf16 %v6408_v32  ;;  %v741_v25 = vsel %vm10231_vm8, %v6401_v0, %v10436_v46  ;;  %v745_v53 = vsel %vm10231_vm8, %v10437_v18, %v10217_v17 }
  0xcd   : > { %v10441_v46 = vrot.slane %v5932_v14, 1 }
  0xce   : > { %v701_v13 = vsel %vm10242_vm6, %v10438_v61, %v10218_v20  ;;  %v697_v47 = vsel %vm10242_vm6, %v6419_v19, %v10439_v60  ;;  %v1218_v56 = vsel %vm1081_vm7, %v6384_v43, %v6419_v19  ;;  %v4853_v61 = vpack.i.bf16 %v1212_v22, %v1211_v34 }
  0xcf   : > { %v4863_v45 = vpack.i.bf16 %v10441_v46, %v10440_v2  ;;  %v1083_v18 = vsel %vm1081_vm7, %v6425_v10, %v697_v47  ;;  %v1220_v62 = vsel %vm1090_vm9, %v1218_v56, %v6401_v0  ;;  %v1087_v59 = vsel %vm1081_vm7, %v6415_v44, %v701_v13 }
  0xd0   : > { %v6463_v60 = vsel %vm1090_vm9, %v1083_v18, %v741_v25  ;;  %v6466_v17 = vsel %vm1090_vm9, %v1087_v59, %v745_v53  ;;  %v4632_v2 = vunpack.i.h.bf16 %v6146_v42  ;;  %v4631_v46 = vunpack.i.l.bf16 %v6146_v42 }
  0xd1   : > { %v6470_v20 = vpop.permute.xlu1 %4729  ;;  %v4838_v47 = vpack.i.bf16 %v6463_v60, %v1220_v62  ;;  %4864 = vrot.lane.b32.xlu0 %v4863_v45, %s5820_s24  ;;  %v10442_v62 = vunpack.i.l.bf16 %v6199_v31  ;;  %v10443_v59 = vunpack.i.l.bf16 %v6290_v26  ;;  %v10445_v0 = vrot.slane %v5932_v14, 3 }
  0xd2   : > { %4854 = vrot.lane.b32.xlu2 %v4853_v61, %s5824_s16  ;;  %v10220_v56 = vunpack.i.h.bf16 %v6470_v20  ;;  %v4731_v34 = vunpack.i.l.bf16 %v6470_v20  ;;  %v520_v18 = vsel %vm10228_vm2, %v4631_v46, %v4632_v2  ;;  %v10449_v26 = vrot.slane %v5932_v14, 7 }
  0xd3   : > { %v4725_v22 = vpop.permute.xlu0 %4724  ;;  %4839 = vrot.lane.b32.xlu1 %v4838_v47, %s5824_s16  ;;  %v521_v45 = vsel %vm10228_vm2, %v4632_v2, %v10442_v62  ;;  %v10444_v47 = vrot.slane %v5922_v8, 3  ;;  %v10448_v2 = vrot.slane %v5922_v8, 7 }
  0xd4   : > { %v6482_v42 = vsel %vm1174_vm12, %v4702_v7, %v10220_v56  ;;  %v4727_v53 = vunpack.i.h.bf16 %v4725_v22  ;;  %v4726_v13 = vunpack.i.l.bf16 %v4725_v22  ;;  %v10446_v56 = vrot.slane %v5922_v8, 5 }
  0xd5   : > { %v4873_v7 = vpack.i.bf16 %v10445_v0, %v10444_v47  ;;  %v10447_v22 = vrot.slane %v5932_v14, 5  ;;  %v1175_v31 = vsel %vm1174_vm12, %v4731_v34, %v4696_v28  ;;  %v4843_v62 = vpack.i.bf16 %v10449_v26, %v10448_v2 }
  0xd6   : > { %v565_v61 = vsel %vm563_vm10, %v4727_v53, %v10443_v59  ;;  %v564_v25 = vsel %vm563_vm10, %v4726_v13, %v4727_v53  ;;  %v10222_v13 = vrot.slane %v5932_v14, 6  ;;  %v4612_v47 = vunpack.i.h.bf16 %v6172_v54 }
  0xd7   : > { %v4878_v46 = vpack.i.bf16 %v10447_v22, %v10446_v56  ;;  %v6506_v59 = vsel %vm1054_vm11, %v520_v18, %v564_v25  ;;  %v6509_v53 = vsel %vm1054_vm11, %v521_v45, %v565_v61  ;;  %v4735_v56 = vpop.permute.xlu2 %4734  ;;  %v10451_v22 = vrot.slane %v5927_v11, 2 }
  0xd8   : > { %v1200_v0 = vsel %vm1063_vm13, %v6506_v59, %v4731_v34  ;;  %v1201_v28 = vsel %vm1063_vm13, %v6509_v53, %v1175_v31  ;;  %v10450_v34 = vrot.slane %v5934_v15, 2  ;;  %v10452_v31 = vrot.slane %v5922_v8, 6 }
  0xd9   : > { %4879 = vrot.lane.b32.xlu0 %v4878_v46, %s5823_s27  ;;  %v1209_v25 = vsel %vm1072_vm14, %v1200_v0, %v6384_v43  ;;  %v1210_v61 = vsel %vm1072_vm14, %v1201_v28, %v6425_v10  ;;  %v10453_v0 = vunpack.i.l.bf16 %v6183_v55 }
  0xda   : > { %4874 = vrot.lane.b32.xlu2 %v4873_v7, %s5821_s25  ;;  %v4611_v7 = vunpack.i.l.bf16 %v6172_v54  ;;  %v4893_v46 = vpack.i.bf16 %v10451_v22, %v10450_v34  ;;  %v4868_v2 = vpack.i.bf16 %v10222_v13, %v10452_v31  ;;  %v4888_v26 = vpack.i.bf16 %v1210_v61, %v1209_v25 }
  0xdb   : > { %4844 = vrot.lane.b32.xlu1 %v4843_v62, %s5816_s17  ;;  %v477_v28 = vsel %vm10230_vm0, %v4612_v47, %v10453_v0  ;;  %v4740_v34 = vpop.permute.xlu0 %4739  ;;  %v10463_v13 = vrot.slane %v5932_v14, 1 }
  0xdc   : > { %v476_v62 = vsel %vm10230_vm0, %v4611_v7, %v4612_v47  ;;  %v1038_v25 = vsel %vm10259_vm1, %v5934_v15, %v477_v28  ;;  %v4745_v7 = vpop.permute.xlu1 %4744  ;;  %v4741_v0 = vunpack.i.l.bf16 %v4740_v34 }
  0xdd   : > { %v1037_v8 = vsel %vm10259_vm1, %v5932_v14, %v476_v62  ;;  %v6547_v61 = vsel %vm1045_vm3, %v1038_v25, %v521_v45  ;;  %v10454_v45 = vrot.slane %v5934_v15, 7  ;;  %v4742_v62 = vunpack.i.h.bf16 %v4740_v34 }
  0xde   : > { %v6550_v55 = vsel %vm1045_vm3, %v1037_v8, %v520_v18  ;;  %v10455_v18 = vrot.slane %v5927_v11, 7  ;;  %v4746_v25 = vunpack.i.l.bf16 %v4745_v7 }
  0xdf   : > { %v6540_v54 = vpop.permute.xlu2 %4749  ;;  %v4883_v47 = vpack.i.bf16 %v6547_v61, %v6550_v55 }
  0xe0   : > { %v4752_v31 = vunpack.i.h.bf16 %v6540_v54 }
  0xe1   : > { %4894 = vrot.lane.b32.xlu0 %v4893_v46, %s5817_s18  ;;  %v4898_v46 = vpack.i.bf16 %v10455_v18, %v10454_v45  ;;  %v10460_v18 = vunpack.i.h.bf16 %v6408_v32  ;;  %v10464_v32 = vunpack.i.h.bf16 %v6386_v52 }
  0xe2   : > { %4889 = vrot.lane.b32.xlu2 %v4888_v26, %s5824_s16  ;;  %v6573_v26 = vunpack.i.h.bf16 %v4735_v56 }
  0xe3   : > { %4869 = vrot.lane.b32.xlu1 %v4868_v2, %s5819_s20  ;;  %v4751_v2 = vunpack.i.l.bf16 %v6540_v54 }
  0xe4   : > { %v6583_v8 = vpop.permute.xlu1 %517 }
  0xe5   : > { %v6581_v54 = vsel %vm10246_vm4, %v4751_v2, %v4752_v31  ;;  %10458 = vst [vmem:[#allocation19_spill] sm:$0xff] %v6583_v8 }
  0xe6   : > { %10457 = vst [vmem:[#allocation18_spill] sm:$0xff] %v6581_v54 }
  0xe7   : > { %v6559_v22 = vpop.permute.xlu2 %4759 }
  0xe8   : > { %v4762_v52 = vunpack.i.h.bf16 %v6559_v22 }
  0xe9   : > { %4909 = vrot.lane.b32.xlu0 %v6037_v63, %s5820_s24  ;;  %v10221_v63 = vunpack.i.h.bf16 %v6231_v21 }
  0xea   : > { %4904 = vrot.lane.b32.xlu2 %v6085_v48, %s5818_s19 }
  0xeb   : > { %4884 = vrot.lane.b32.xlu1 %v4883_v47, %s5824_s16  ;;  %v6578_v28 = vsel %vm10246_vm4, %v10221_v63, %v4751_v2  ;;  %v6585_v47 = vpop.permute.xlu0 %4754  ;;  %v703_v2 = vsel %vm10242_vm6, %v4741_v0, %v4742_v62  ;;  %v10461_v63 = vunpack.i.h.bf16 %v6197_v27 }
  0xec   : > { %10456 = vst [vmem:[#allocation17_spill] sm:$0xff] %v6578_v28 }
  0xef   : > { %v6587_v45 = vpop.permute.xlu2 %4779 }
  0xf1   : > { %4924 = vrot.lane.b32.xlu0 %v6375_v33, %s5822_s26  ;;  %v4747_v33 = vunpack.i.h.bf16 %v4745_v7 }
  0xf2   : > { %4919 = vrot.lane.b32.xlu2 %v6069_v37, %s5821_s25  ;;  %v4736_v37 = vunpack.i.l.bf16 %v4735_v56  ;;  %v4933_v56 = vpack.i.bf16 %v6581_v54, %v6578_v28 }
  0xf3   : > { %4899 = vrot.lane.b32.xlu1 %v4898_v46, %s5816_s17  ;;  %v702_v46 = vsel %vm10242_vm6, %v10460_v18, %v4741_v0  ;;  %v746_v0 = vsel %vm10231_vm8, %v10464_v32, %v4746_v25  ;;  %v747_v18 = vsel %vm10231_vm8, %v4746_v25, %v4747_v33  ;;  %v6629_v25 = vpop.permute.xlu1 %4764  ;;  %v6631_v32 = vpop.permute.xlu0 %561  ;;  %vm10269_vm8 = vcmask 490496  }
  0xf4   : > { %v6591_v34 = vsel %vm10239_vm5, %v4736_v37, %v6573_v26  ;;  %v6602_v7 = vsel %vm10239_vm5, %v10461_v63, %v4736_v37  ;;  %v10465_v37 = vrot.slane %v5934_v15, 5  ;;  %v4761_v15 = vunpack.i.l.bf16 %v6559_v22 }
  0xf5   : > { %10459 = vst [vmem:[#allocation20_spill] sm:$0xff] %v6591_v34  ;;  %v1088_v27 = vsel %vm1081_vm7, %v6602_v7, %v702_v46  ;;  %v1089_v63 = vsel %vm1081_vm7, %v6591_v34, %v703_v2  ;;  %vm10266_vm5 = vcmask 261120   ;;  %vm809_vm6 = vcmask 752640  }
  0xf6   : > { %10462 = vst [vmem:[#allocation21_spill] sm:$0xff] %v6602_v7  ;;  %v6623_v54 = vsel %vm1090_vm9, %v1088_v27, %v746_v0  ;;  %v4756_v0 = vunpack.i.l.bf16 %v6585_v47  ;;  %v570_v22 = vsel %vm563_vm10, %v4761_v15, %v4762_v52 }
  0xf7   : > { %10467 = vst [vmem:[#allocation22_spill] sm:$0xff] %v6623_v54  ;;  %v6635_v2 = vpop.permute.xlu2 %4794 }
  0xf9   : > { %633 = vrot.lane.b32.xlu0 %v10463_v13, %s5810_s29 }
  0xfa   : > { %4934 = vrot.lane.b32.xlu2 %v4933_v56, %s5824_s16  ;;  %v10466_v56 = vrot.slane %v5927_v11, 5 }
  0xfb   : > { %4914 = vrot.lane.b32.xlu1 %v6073_v39, %s5819_s20  ;;  %v6626_v39 = vsel %vm1090_vm9, %v1089_v63, %v747_v18  ;;  %v1219_v18 = vsel %vm1081_vm7, %v6573_v26, %v4742_v62  ;;  %v4766_v63 = vunpack.i.l.bf16 %v6629_v25  ;;  %v10469_v62 = vunpack.i.h.bf16 %v6470_v20 }
  0xfc   : > { %v4938_v13 = vpack.i.bf16 %v10466_v56, %v10465_v37  ;;  %10468 = vst [vmem:[#allocation23_spill] sm:$0xff] %v6626_v39  ;;  %v4928_v46 = vpack.i.bf16 %v6626_v39, %v6623_v54  ;;  %v4757_v37 = vunpack.i.h.bf16 %v6585_v47  ;;  %v571_v56 = vsel %vm563_vm10, %v4762_v52, %v6631_v32 }
  0xfd   : > { %v1221_v47 = vsel %vm1090_vm9, %v1219_v18, %v4747_v33  ;;  %v1180_v27 = vsel %vm1174_vm12, %v10469_v62, %v4766_v63  ;;  %v10470_v54 = vunpack.i.h.bf16 %v6629_v25 }
  0xfe   : > { %v526_v39 = vsel %vm10228_vm2, %v4756_v0, %v4757_v37  ;;  %v4943_v33 = vpack.i.bf16 %v4752_v31, %v1221_v47  ;;  %v10473_v47 = vunpack.i.h.bf16 %v6301_v49 }
  0xff   : > { %v6665_v52 = vsel %vm1054_vm11, %v526_v39, %v570_v22  ;;  %v4626_v22 = vunpack.i.l.bf16 %v6178_v57 }
 0x100   : > { %v1206_v20 = vsel %vm1063_vm13, %v6665_v52, %v1180_v27  ;;  %v6685_v27 = vpop.permute.xlu0 %4769 }
 0x101   : > { %4939 = vrot.lane.b32.xlu0 %v4938_v13, %s5823_s27  ;;  %v527_v13 = vsel %vm10228_vm2, %v4757_v37, %v6583_v8  ;;  %v1215_v31 = vsel %vm1072_vm14, %v1206_v20, %v6602_v7 }
 0x102   : > { %756 = vrot.lane.b32.xlu2 %v5932_v14, %s5812_s13  ;;  %v6662_v28 = vsel %vm1054_vm11, %v527_v13, %v571_v56  ;;  %v10472_v56 = vunpack.i.h.bf16 %v6231_v21 }
 0x103   : > { %4929 = vrot.lane.b32.xlu1 %v4928_v46, %s5824_s16  ;;  %v1181_v46 = vsel %vm1174_vm12, %v4766_v63, %v10470_v54  ;;  %v10471_v54 = vrot.slane %v5932_v14, 6  ;;  %vm1321_vm12 = vcmask 252928  }
 0x104   : > { %v1207_v37 = vsel %vm1063_vm13, %v6662_v28, %v1181_v46  ;;  %v6692_v62 = vsel %vm10246_vm4, %v10473_v47, %v10472_v56  ;;  %vm607_vm4 = vcmask 1014784  }
 0x105   : > { %v1216_v63 = vsel %vm1072_vm14, %v1207_v37, %v6591_v34 }
 0x106   : > { %v4958_v46 = vpack.i.bf16 %v1216_v63, %v1215_v31  ;;  %v10475_v31 = vrot.slane %v5919_v6, 7 }
 0x108   : > { %v4973_v63 = vpack.i.bf16 %v6140_v40, %v10475_v31  ;;  %v10478_v40 = vunpack.i.h.bf16 %v6188_v4  ;;  %v10481_v4 = vunpack.i.h.bf16 %v6168_v41  ;;  %v1199_v41 = vsel %vm1054_vm11, %v6583_v8, %v6631_v32 }
 0x109   : > { %4949 = vrot.lane.b32.xlu0 %v6085_v48, %s5822_s26  ;;  %v4627_v48 = vunpack.i.h.bf16 %v6178_v57  ;;  %v10474_v57 = vrot.slane %v5932_v14, 3  ;;  %v6719_v14 = vpop.permute.xlu0 %4784  ;;  %v10482_v31 = vunpack.i.h.bf16 %v6629_v25  ;;  %v1197_v32 = vsel %vm10259_vm1, 0.0, %v6134_v29 }
 0x10a   : > { %4944 = vrot.lane.b32.xlu2 %v4943_v33, %s5824_s16  ;;  %v4963_v33 = vpack.i.bf16 %v6692_v62, %v6466_v17 }
 0x10b   : > { %677 = vrot.lane.b32.xlu1 %v10471_v54, %s5811_s30  ;;  %v6677_v18 = vpop.permute.xlu2 %4819  ;;  %v483_v20 = vsel %vm10230_vm0, %v4627_v48, %v6134_v29  ;;  %v482_v37 = vsel %vm10230_vm0, %v4626_v22, %v4627_v48  ;;  %v1198_v29 = vsel %vm1045_vm3, %v1197_v32, %v6583_v8  ;;  %s5831_s30 = smov 56  }
 0x10c   : > { %v1043_v49 = vsel %vm10259_vm1, %v5927_v11, %v482_v37  ;;  %v1044_v54 = vsel %vm10259_vm1, %v5919_v6, %v483_v20  ;;  %v10480_v20 = vrot.slane %v5919_v6, 2  ;;  %v481_v6 = vsel %vm10230_vm0, %v10481_v4, %v4626_v22 }
 0x10d   : > { %v6714_v48 = vsel %vm1045_vm3, %v1043_v49, %v526_v39  ;;  %v6717_v56 = vsel %vm1045_vm3, %v1044_v54, %v527_v13  ;;  %v525_v39 = vsel %vm10228_vm2, %v10478_v40, %v4756_v0  ;;  %v10479_v13 = vunpack.i.h.bf16 %v6181_v23 }
 0x10e   : > { %10476 = vst [vmem:[#allocation24_spill] sm:$0xff] %v6714_v48  ;;  %v4953_v47 = vpack.i.bf16 %v6717_v56, %v6714_v48  ;;  %v4968_v37 = vpack.i.bf16 %v6121_v24, %v10480_v20  ;;  %vm10268_vm2 = vcmask 506880   ;;  %vm10267_vm0 = vcmask 498688  }
 0x10f   : > { %10477 = vst [vmem:[#allocation25_spill] sm:$0xff] %v6717_v56 }
 0x111   : > { %4964 = vrot.lane.b32.xlu0 %v4963_v33, %s5824_s16  ;;  %v569_v33 = vsel %vm563_vm10, %v10479_v13, %v4761_v15  ;;  %v6743_v49 = vpop.permute.xlu0 %4799  ;;  %vm844_vm10 = vcmask 523264   ;;  %v10243_v13 = vunpack.i.h.bf16 %v6587_v45 }
 0x112   : > { %4959 = vrot.lane.b32.xlu2 %v4958_v46, %s5824_s16  ;;  %v6723_v46 = vpop.permute.xlu1 %4774  ;;  %v10497_v56 = vunpack.i.l.bf16 %v6743_v49 }
 0x113   : > { %721 = vrot.lane.b32.xlu1 %v10474_v57, %s5813_s14  ;;  %v6741_v57 = vsel %vm1054_vm11, %v525_v39, %v569_v33  ;;  %v10227_v25 = vunpack.i.l.bf16 %v6723_v46  ;;  %s5827_s14 = smov 66  }
 0x114   : > { %v6704_v21 = vpop.permute.xlu2 %4824  ;;  %v1205_v23 = vsel %vm1063_vm13, %v6741_v57, %v6482_v42 }
 0x115   : > { %v10237_v4 = vunpack.i.h.bf16 %v6704_v21 }
 0x119   : > { %4979 = vrot.lane.b32.xlu0 %v6137_v30, %s5818_s19  ;;  %v6773_v22 = vpop.permute.xlu0 %4809 }
 0x11a   : > { %4974 = vrot.lane.b32.xlu2 %v4973_v63, %s5816_s17  ;;  %v6756_v15 = vpop.permute.xlu1 %4789  ;;  %v1208_v63 = vsel %vm1063_vm13, %v1199_v41, %v10482_v31  ;;  %v10232_v31 = vmov 0  }
 0x11b   : > { %4954 = vrot.lane.b32.xlu1 %v4953_v47, %s5824_s16  ;;  %5019 = vset.pattern.permute.xlu2 %v10232_v31  ;;  %v10485_v32 = vunpack.i.h.bf16 %v6756_v15 }
 0x11c   : > { %v6729_v11 = vpop.permute.xlu2 %4834  ;;  %5018 = vset.pattern.permute.xlu1 %v10232_v31  ;;  %5495 = vset.pattern.permute.xlu0 %v10232_v31 }
 0x11d   : > { %v10265_v7 = vunpack.i.l.bf16 %v6729_v11 }
 0x121   : > { %4994 = vrot.lane.b32.xlu0 %v6104_v1, %s5821_s25  ;;  %v1042_v1 = vsel %vm10259_vm1, %v5924_v9, %v481_v6  ;;  %v10236_v6 = vunpack.i.l.bf16 %v6704_v21 }
 0x122   : > { %4989 = vrot.lane.b32.xlu2 %v6111_v5, %s5819_s20  ;;  %v1214_v5 = vsel %vm1072_vm14, %v1205_v23, %v6415_v44  ;;  %v6765_v54 = vsel %vm1045_vm3, %v1042_v1, %v525_v39  ;;  %v6785_v40 = vpop.permute.xlu1 %4804  ;;  %v10229_v39 = vunpack.i.h.bf16 %v6723_v46  ;;  %v10234_v23 = vunpack.i.l.bf16 %v6685_v27 }
 0x123   : > { %4969 = vrot.lane.b32.xlu1 %v4968_v37, %s5817_s18  ;;  %v5008_v42 = vpack.i.bf16 %v1214_v5, %v6765_v54  ;;  %v10483_v5 = vrot.slane %v5924_v9, 7  ;;  %v1340_v31 = vsel %vm1321_vm12, %v10236_v6, %v10237_v4  ;;  %v10484_v6 = vunpack.i.l.bf16 %v6719_v14 }
 0x124   : > { %v6758_v0 = vpop.permute.xlu2 %4849  ;;  %v882_v1 = vsel %vm879_vm15, %v10227_v25, %v10229_v39 }
 0x129   : > { %5009 = vrot.lane.b32.xlu0 %v5008_v42, %s5824_s16 }
 0x12a   : > { %5004 = vrot.lane.b32.xlu2 %v5929_v12, %s5823_s27  ;;  %v1217_v12 = vsel %vm1072_vm14, %v1208_v63, %v6573_v26  ;;  %v10235_v26 = vunpack.i.h.bf16 %v6685_v27  ;;  %v10241_v63 = vunpack.i.h.bf16 %v6719_v14  ;;  %v6833_v42 = vpop.permute.xlu1 %4829 }
 0x12b   : > { %4984 = vrot.lane.b32.xlu1 %v6071_v38, %s5820_s24  ;;  %v10240_v38 = vunpack.i.l.bf16 %v6587_v45  ;;  %v4998_v37 = vpack.i.bf16 %v1217_v12, %v1198_v29  ;;  %v10494_v8 = vunpack.i.h.bf16 %v6833_v42 }
 0x12c   : > { %v6781_v47 = vpop.permute.xlu2 %4854  ;;  %v847_v20 = vsel %vm844_vm10, %v10234_v23, %v10235_v26  ;;  %v952_v4 = vsel %vm10267_vm0, %v10484_v6, %v10241_v63  ;;  %v10488_v6 = vrot.slane %v5924_v9, 3 }
 0x12d   : > { %v917_v33 = vsel %vm10268_vm2, %v10240_v38, %v10243_v13  ;;  %v1117_v41 = vsel %vm1054_vm11, %v847_v20, %v882_v1  ;;  %v10487_v38 = vrot.slane %v5924_v9, 6  ;;  %v10489_v13 = vrot.slane %v5924_v9, 2 }
 0x12e   : > { %v10490_v1 = vunpack.i.h.bf16 %v6781_v47  ;;  %v1125_v24 = vsel %vm1063_vm13, %v1117_v41, %v917_v33  ;;  %v10498_v41 = vunpack.i.h.bf16 %v6785_v40 }
 0x131   : > { %906 = vrot.lane.b32.xlu0 %v6045_v3, %s5818_s19 }
 0x132   : > { %871 = vrot.lane.b32.xlu2 %v10483_v5, %s5816_s17  ;;  %v5826_v5 = vmov 65535  }
 0x133   : > { %4999 = vrot.lane.b32.xlu1 %v4998_v37, %s5824_s16  ;;  %v6817_v12 = vpop.permute.xlu0 %4814  ;;  %v1435_v25 = vsel %vm1090_vm9, 4294967295, %v5826_v5  ;;  %s5828_s16 = smov 58  }
 0x134   : > { %v6819_v29 = vpop.permute.xlu2 %4874  ;;  %v4817_v37 = vunpack.i.h.bf16 %v6817_v12  ;;  %v10238_v39 = vunpack.i.l.bf16 %v6817_v12  ;;  %v6846_v26 = vsel %vm1045_vm3, %v1435_v25, 0 }
 0x136   : > { %v1348_v23 = vsel %vm1321_vm12, %v10238_v39, %v4817_v37  ;;  %v10486_v39 = vunpack.i.l.bf16 %v6756_v15 }
 0x137   : > { %v1420_v5 = vpack.c.bf16 %v1348_v23, %v1340_v31  ;;  %v10491_v31 = vunpack.i.l.bf16 %v6781_v47 }
 0x138   : > { %v987_v25 = vsel %vm10269_vm8, %v10486_v39, %v10485_v32  ;;  %v10493_v39 = vunpack.i.l.bf16 %v6635_v2 }
 0x139   : > { %1011 = vrot.lane.b32.xlu0 %v10488_v6, %s5821_s25  ;;  %v1444_v63 = vand.u32 %v6846_v26, %v1420_v5  ;;  %v10492_v5 = vunpack.i.h.bf16 %v6635_v2 }
 0x13a   : > { %976 = vrot.lane.b32.xlu2 %v10487_v38, %s5819_s20  ;;  %v1332_v38 = vsel %vm1321_vm12, %v10491_v31, %v10490_v1  ;;  %v10495_v31 = vunpack.i.l.bf16 %v6833_v42  ;;  %v10496_v1 = vunpack.i.h.bf16 %v6743_v49 }
 0x13b   : > { %836 = vrot.lane.b32.xlu1 %v10489_v13, %s5817_s18  ;;  %1490 = vmatpush.bf16.msra.mxu2 %v1444_v63  ;;  %v6885_v6 = vpop.permute.xlu0 %4859  ;;  %v1022_v32 = vsel %vm10266_vm5, %v10493_v39, %v10492_v5  ;;  %v1141_v13 = vsel %vm1081_vm7, %v952_v4, %v987_v25  ;;  %v1133_v39 = vsel %vm1072_vm14, %v1125_v24, %v952_v4  ;;  %v10499_v25 = vunpack.i.l.bf16 %v6785_v40 }
 0x13c   : > { %v6883_v23 = vpop.permute.xlu2 %4889  ;;  %v1324_v63 = vsel %vm1321_vm12, %v10495_v31, %v10494_v8  ;;  %v812_v48 = vsel %vm809_vm6, %v10497_v56, %v10496_v1  ;;  %v1149_v33 = vsel %vm1090_vm9, %v1141_v13, %v1022_v32  ;;  %v10264_v31 = vunpack.i.h.bf16 %v6729_v11 }
 0x13d   : > { %v1412_v34 = vpack.c.bf16 %v1332_v38, %v1324_v63  ;;  %v610_v5 = vsel %vm607_vm4, %v10499_v25, %v10498_v41  ;;  %v1101_v8 = vsel %vm10259_vm1, %v6313_v58, %v812_v48  ;;  %v10500_v56 = vrot.slane %v5924_v9, 5 }
 0x13e   : > { %v1404_v24 = vpack.c.bf16 %v1149_v33, %v1133_v39  ;;  %v1066_v4 = vsel %vm1063_vm13, %v6390_v36, %v610_v5  ;;  %v4821_v32 = vunpack.i.l.bf16 %v6677_v18  ;;  %v10501_v58 = vrot.slane %v5924_v9, 1 }
 0x13f   : > { %1491 = vmatpush.bf16.msra.mxu2 %v1412_v34  ;;  %v4822_v34 = vunpack.i.h.bf16 %v6677_v18  ;;  %v1109_v48 = vsel %vm1045_vm3, %v1101_v8, %v847_v20  ;;  %v1075_v63 = vsel %vm1072_vm14, %v1066_v4, %v6256_v35  ;;  %v10502_v20 = vunpack.i.h.bf16 %v6704_v21 }
 0x140   : > { %v1396_v9 = vpack.c.bf16 %v1109_v48, %v6281_v16  ;;  %v10503_v25 = vunpack.i.l.bf16 %v6817_v12  ;;  %v10262_v5 = vunpack.i.h.bf16 %v6885_v6  ;;  %v10263_v35 = vunpack.i.l.bf16 %v6885_v6 }
 0x141   : > { %599 = vrot.lane.b32.xlu0 %v6045_v3, %s5822_s26  ;;  %v1349_v3 = vsel %vm1321_vm12, %v4817_v37, %v10264_v31  ;;  %v1341_v39 = vsel %vm1321_vm12, %v10502_v20, %v10265_v7  ;;  %v1346_v41 = vsel %vm1321_vm12, %v4821_v32, %v4822_v34  ;;  %v10504_v8 = vunpack.i.l.bf16 %v6704_v21 }
 0x142   : > { %801 = vrot.lane.b32.xlu2 %v10500_v56, %s5823_s27  ;;  %v1421_v33 = vpack.c.bf16 %v1349_v3, %v1341_v39  ;;  %v1347_v37 = vsel %vm1321_vm12, %v4822_v34, %v10503_v25  ;;  %v10506_v21 = vunpack.i.h.bf16 %v6833_v42  ;;  %v10258_v20 = vunpack.i.l.bf16 %v6773_v22 }
 0x143   : > { %941 = vrot.lane.b32.xlu1 %v10501_v58, %s5820_s24  ;;  %1492 = vmatpush.bf16.msra.mxu2 %v1404_v24  ;;  %v6930_v13 = vpop.permute.xlu0 %4864  ;;  %v10505_v58 = vld [vmem:[#allocation5_spill] sm:$0xff]  ;;  %v10525_v7 = vunpack.i.l.bf16 %v6719_v14 }
 0x144   : > { %v6928_v38 = vpop.permute.xlu2 %4904  ;;  %v1388_v48 = vpack.c.bf16 %v1075_v63, %v10505_v58  ;;  %v1447_v12 = vand.u32 %v6846_v26, %v1421_v33  ;;  %v10507_v63 = vunpack.i.h.bf16 %v6781_v47  ;;  %v419_v33 = vld [vmem:[%s10157_s3] sm:$0x3f] }
 0x145   : > { %v4840_v36 = vpop.permute.xlu1 %4839 }
 0x146   : > { %v4842_v18 = vunpack.i.h.bf16 %v4840_v36  ;;  %v4841_v1 = vunpack.i.l.bf16 %v4840_v36  ;;  %v1325_v36 = vsel %vm1321_vm12, %v10506_v21, %v10263_v35 }
 0x147   : > { %1493 = vmatpush.bf16.msra.mxu2 %v1396_v9 }
 0x148   : > { %v1338_v16 = vsel %vm1321_vm12, %v4841_v1, %v4842_v18  ;;  %v1339_v56 = vsel %vm1321_vm12, %v4842_v18, %v10504_v8  ;;  %v10509_v8 = vunpack.i.h.bf16 %v6685_v27 }
 0x149   : > { %v1418_v24 = vpack.c.bf16 %v1346_v41, %v1338_v16  ;;  %v1419_v4 = vpack.c.bf16 %v1347_v37, %v1339_v56  ;;  %v10508_v41 = vunpack.i.h.bf16 %v6723_v46  ;;  %v10253_v37 = vunpack.i.l.bf16 %v6758_v0 }
 0x14a   : > { %v848_v56 = vsel %vm844_vm10, %v10509_v8, %v10258_v20 }
 0x14b   : > { %5014 = vrot.lane.b32.xlu1 %v6137_v30, %s5822_s26  ;;  %v1438_v34 = vand.u32 %v6846_v26, %v1418_v24  ;;  %v1441_v32 = vand.u32 %v6846_v26, %v1419_v4  ;;  %1494 = vmatpush.bf16.msra.mxu2 %v1388_v48  ;;  %v6959_v3 = vpop.permute.xlu0 %4879  ;;  %v1333_v30 = vsel %vm1321_vm12, %v10507_v63, %v10262_v5  ;;  %v10255_v24 = vunpack.i.l.bf16 %v6930_v13 }
 0x14c   : > { %v6971_v18 = vpop.permute.xlu2 %4919  ;;  %v1413_v39 = vpack.c.bf16 %v1333_v30, %v1325_v36  ;;  %v10254_v16 = vunpack.i.l.bf16 %v6959_v3  ;;  %v10260_v48 = vunpack.i.l.bf16 %v6819_v29  ;;  %v10511_v36 = vunpack.i.h.bf16 %v6743_v49 }
 0x14d   : > { %v6973_v1 = vpop.permute.xlu1 %4844  ;;  %1464 = vmatpush.bf16.msra.mxu0 %v1438_v34  ;;  %1477 = vmatpush.bf16.msra.mxu1 %v1441_v32  ;;  %v10510_v32 = vunpack.i.h.bf16 %v6587_v45  ;;  %v10524_v5 = vunpack.i.l.bf16 %v6587_v45 }
 0x14e   : > { %v10257_v9 = vunpack.i.l.bf16 %v6973_v1  ;;  %v813_v63 = vsel %vm809_vm6, %v10511_v36, %v10254_v16 }
 0x14f   : > { %1503 = vmatpush.bf16.msrb.mxu2 %v1447_v12  ;;  %v918_v21 = vsel %vm10268_vm2, %v10510_v32, %v10253_v37  ;;  %v10514_v32 = vunpack.i.h.bf16 %v6635_v2 }
 0x150   : > { %v883_v25 = vsel %vm879_vm15, %v10508_v41, %v10257_v9  ;;  %v4891_v9 = vunpack.i.l.bf16 %v6883_v23 }
 0x151   : > { %v1118_v58 = vsel %vm1054_vm11, %v848_v56, %v883_v25  ;;  %v10513_v25 = vunpack.i.h.bf16 %v6756_v15  ;;  %v1023_v36 = vsel %vm10266_vm5, %v10514_v32, %v10260_v48  ;;  %v10522_v48 = vld [vmem:[#allocation6_spill] sm:$0xff] }
 0x153   : > { %1504 = vmatpush.bf16.msrb.mxu2 %v1413_v39  ;;  %1428 = vperm.xlu1 %5018, %v419_v33   ;;  %v6993_v4 = vpop.permute.xlu0 %4894  ;;  %v1126_v39 = vsel %vm1063_vm13, %v1118_v58, %v918_v21  ;;  %v10512_v33 = vunpack.i.h.bf16 %v6719_v14  ;;  %v10515_v21 = vld [vmem:[#allocation11_spill] sm:$0xff] }
 0x154   : > { %v7010_v30 = vpop.permute.xlu2 %4934  ;;  %v1102_v37 = vsel %vm10259_vm1, %v10515_v21, %v813_v63  ;;  %vm1431_vm1 = vcmask 613376  }
 0x155   : > { %v6997_v12 = vpop.permute.xlu1 %4869  ;;  %v953_v41 = vsel %vm10267_vm0, %v10512_v33, %v10255_v24  ;;  %v10516_v24 = vmov 0.0  }
 0x156   : > { %v10256_v34 = vunpack.i.l.bf16 %v6997_v12  ;;  %v1134_v16 = vsel %vm1072_vm14, %v1126_v39, %v953_v41  ;;  %v7043_v39 = vld [vmem:[%s10156_s2] sm:$0x7] }
 0x157   : > { %4362 = vmatmul.msk.bf16.vlgmr.msra.gmra.mxu2 %vm1431_vm1, %v7043_v39 }
 0x158   : > { %v988_v8 = vsel %vm10269_vm8, %v10513_v25, %v10256_v34  ;;  %v4892_v34 = vunpack.i.h.bf16 %v6883_v23 }
 0x159   : > { %v1142_v58 = vsel %vm1081_vm7, %v953_v41, %v988_v8  ;;  %v1110_v8 = vsel %vm1045_vm3, %v1102_v37, %v848_v56  ;;  %v10517_v41 = vld [vmem:[#allocation9_spill] sm:$0xff]  ;;  %v10518_v37 = vunpack.i.l.bf16 %v6833_v42 }
 0x15a   : > { %v1150_v33 = vsel %vm1090_vm9, %v1142_v58, %v1023_v36  ;;  %v1330_v36 = vsel %vm1321_vm12, %v4891_v9, %v4892_v34  ;;  %v10519_v58 = vunpack.i.l.bf16 %v6781_v47  ;;  %v4896_v47 = vunpack.i.l.bf16 %v6993_v4 }
 0x15b   : > { %2304 = vrot.lane.b32.xlu1 %v10516_v24, %s5827_s14  ;;  %v1405_v25 = vpack.c.bf16 %v1150_v33, %v1134_v16  ;;  %v7037_v20 = vpop.permute.xlu0 %4909  ;;  %v1397_v16 = vpack.c.bf16 %v1110_v8, %v10517_v41 }
 0x15c   : > { %v1331_v33 = vsel %vm1321_vm12, %v4892_v34, %v10519_v58  ;;  %v10520_v34 = vunpack.i.h.bf16 %v6785_v40 }
 0x15d   : > { %1505 = vmatpush.bf16.msrb.mxu2 %v1405_v25  ;;  %v4885_v32 = vpop.permute.xlu1 %4884  ;;  %v7056_v25 = vpop.permute.xlu2 %756 }
 0x15e   : > { %v4887_v63 = vunpack.i.h.bf16 %v4885_v32  ;;  %v4886_v21 = vunpack.i.l.bf16 %v4885_v32 }
 0x160   : > { %v1322_v23 = vsel %vm1321_vm12, %v4886_v21, %v4887_v63  ;;  %v1323_v56 = vsel %vm1321_vm12, %v4887_v63, %v10518_v37  ;;  %v4847_v63 = vunpack.i.h.bf16 %v6973_v1 }
 0x161   : > { %1506 = vmatpush.bf16.msrb.mxu2 %v1397_v16  ;;  %v1410_v32 = vpack.c.bf16 %v1330_v36, %v1322_v23  ;;  %v1411_v8 = vpack.c.bf16 %v1331_v33, %v1323_v56  ;;  %v4812_v36 = vunpack.i.h.bf16 %v6773_v22  ;;  %v10521_v56 = vunpack.i.l.bf16 %v6723_v46 }
 0x162   : > { %v4867_v46 = vunpack.i.h.bf16 %v6930_v13 }
 0x163   : > { %1465 = vmatpush.bf16.msra.mxu0 %v1410_v32  ;;  %1478 = vmatpush.bf16.msra.mxu1 %v1411_v8  ;;  %v7058_v41 = vpop.permute.xlu0 %4924  ;;  %v4852_v32 = vunpack.i.h.bf16 %v6758_v0  ;;  %v4906_v8 = vunpack.i.l.bf16 %v6928_v38 }
 0x164   : > { %v10261_v21 = vunpack.i.l.bf16 %v7058_v41 }
 0x165   : > { %v7061_v9 = vpop.permute.xlu1 %4899 }
 0x166   : > { %v4901_v42 = vunpack.i.l.bf16 %v7061_v9  ;;  %v611_v16 = vsel %vm607_vm4, %v10520_v34, %v10261_v21  ;;  %v7084_v21 = vsel %vm844_vm10, %v4812_v36, %v4896_v47  ;;  %v4921_v36 = vunpack.i.l.bf16 %v6971_v18 }
 0x167   : > { %v1067_v23 = vsel %vm1063_vm13, %v6394_v50, %v611_v16  ;;  %v10523_v50 = vunpack.i.l.bf16 %v6685_v27  ;;  %v4945_v16 = vpop.permute.xlu2 %4944 }
 0x168   : > { %v880_v37 = vsel %vm879_vm15, %v4847_v63, %v4901_v42  ;;  %v881_v58 = vsel %vm879_vm15, %v4901_v42, %v10521_v56  ;;  %v1076_v33 = vsel %vm1072_vm14, %v1067_v23, %v6264_v51  ;;  %v4911_v42 = vunpack.i.l.bf16 %v7037_v20 }
 0x169   : > { %v1389_v34 = vpack.c.bf16 %v1076_v33, %v10522_v48  ;;  %v846_v63 = vsel %vm844_vm10, %v4896_v47, %v10523_v50  ;;  %v1115_v51 = vsel %vm1054_vm11, %v7084_v21, %v880_v37  ;;  %v4877_v23 = vunpack.i.h.bf16 %v6819_v29 }
 0x16a   : > { %v1116_v48 = vsel %vm1054_vm11, %v846_v63, %v881_v58  ;;  %v4872_v47 = vunpack.i.h.bf16 %v6997_v12  ;;  %v915_v50 = vsel %vm10268_vm2, %v4852_v32, %v4906_v8  ;;  %v950_v35 = vsel %vm10267_vm0, %v4867_v46, %v4911_v42 }
 0x16b   : > { %v7091_v56 = vpop.permute.xlu0 %633  ;;  %1507 = vmatpush.bf16.msrb.mxu2 %v1389_v34  ;;  %v916_v34 = vsel %vm10268_vm2, %v4906_v8, %v10524_v5  ;;  %v1123_v37 = vsel %vm1063_vm13, %v1115_v51, %v915_v50  ;;  %v951_v24 = vsel %vm10267_vm0, %v4911_v42, %v10525_v7  ;;  %v10526_v32 = vunpack.i.l.bf16 %v6756_v15 }
 0x16c   : > { %v1124_v58 = vsel %vm1063_vm13, %v1116_v48, %v916_v34  ;;  %v1020_v5 = vsel %vm10266_vm5, %v4877_v23, %v4921_v36  ;;  %v10527_v51 = vunpack.i.l.bf16 %v6635_v2  ;;  %v4937_v42 = vunpack.i.h.bf16 %v7010_v30 }
 0x16d   : > { %v7098_v27 = vpop.permute.xlu1 %4914  ;;  %v1132_v7 = vsel %vm1072_vm14, %v1124_v58, %v951_v24  ;;  %v4936_v23 = vunpack.i.l.bf16 %v7010_v30  ;;  %v4947_v50 = vunpack.i.h.bf16 %v4945_v16  ;;  %vm10534_vm0 = vcmask 777216  }
 0x16e   : > { %v4916_v33 = vunpack.i.l.bf16 %v7098_v27  ;;  %4363 = vmatmul.msk.bf16.vlgmr.msrb.gmra.mxu2 %vm1431_vm1, %v7043_v39  ;;  %v1021_v48 = vsel %vm10266_vm5, %v4921_v36, %v10527_v51  ;;  %vm10530_vm5 = vcmask 1042432   ;;  %vm10535_vm2 = vcmask 1042432  }
 0x16f   : > { %v7132_v36 = vpop.permute.xlu2 %4959 }
 0x170   : > { %v985_v31 = vsel %vm10269_vm8, %v4872_v47, %v4916_v33  ;;  %v986_v45 = vsel %vm10269_vm8, %v4916_v33, %v10526_v32  ;;  %v1131_v47 = vsel %vm1072_vm14, %v1123_v37, %v950_v35  ;;  %v4946_v37 = vunpack.i.l.bf16 %v4945_v16 }
 0x171   : > { %v1139_v8 = vsel %vm1081_vm7, %v950_v35, %v985_v31  ;;  %v1140_v46 = vsel %vm1081_vm7, %v951_v24, %v986_v45  ;;  %v1352_v32 = vsel %vm1321_vm12, %v4936_v23, %v4937_v42  ;;  %v10528_v45 = vunpack.i.l.bf16 %v6743_v49 }
 0x172   : > { %v1147_v14 = vsel %vm1090_vm9, %v1139_v8, %v1020_v5  ;;  %v1148_v15 = vsel %vm1090_vm9, %v1140_v46, %v1021_v48  ;;  %v10529_v8 = vld [vmem:[#allocation8_spill] sm:$0xff]  ;;  %v1353_v46 = vsel %vm1321_vm12, %v4937_v42, %v4947_v50  ;;  %v4882_v42 = vunpack.i.h.bf16 %v6959_v3 }
 0x173   : > { %v1402_v33 = vpack.c.bf16 %v1147_v14, %v1131_v47  ;;  %v1403_v31 = vpack.c.bf16 %v1148_v15, %v1132_v7  ;;  %v7130_v2 = vpop.permute.xlu0 %4939  ;;  %v4927_v50 = vunpack.i.h.bf16 %v7058_v41  ;;  %vm10536_vm8 = vcmask 785408  }
 0x174   : > { %v4941_v34 = vunpack.i.l.bf16 %v7130_v2 }
 0x175   : > { %v4930_v35 = vpop.permute.xlu1 %4929  ;;  %1466 = vmatpush.bf16.msra.mxu0 %v1402_v33  ;;  %1479 = vmatpush.bf16.msra.mxu1 %v1403_v31 }
 0x176   : > { %v4932_v24 = vunpack.i.h.bf16 %v4930_v35  ;;  %v4931_v58 = vunpack.i.l.bf16 %v4930_v35  ;;  %v811_v30 = vsel %vm809_vm6, %v4941_v34, %v10528_v45  ;;  %v810_v45 = vsel %vm809_vm6, %v4882_v42, %v4941_v34 }
 0x177   : > { %v1100_v51 = vsel %vm10530_vm5, %v10529_v8, %v811_v30  ;;  %vm10533_vm5 = vcmask 760832  }
 0x178   : > { %v1344_v5 = vsel %vm1321_vm12, %v4931_v58, %v4932_v24  ;;  %v1345_v48 = vsel %vm1321_vm12, %v4932_v24, %v4946_v37  ;;  %v1108_v16 = vsel %vm1045_vm3, %v1100_v51, %v846_v63  ;;  %v7153_v63 = vpop.permute.xlu2 %4974 }
 0x179   : > { %v1424_v47 = vpack.c.bf16 %v1352_v32, %v1344_v5  ;;  %v1425_v14 = vpack.c.bf16 %v1353_v46, %v1345_v48  ;;  %v1395_v7 = vpack.c.bf16 %v1108_v16, %v6463_v60  ;;  %v10531_v60 = vunpack.i.l.bf16 %v6785_v40  ;;  %v10532_v5 = vld [vmem:[#allocation7_spill] sm:$0xff]  ;;  %v10537_v16 = vld [vmem:[#allocation16_spill] sm:$0xff] }
 0x17a   : > { %v775_v8 = vsel %vm10533_vm5, %v7056_v25, %v10532_v5  ;;  %vm10538_vm5 = vcmask 769024  }
 0x17b   : > { %v1456_v15 = vand.u32 %v6846_v26, %v1424_v47  ;;  %v1459_v49 = vand.u32 %v6846_v26, %v1425_v14  ;;  %v7148_v33 = vpop.permute.xlu0 %4949  ;;  %1480 = vmatpush.bf16.msra.mxu1 %v1395_v7 }
 0x17c   : > { %v4951_v31 = vunpack.i.l.bf16 %v7148_v33 }
 0x17d   : > { %v678_v35 = vpop.permute.xlu1 %677  ;;  %1542 = vmatpush.bf16.msra.mxu2 %v1456_v15  ;;  %1555 = vmatpush.bf16.msra.mxu3 %v1459_v49 }
 0x17e   : > { %v609_v37 = vsel %vm607_vm4, %v4951_v31, %v10531_v60  ;;  %v696_v51 = vsel %vm10534_vm0, %v678_v35, %v6419_v19  ;;  %v608_v40 = vsel %vm607_vm4, %v4927_v50, %v4951_v31  ;;  %v10539_v31 = vunpack.i.l.bf16 %v6729_v11 }
 0x17f   : > { %v1065_v24 = vsel %vm1063_vm13, %v6509_v53, %v609_v37  ;;  %v1099_v53 = vsel %vm10535_vm2, %v775_v8, %v810_v45  ;;  %v1064_v19 = vsel %vm1063_vm13, %v6506_v59, %v608_v40  ;;  %v10540_v59 = vunpack.i.h.bf16 %v6729_v11 }
 0x180   : > { %v1074_v32 = vsel %vm1072_vm14, %v1065_v24, %v6425_v10  ;;  %v652_v10 = vsel %vm10536_vm8, %v7091_v56, %v6384_v43  ;;  %v1107_v7 = vsel %vm1045_vm3, %v1099_v53, %v7084_v21  ;;  %v7192_v50 = vpop.permute.xlu2 %4989  ;;  %v10274_v60 = vunpack.i.h.bf16 %v7132_v36 }
 0x181   : > { %v1387_v30 = vpack.c.bf16 %v1074_v32, %v6547_v61  ;;  %v1082_v47 = vsel %vm1081_vm7, %v652_v10, %v696_v51  ;;  %v1073_v21 = vsel %vm1072_vm14, %v1064_v19, %v652_v10  ;;  %v4961_v37 = vunpack.i.l.bf16 %v7132_v36 }
 0x182   : > { %v1386_v32 = vpack.c.bf16 %v1073_v21, %v6550_v55  ;;  %v10273_v53 = vunpack.i.h.bf16 %v6993_v4  ;;  %v4976_v10 = vunpack.i.l.bf16 %v7153_v63  ;;  %vm10541_vm0 = vcmask 490496  }
 0x183   : > { %v4965_v48 = vpop.permute.xlu0 %4964  ;;  %1481 = vmatpush.bf16.msra.mxu1 %v1387_v30  ;;  %v1336_v51 = vsel %vm1321_vm12, %v4961_v37, %v10274_v60  ;;  %vm10542_vm2 = vcmask 506880   ;;  %vm10546_vm8 = vcmask 498688  }
 0x184   : > { %v4967_v34 = vunpack.i.h.bf16 %v4965_v48  ;;  %v4966_v46 = vunpack.i.l.bf16 %v4965_v48 }
 0x185   : > { %v722_v61 = vpop.permute.xlu1 %721 }
 0x186   : > { %v740_v25 = vsel %vm10538_vm5, %v722_v61, %v10537_v16  ;;  %v1343_v15 = vsel %vm1321_vm12, %v4966_v46, %v4931_v58  ;;  %v1351_v43 = vsel %vm1321_vm12, %v4967_v34, %v4936_v23  ;;  %4361 = vmatmul.msk.bf16.vlgmr.msra.gmra.mxu1 %vm1431_vm1, %v7043_v39  ;;  %v1342_v35 = vsel %vm1321_vm12, %v10539_v31, %v4966_v46 }
 0x187   : > { %v1091_v14 = vsel %vm1090_vm9, %v1082_v47, %v740_v25  ;;  %v1423_v49 = vpack.c.bf16 %v1351_v43, %v1343_v15  ;;  %v1350_v42 = vsel %vm1321_vm12, %v10540_v59, %v4967_v34  ;;  %v10272_v46 = vunpack.i.h.bf16 %v7061_v9 }
 0x188   : > { %v1394_v56 = vpack.c.bf16 %v1107_v7, %v1091_v14  ;;  %v1422_v58 = vpack.c.bf16 %v1350_v42, %v1342_v35  ;;  %v7214_v55 = vpop.permute.xlu2 %5004  ;;  %v4991_v61 = vunpack.i.l.bf16 %v7192_v50  ;;  %v10270_v25 = vunpack.i.h.bf16 %v7098_v27 }
 0x189   : > { %v1453_v23 = vand.u32 %v6846_v26, %v1423_v49  ;;  %v886_v19 = vsel %vm879_vm15, %v10272_v46, %v4976_v10  ;;  %v10276_v14 = vunpack.i.h.bf16 %v7130_v2  ;;  %v5006_v7 = vunpack.i.l.bf16 %v7214_v55 }
 0x18a   : > { %1467 = vmatpush.bf16.msra.mxu0 %v1394_v56  ;;  %v1450_v45 = vand.u32 %v6846_v26, %v1422_v58  ;;  %v10271_v15 = vunpack.i.h.bf16 %v6928_v38  ;;  %v4922_v56 = vunpack.i.h.bf16 %v6971_v18  ;;  %v4912_v49 = vunpack.i.h.bf16 %v7037_v20 }
 0x18b   : > { %v7198_v24 = vpop.permute.xlu0 %4979  ;;  %1529 = vmatpush.bf16.msrb.mxu1 %v1453_v23  ;;  %v4977_v31 = vunpack.i.h.bf16 %v7153_v63  ;;  %v991_v35 = vsel %vm10541_vm0, %v10270_v25, %v4991_v61  ;;  %v816_v63 = vsel %vm809_vm6, %v10276_v14, %v5006_v7  ;;  %vm10547_vm5 = vcmask 261120  }
 0x18c   : > { %v4981_v16 = vunpack.i.l.bf16 %v7198_v24  ;;  %vm10551_vm0 = vcmask 1042432  }
 0x18d   : > { %v7201_v11 = vpop.permute.xlu1 %4954 }
 0x18e   : > { %v10275_v30 = vunpack.i.h.bf16 %v7201_v11  ;;  %v4956_v5 = vunpack.i.l.bf16 %v7201_v11  ;;  %1468 = vmatpush.bf16.msra.mxu0 %v1386_v32  ;;  %v921_v21 = vsel %vm10542_vm2, %v10271_v15, %v4981_v16  ;;  %v10545_v15 = vunpack.i.h.bf16 %v6885_v6  ;;  %vm10552_vm2 = vmmov %vm10546_vm8 }
 0x190   : > { %v1328_v8 = vsel %vm1321_vm12, %v4956_v5, %v10275_v30  ;;  %v7240_v42 = vpop.permute.xlu2 %871 }
 0x191   : > { %v1416_v40 = vpack.c.bf16 %v1336_v51, %v1328_v8  ;;  %4360 = vmatmul.msk.bf16.vlgmr.msra.gmra.mxu0 %vm1431_vm1, %v7043_v39 }
 0x192   : > { %1516 = vmatpush.bf16.msrb.mxu0 %v1450_v45 }
 0x193   : > { %1543 = vmatpush.bf16.msra.mxu2 %v1416_v40  ;;  %v7216_v26 = vpop.permute.xlu0 %4994 }
 0x194   : > { %v4996_v58 = vunpack.i.l.bf16 %v7216_v26 }
 0x195   : > { %v4970_v48 = vpop.permute.xlu1 %4969 }
 0x196   : > { %v4971_v34 = vunpack.i.l.bf16 %v4970_v48  ;;  %v7249_v8 = vunpack.i.h.bf16 %v4970_v48 }
 0x198   : > { %v851_v47 = vsel %vm844_vm10, %v10273_v53, %v4971_v34  ;;  %10543 = vst [vmem:[#allocation5_spill] sm:$0xff] %v7249_v8 }
 0x199   : > { %v1121_v43 = vsel %vm1054_vm11, %v851_v47, %v886_v19  ;;  %v10544_v19 = vunpack.i.l.bf16 %v6885_v6 }
 0x19a   : > { %v1129_v40 = vsel %vm1063_vm13, %v1121_v43, %v921_v21  ;;  %v1026_v43 = vsel %vm10547_vm5, %v4922_v56, %v4996_v58  ;;  %vm10554_vm5 = vcmask 506880  }
 0x19b   : > { %v5010_v59 = vpop.permute.xlu0 %5009 }
 0x19c   : > { %v5012_v23 = vunpack.i.h.bf16 %v5010_v59  ;;  %v5011_v32 = vunpack.i.l.bf16 %v5010_v59 }
 0x19d   : > { %v4985_v45 = vpop.permute.xlu1 %4984 }
 0x19e   : > { %v4986_v51 = vunpack.i.l.bf16 %v4985_v45  ;;  %v1326_v25 = vsel %vm1321_vm12, %v10544_v19, %v5011_v32  ;;  %v1334_v46 = vsel %vm1321_vm12, %v10545_v15, %v5012_v23  ;;  %v1327_v59 = vsel %vm1321_vm12, %v5011_v32, %v4956_v5  ;;  %v10550_v32 = vld [vmem:[#allocation17_spill] sm:$0xff]  ;;  %v10555_v19 = vld [vmem:[#allocation22_spill] sm:$0xff] }
 0x19f   : > { %v1335_v53 = vsel %vm1321_vm12, %v5012_v23, %v4961_v37  ;;  %v4987_v60 = vunpack.i.h.bf16 %v4985_v45  ;;  %v1414_v30 = vpack.c.bf16 %v1334_v46, %v1326_v25  ;;  %v887_v15 = vsel %vm879_vm15, %v4976_v10, %v4977_v31 }
 0x1a0   : > { %v1415_v14 = vpack.c.bf16 %v1335_v53, %v1327_v59  ;;  %v956_v48 = vsel %vm10546_vm8, %v4912_v49, %v4986_v51  ;;  %v7270_v5 = vunpack.i.h.bf16 %v7192_v50  ;;  %v7273_v37 = vunpack.i.h.bf16 %v7198_v24 }
 0x1a1   : > { %v1137_v21 = vsel %vm1072_vm14, %v1129_v40, %v956_v48  ;;  %v1145_v6 = vsel %vm1081_vm7, %v956_v48, %v991_v35  ;;  %1517 = vmatpush.bf16.msrb.mxu0 %v1414_v30  ;;  %v4997_v46 = vunpack.i.h.bf16 %v7216_v26  ;;  %v852_v25 = vsel %vm844_vm10, %v4971_v34, %v7249_v8 }
 0x1a2   : > { %10548 = vst [vmem:[#allocation11_spill] sm:$0xff] %v7270_v5  ;;  %1530 = vmatpush.bf16.msrb.mxu1 %v1415_v14  ;;  %v1153_v53 = vsel %vm1090_vm9, %v1145_v6, %v1026_v43  ;;  %v1105_v35 = vsel %vm10551_vm0, %v10550_v32, %v816_v63  ;;  %v957_v31 = vsel %vm10552_vm2, %v4986_v51, %v4987_v60  ;;  %vm10553_vm8 = vcmask 490496   ;;  %v977_v63 = vpop.permute.xlu2 %976  ;;  %v5796_v32 = vld [vmem:[%s10155_s1] ss:$0 sm:$0xff] }
 0x1a3   : > { %10549 = vst [vmem:[#allocation9_spill] sm:$0xff] %v7273_v37  ;;  %v1408_v23 = vpack.c.bf16 %v1153_v53, %v1137_v21  ;;  %v907_v10 = vpop.permute.xlu0 %906  ;;  %v1113_v50 = vsel %vm1045_vm3, %v1105_v35, %v851_v47  ;;  %v992_v24 = vsel %vm10553_vm8, %v4991_v61, %v7270_v5  ;;  %v5007_v30 = vunpack.i.h.bf16 %v7214_v55  ;;  %1576 = vperm.xlu2 %5019, %v5796_v32   ;;  %v10584_v32 = vld [vmem:[#allocation14_spill] sm:$0xff] }
 0x1a4   : > { %v922_v34 = vsel %vm10554_vm5, %v4981_v16, %v7273_v37  ;;  %v1122_v40 = vsel %vm1054_vm11, %v852_v25, %v887_v15  ;;  %v1400_v59 = vpack.c.bf16 %v1113_v50, %v10555_v19  ;;  %vm10556_vm0 = vcmask 261120  }
 0x1a5   : > { %v5000_v14 = vpop.permute.xlu1 %4999  ;;  %1544 = vmatpush.bf16.msra.mxu2 %v1408_v23  ;;  %v1027_v47 = vsel %vm10556_vm0, %v4996_v58, %v4997_v46  ;;  %v1146_v60 = vsel %vm1081_vm7, %v957_v31, %v992_v24  ;;  %v10557_v61 = vunpack.i.h.bf16 %v7201_v11  ;;  %v10558_v51 = vunpack.i.h.bf16 %v7132_v36  ;;  %v10559_v46 = vld [vmem:[#allocation18_spill] sm:$0xff] }
 0x1a6   : > { %v5002_v26 = vunpack.i.h.bf16 %v5000_v14  ;;  %v5001_v45 = vunpack.i.l.bf16 %v5000_v14  ;;  %v1130_v16 = vsel %vm1063_vm13, %v1122_v40, %v922_v34  ;;  %v1154_v6 = vsel %vm1090_vm9, %v1146_v60, %v1027_v47 }
 0x1a7   : > { %v1138_v21 = vsel %vm1072_vm14, %v1130_v16, %v957_v31  ;;  %v817_v58 = vsel %vm809_vm6, %v5006_v7, %v5007_v30  ;;  %vm10560_vm2 = vcmask 1042432   ;;  %v10561_v35 = vunpack.i.l.bf16 %v6773_v22  ;;  %v10563_v30 = vld [vmem:[#allocation23_spill] sm:$0xff] }
 0x1a8   : > { %v1329_v55 = vsel %vm1321_vm12, %v10557_v61, %v5001_v45  ;;  %v1337_v48 = vsel %vm1321_vm12, %v10558_v51, %v5002_v26  ;;  %v1409_v11 = vpack.c.bf16 %v1154_v6, %v1138_v21  ;;  %v1106_v23 = vsel %vm10560_vm2, %v10559_v46, %v817_v58  ;;  %vm10567_vm12 = vmmov %vm10553_vm8 }
 0x1a9   : > { %1545 = vmatpush.bf16.msra.mxu2 %v1400_v59  ;;  %v1417_v43 = vpack.c.bf16 %v1337_v48, %v1329_v55  ;;  %v1114_v36 = vsel %vm1045_vm3, %v1106_v23, %v852_v25  ;;  %v10562_v7 = vunpack.i.h.bf16 %v6993_v4  ;;  %v10564_v25 = vunpack.i.l.bf16 %v6973_v1 }
 0x1aa   : > { %v802_v24 = vpop.permute.xlu2 %801  ;;  %v1401_v14 = vpack.c.bf16 %v1114_v36, %v10563_v30  ;;  %v10565_v45 = vunpack.i.h.bf16 %v7061_v9  ;;  %v4952_v34 = vunpack.i.h.bf16 %v7148_v33  ;;  %v10566_v19 = vunpack.i.l.bf16 %v6997_v12  ;;  %v10585_v30 = vld [vmem:[#allocation13_spill] sm:$0xff] }
 0x1ab   : > { %1556 = vmatpush.bf16.msra.mxu3 %v1417_v43  ;;  %v1012_v15 = vpop.permute.xlu0 %1011  ;;  %v884_v26 = vsel %vm879_vm15, %v10564_v25, %v7240_v42  ;;  %v10568_v1 = vunpack.i.h.bf16 %v7098_v27  ;;  %v10569_v9 = vunpack.i.l.bf16 %v6959_v3  ;;  %v10571_v61 = vunpack.i.l.bf16 %v6758_v0 }
 0x1ac   : > { %v885_v22 = vsel %vm879_vm15, %v7240_v42, %v10565_v45  ;;  %v989_v59 = vsel %vm10567_vm12, %v10566_v19, %v977_v63  ;;  %v10570_v42 = vunpack.i.h.bf16 %v7130_v2  ;;  %v10573_v12 = vunpack.i.h.bf16 %v6928_v38  ;;  %vm10574_vm15 = vmmov %vm10554_vm5  ;;  %v10587_v45 = vld [vmem:[#allocation10_spill] sm:$0xff] }
 0x1ad   : > { %v837_v53 = vpop.permute.xlu1 %836  ;;  %v990_v47 = vsel %vm10553_vm8, %v977_v63, %v10568_v1  ;;  %v814_v60 = vsel %vm809_vm6, %v10569_v9, %v802_v24  ;;  %v10575_v27 = vunpack.i.l.bf16 %v6819_v29  ;;  %v1025_v3 = vsel %vm10556_vm0, %v1012_v15, %v4922_v56  ;;  %v10589_v1 = vld [vmem:[#allocation21_spill] sm:$0xff] }
 0x1ae   : > { %v849_v50 = vsel %vm844_vm10, %v10561_v35, %v837_v53  ;;  %v850_v31 = vsel %vm844_vm10, %v837_v53, %v10562_v7  ;;  %v815_v33 = vsel %vm809_vm6, %v802_v24, %v10570_v42  ;;  %v920_v51 = vsel %vm10574_vm15, %v907_v10, %v10573_v12  ;;  %v10592_v42 = vld [vmem:[#allocation25_spill] sm:$0xff] }
 0x1af   : > { %1557 = vmatpush.bf16.msra.mxu3 %v1409_v11  ;;  %v1119_v4 = vsel %vm1054_vm11, %v849_v50, %v884_v26  ;;  %v1120_v40 = vsel %vm1054_vm11, %v850_v31, %v885_v22  ;;  %vm10572_vm11 = vmmov %vm10554_vm5  ;;  %v10577_v43 = vunpack.i.l.bf16 %v6930_v13  ;;  %vm10578_vm6 = vcmask 498688   ;;  %v10581_v11 = vld [vmem:[#allocation12_spill] sm:$0xff] }
 0x1b0   : > { %v919_v55 = vsel %vm10572_vm11, %v10571_v61, %v907_v10  ;;  %vm10576_vm5 = vmmov %vm10556_vm0  ;;  %v1128_v29 = vsel %vm1063_vm13, %v1120_v40, %v920_v51  ;;  %v10580_v13 = vunpack.i.l.bf16 %v7058_v41  ;;  %vm10582_vm12 = vcmask 1042432  }
 0x1b1   : > { %v1024_v63 = vsel %vm10576_vm5, %v10575_v27, %v1012_v15  ;;  %vm10579_vm2 = vmmov %vm10578_vm6  ;;  %v1127_v10 = vsel %vm1063_vm13, %v1119_v4, %v919_v55  ;;  %v1103_v46 = vsel %vm10582_vm12, %v10581_v11, %v814_v60  ;;  %v10588_v4 = vld [vmem:[#allocation15_spill] sm:$0xff] }
 0x1b2   : > { %vm10583_vm8 = vmmov %vm10582_vm12  ;;  %v1111_v36 = vsel %vm1045_vm3, %v1103_v46, %v849_v50 }
 0x1b3   : > { %1558 = vmatpush.bf16.msra.mxu3 %v1401_v14  ;;  %v600_v48 = vpop.permute.xlu0 %599  ;;  %v1104_v23 = vsel %vm10583_vm8, %v6692_v62, %v815_v33  ;;  %v1398_v14 = vpack.c.bf16 %v1111_v36, %v10585_v30 }
 0x1b4   : > { %v612_v6 = vsel %vm607_vm4, %v10580_v13, %v600_v48  ;;  %v613_v20 = vsel %vm607_vm4, %v600_v48, %v4952_v34  ;;  %v1112_v41 = vsel %vm1045_vm3, %v1104_v23, %v850_v31 }
 0x1b5   : > { %v942_v2 = vpop.permute.xlu1 %941  ;;  %v1068_v35 = vsel %vm1063_vm13, %v10584_v32, %v612_v6  ;;  %v1069_v7 = vsel %vm1063_vm13, %v6741_v57, %v613_v20  ;;  %v1399_v25 = vpack.c.bf16 %v1112_v41, %v6466_v17 }
 0x1b6   : > { %v954_v0 = vsel %vm10578_vm6, %v10577_v43, %v942_v2  ;;  %v955_v38 = vsel %vm10579_vm2, %v942_v2, %v4912_v49  ;;  %v1077_v50 = vsel %vm1072_vm14, %v1068_v35, %v10587_v45  ;;  %v1078_v31 = vsel %vm1072_vm14, %v1069_v7, %v6415_v44 }
 0x1b7   : > { %v1135_v16 = vsel %vm1072_vm14, %v1127_v10, %v954_v0  ;;  %v1143_v18 = vsel %vm1081_vm7, %v954_v0, %v989_v59  ;;  %v1136_v56 = vsel %vm1072_vm14, %v1128_v29, %v955_v38  ;;  %v1144_v21 = vsel %vm1081_vm7, %v955_v38, %v990_v47  ;;  %v10590_v47 = vld [vmem:[#allocation20_spill] sm:$0xff] }
 0x1b8   : > { %v1151_v49 = vsel %vm1090_vm9, %v1143_v18, %v1024_v63  ;;  %v1152_v58 = vsel %vm1090_vm9, %v1144_v21, %v1025_v3  ;;  %v1390_v40 = vpack.c.bf16 %v1077_v50, %v10588_v4  ;;  %v1391_v17 = vpack.c.bf16 %v1078_v31, %v6765_v54 }
 0x1b9   : > { %v1406_v15 = vpack.c.bf16 %v1151_v49, %v1135_v16  ;;  %v1407_v53 = vpack.c.bf16 %v1152_v58, %v1136_v56  ;;  %vm10596_vm2 = vcmask 1039360  }
 0x1ba   : > { %vm10597_vm12 = vmmov %vm10596_vm2 }
 0x1bb   : > { %1518 = vmatpush.bf16.msrb.mxu0 %v1406_v15  ;;  %1531 = vmatpush.bf16.msrb.mxu1 %v1407_v53  ;;  %vm10598_vm8 = vmmov %vm10596_vm2 }
 0x1bd   : > { %v5015_v24 = vpop.permute.xlu1 %5014 }
 0x1be   : > { %v7380_v26 = vunpack.i.h.bf16 %v5015_v24  ;;  %v5016_v62 = vunpack.i.l.bf16 %v5015_v24 }
 0x1bf   : > { %1519 = vmatpush.bf16.msrb.mxu0 %v1398_v14  ;;  %1532 = vmatpush.bf16.msrb.mxu1 %v1399_v25 }
 0x1c0   : > { %10586 = vst [vmem:[#allocation6_spill] sm:$0xff] %v7380_v26  ;;  %v614_v22 = vsel %vm607_vm4, %v4952_v34, %v5016_v62  ;;  %v615_v57 = vsel %vm607_vm4, %v5016_v62, %v7380_v26  ;;  %v10591_v34 = vld [vmem:[#allocation24_spill] sm:$0xff] }
 0x1c1   : > { %v1070_v19 = vsel %vm1063_vm13, %v6665_v52, %v614_v22  ;;  %v1071_v59 = vsel %vm1063_vm13, %v6662_v28, %v615_v57  ;;  %v10593_v28 = vmov 0.0  }
 0x1c2   : > { %v1079_v44 = vsel %vm1072_vm14, %v1070_v19, %v10589_v1  ;;  %v1080_v9 = vsel %vm1072_vm14, %v1071_v59, %v10590_v47  ;;  %1977 = vrot.lane.b32.xlu2 %v10593_v28, %s5828_s16 }
 0x1c3   : > { %1520 = vmatpush.bf16.msrb.mxu0 %v1390_v40  ;;  %1533 = vmatpush.bf16.msrb.mxu1 %v1391_v17  ;;  %v1392_v60 = vpack.c.bf16 %v1079_v44, %v10591_v34  ;;  %v1393_v33 = vpack.c.bf16 %v1080_v9, %v10592_v42 }
 0x1c5   : > { %1546 = vmatpush.bf16.msra.mxu2 %v1392_v60  ;;  %1559 = vmatpush.bf16.msra.mxu3 %v1393_v33  ;;  %v1429_v27 = vpop.permute.xlu1 %1428 }
 0x1c6   : > { %4364 = vmatmul.msk.bf16.vlgmr.msrb.gmra.mxu0 %vm1431_vm1, %v7043_v39  ;;  %4365 = vmatmul.msk.bf16.vlgmr.msrb.gmra.mxu1 %vm1431_vm1, %v7043_v39 }
 0x1c8   : > { %4366 = vmatmul.msk.bf16.vlgmr.msra.gmra.mxu2 %vm1431_vm1, %v7043_v39  ;;  %4367 = vmatmul.msk.bf16.vlgmr.msra.gmra.mxu3 %vm1431_vm1, %v7043_v39 }
 0x1cd   : > { %v7418_v40 = vpop.permute.xlu1 %2304 }
 0x1ce   : > { %10595 = vst [vmem:[#allocation7_spill] sm:$0xff] %v7418_v40 }
 0x1da   : > { %v1496_v52 = vpop.f32.mrf.mxu2 }
 0x1db   : > { %v1497_v23 = vadd.f32 %v1496_v52, %v1429_v27 }
 0x1dd   : > { %vm1567_vm0 = vcmp.gt.f32.partialorder %v1497_v23, 0.0 }
 0x1e2   : > { %v1498_v54 = vpop.f32.mrf.mxu2 }
 0x1f1   : > { %v1509_v61 = vpop.f32.mrf.mxu2 }
 0x1f2   : > { %v1510_v36 = vadd.f32 %v1509_v61, %v1429_v27 }
 0x1f4   : > { %vm1568_vm6 = vcmp.gt.f32.partialorder %v1510_v36, 0.0 }
 0x1f9   : > { %v1511_v55 = vpop.f32.mrf.mxu2 }
 0x1fd   : > { %v1577_v3 = vpop.permute.xlu2 %1576 }
 0x1fe   : > { %v1582_v25 = vmul.f32 %v1577_v3, %v1510_v36  ;;  %v1581_v62 = vmul.f32 %v1577_v3, %v1497_v23 }
 0x200   : > { %v1589_v31 = vsel %vm1567_vm0, %v1497_v23, %v1581_v62  ;;  %v1590_v22 = vsel %vm1568_vm6, %v1510_v36, %v1582_v25 }
 0x201   : > { %v5030_v57 = vpack.i.bf16 %v1590_v22, %v1589_v31 }
 0x203   : > { %v1483_v12 = vpop.f32.mrf.mxu1 }
 0x204   : > { %v1484_v56 = vadd.f32 %v1483_v12, %v1429_v27 }
 0x206   : > { %v1580_v53 = vmul.f32 %v1577_v3, %v1484_v56  ;;  %vm1566_vm11 = vcmp.gt.f32.partialorder %v1484_v56, 0.0 }
 0x208   : > { %v1588_v7 = vsel %vm1566_vm11, %v1484_v56, %v1580_v53 }
 0x20b   : > { %v1485_v51 = vpop.f32.mrf.mxu1 }
 0x20e   : > { %v1470_v63 = vpop.f32.mrf.mxu0 }
 0x20f   : > { %v1471_v48 = vadd.f32 %v1470_v63, %v1429_v27 }
 0x211   : > { %vm1565_vm9 = vcmp.gt.f32.partialorder %v1471_v48, 0.0  ;;  %v1579_v2 = vmul.f32 %v1577_v3, %v1471_v48 }
 0x213   : > { %v1587_v43 = vsel %vm1565_vm9, %v1471_v48, %v1579_v2  ;;  %vm10599_vm9 = vmmov %vm10596_vm2 }
 0x214   : > { %1603 = vrot.lane.b32.xlu1 %v1587_v43, %s5808_s23 }
 0x216   : > { %v1472_v0 = vpop.f32.mrf.mxu0 }
 0x21c   : > { %v7416_v4 = vpop.permute.xlu2 %1977 }
 0x21d   : > { %10594 = vst [vmem:[#allocation8_spill] sm:$0xff] %v7416_v4 }
 0x243   : > { %v1522_v38 = vpop.f32.mrf.mxu0  ;;  %v1535_v10 = vpop.f32.mrf.mxu1 }
 0x244   : > { %v1523_v29 = vadd.f32 %v1522_v38, %v1429_v27  ;;  %v1536_v39 = vadd.f32 %v1535_v10, %v1429_v27 }
 0x246   : > { %vm1569_vm1 = vcmp.gt.f32.partialorder %v1523_v29, 0.0  ;;  %v1583_v16 = vmul.f32 %v1577_v3, %v1523_v29  ;;  %vm1570_vm14 = vcmp.gt.f32.partialorder %v1536_v39, 0.0  ;;  %v1584_v18 = vmul.f32 %v1577_v3, %v1536_v39 }
 0x248   : > { %v1591_v21 = vsel %vm1569_vm1, %v1523_v29, %v1583_v16  ;;  %v1592_v13 = vsel %vm1570_vm14, %v1536_v39, %v1584_v18  ;;  %vm10600_vm1 = vmmov %vm10596_vm2 }
 0x249   : > { %v5025_v6 = vpack.i.bf16 %v1592_v13, %v1591_v21  ;;  %vm10601_vm14 = vmmov %vm10600_vm1 }
 0x24a   : > { %vm10602_vm11 = vmmov %vm10600_vm1 }
 0x24b   : > { %v1548_v20 = vpop.f32.mrf.mxu2  ;;  %v1561_v49 = vpop.f32.mrf.mxu3  ;;  %5026 = vrot.lane.b32.xlu1 %v5025_v6, %s5808_s23 }
 0x24c   : > { %v1549_v58 = vadd.f32 %v1548_v20, %v1429_v27  ;;  %v1562_v15 = vadd.f32 %v1561_v49, %v1429_v27  ;;  %v1524_v11 = vpop.f32.mrf.mxu0  ;;  %v1537_v46 = vpop.f32.mrf.mxu1 }
 0x24d   : > { %v10606_v46 = vld [vmem:[#allocation2_spill] sm:$0xff] }
 0x24e   : > { %vm1571_vm15 = vcmp.gt.f32.partialorder %v1549_v58, 0.0  ;;  %v1585_v41 = vmul.f32 %v1577_v3, %v1549_v58  ;;  %vm1572_vm5 = vcmp.gt.f32.partialorder %v1562_v15, 0.0  ;;  %v1586_v32 = vmul.f32 %v1577_v3, %v1562_v15 }
 0x250   : > { %v1594_v35 = vsel %vm1572_vm5, %v1562_v15, %v1586_v32  ;;  %v1593_v24 = vsel %vm1571_vm15, %v1549_v58, %v1585_v41  ;;  %vm10603_vm15 = vmmov %vm10600_vm1  ;;  %vm10604_vm5 = vcmask 785408  }
 0x251   : > { %v5020_v30 = vpack.i.bf16 0.0, %v1594_v35  ;;  %v5035_v14 = vpack.i.bf16 %v1588_v7, %v1593_v24  ;;  %vm10607_vm0 = vmmov %vm10604_vm5 }
 0x252   : > { %vm10608_vm6 = vmmov %vm10607_vm0 }
 0x253   : > { %v1563_v45 = vpop.f32.mrf.mxu3  ;;  %5021 = vrot.lane.b32.xlu0 %v5020_v30, %s5808_s23  ;;  %5036 = vrot.lane.b32.xlu2 %v5035_v14, %s5808_s23  ;;  %v1550_v50 = vpop.f32.mrf.mxu2 }
 0x25b   : > { %5031 = vrot.lane.b32.xlu0 %v5030_v57, %s5808_s23  ;;  %s5829_s23 = smov 122  }
 0x286   : > { %v1604_v19 = vpop.permute.xlu1 %1603 }
 0x2ad   : > { %v5037_v17 = vpop.permute.xlu2 %5036 }
 0x2ae   : > { %v5039_v59 = vunpack.i.h.bf16 %v5037_v17  ;;  %v5038_v61 = vunpack.i.l.bf16 %v5037_v17 }
 0x2b0   : > { %v1621_v1 = vsel %vm10596_vm2, %v1604_v19, %v5039_v59  ;;  %vm10609_vm2 = vmmov %vm10607_vm0 }
 0x2b1   : > { %v1637_v44 = vmax.f32 %v1587_v43, %v1621_v1 }
 0x2b3   : > { %1653 = vrot.lane.b32.xlu2 %v1637_v44, %s5810_s29 }
 0x2bd   : > { %v5027_v47 = vpop.permute.xlu1 %5026 }
 0x2be   : > { %v5029_v42 = vunpack.i.h.bf16 %v5027_v47  ;;  %v5028_v33 = vunpack.i.l.bf16 %v5027_v47 }
 0x2c0   : > { %v1625_v12 = vsel %vm10598_vm8, %v5028_v33, %v5029_v42  ;;  %v1626_v51 = vsel %vm10599_vm9, %v5029_v42, %v5038_v61  ;;  %vm10615_vm8 = vmmov %vm10607_vm0 }
 0x2c1   : > { %v7427_v2 = vmax.f32 %v1591_v21, %v1625_v12  ;;  %v7429_v43 = vmax.f32 %v1592_v13, %v1626_v51  ;;  %vm10616_vm9 = vmmov %vm10607_vm0 }
 0x2c3   : > { %v5050_v6 = vpack.i.bf16 %v7429_v43, %v7427_v2 }
 0x2c5   : > { %v5022_v9 = vpop.permute.xlu0 %5021 }
 0x2c6   : > { %v5024_v34 = vunpack.i.h.bf16 %v5022_v9  ;;  %v5023_v60 = vunpack.i.l.bf16 %v5022_v9 }
 0x2c8   : > { %v1628_v52 = vsel %vm10597_vm12, %v5023_v60, %v5024_v34  ;;  %v1627_v48 = vsel %vm10600_vm1, %v5038_v61, %v5023_v60  ;;  %vm10610_vm12 = vmmov %vm10607_vm0 }
 0x2c9   : > { %v1644_v54 = vmax.f32 %v1594_v35, %v1628_v52  ;;  %v7434_v39 = vmax.f32 %v1593_v24, %v1627_v48  ;;  %vm10617_vm1 = vmmov %vm10607_vm0 }
 0x2cb   : > { %v5040_v55 = vpack.i.bf16 0.0, %v1644_v54 }
 0x2cd   : > { %v5032_v27 = vpop.permute.xlu0 %5031  ;;  %5041 = vrot.lane.b32.xlu2 %v5040_v55, %s5810_s29 }
 0x2ce   : > { %v5034_v63 = vunpack.i.h.bf16 %v5032_v27  ;;  %v5033_v3 = vunpack.i.l.bf16 %v5032_v27 }
 0x2d0   : > { %v1622_v0 = vsel %vm10601_vm14, %v5039_v59, %v5033_v3  ;;  %v1623_v38 = vsel %vm10602_vm11, %v5033_v3, %v5034_v63  ;;  %v1624_v10 = vsel %vm10603_vm15, %v5034_v63, %v5028_v33  ;;  %vm10628_vm14 = vcmask 1031168  }
 0x2d1   : > { %v1638_v29 = vmax.f32 %v1588_v7, %v1622_v0  ;;  %v1639_v16 = vmax.f32 %v1589_v31, %v1623_v38  ;;  %v1640_v18 = vmax.f32 %v1590_v22, %v1624_v10  ;;  %vm1848_vm11 = vcmask 982016  }
 0x2d2   : > { %vm1813_vm15 = vcmask 998400  }
 0x2d3   : > { %v5055_v56 = vpack.i.bf16 %v7434_v39, %v1638_v29  ;;  %v5045_v21 = vpack.i.bf16 %v1640_v18, %v1639_v16 }
 0x2d5   : > { %5056 = vrot.lane.b32.xlu0 %v5055_v56, %s5810_s29  ;;  %5051 = vrot.lane.b32.xlu2 %v5050_v6, %s5810_s29 }
 0x2d6   : > { %5046 = vrot.lane.b32.xlu1 %v5045_v21, %s5810_s29  ;;  %s5830_s29 = smov 120  }
 0x30d   : > { %v1654_v13 = vpop.permute.xlu2 %1653 }
 0x327   : > { %v7442_v20 = vpop.permute.xlu2 %5041 }
 0x328   : > { %v5044_v49 = vunpack.i.h.bf16 %v7442_v20  ;;  %v5043_v58 = vunpack.i.l.bf16 %v7442_v20 }
 0x32a   : > { %v1678_v15 = vsel %vm10604_vm5, %v5043_v58, %v5044_v49  ;;  %vm10634_vm5 = vcmask 490496  }
 0x32b   : > { %v7449_v53 = vmax.f32 %v1644_v54, %v1678_v15 }
 0x32d   : > { %10605 = vst [vmem:[#allocation16_spill] sm:$0xff] %v7449_v53  ;;  %v1794_v11 = vrot.slane %v7449_v53, 6  ;;  %v7489_v47 = vrot.slane %v7449_v53, 4  ;;  %v7528_v0 = vrot.slane %v7449_v53, 2 }
 0x32f   : > { %v7453_v23 = vpack.i.bf16 %v10606_v46, %v1794_v11  ;;  %v7457_v36 = vpop.permute.xlu2 %5051  ;;  %10611 = vst [vmem:[#allocation17_spill] sm:$0xff] %v7489_v47 }
 0x330   : > { %v5053_v7 = vunpack.i.l.bf16 %v7457_v36  ;;  %10614 = vst [vmem:[#allocation23_spill] sm:$0xff] %v7528_v0  ;;  %v5054_v56 = vunpack.i.h.bf16 %v7457_v36 }
 0x331   : > { %5066 = vrot.lane.b32.xlu0 %v7453_v23, %s5829_s23 }
 0x347   : > { %v7459_v41 = vpop.permute.xlu0 %5056 }
 0x348   : > { %v5058_v32 = vunpack.i.l.bf16 %v7459_v41  ;;  %v5047_v35 = vpop.permute.xlu1 %5046  ;;  %v5059_v48 = vunpack.i.h.bf16 %v7459_v41 }
 0x349   : > { %v5049_v24 = vunpack.i.h.bf16 %v5047_v35  ;;  %v5048_v30 = vunpack.i.l.bf16 %v5047_v35 }
 0x34a   : > { %v1671_v14 = vsel %vm10607_vm0, %v1654_v13, %v5058_v32  ;;  %v1677_v10 = vsel %vm10615_vm8, %v5059_v48, %v5043_v58  ;;  %v1676_v21 = vsel %vm10616_vm9, %v5054_v56, %v5059_v48  ;;  %vm10636_vm0 = vcmask 506880  }
 0x34b   : > { %v7464_v25 = vmax.f32 %v1637_v44, %v1671_v14  ;;  %v1674_v62 = vsel %vm10608_vm6, %v5049_v24, %v5053_v7  ;;  %v1673_v50 = vsel %vm10609_vm2, %v5048_v30, %v5049_v24  ;;  %v1672_v59 = vsel %vm10610_vm12, %v5058_v32, %v5048_v30  ;;  %vm10642_vm6 = vmmov %vm10628_vm14 }
 0x34c   : > { %v7469_v45 = vmax.f32 %v1640_v18, %v1674_v62  ;;  %v7472_v31 = vmax.f32 %v1639_v16, %v1673_v50  ;;  %v7486_v44 = vmax.f32 %v1638_v29, %v1672_v59  ;;  %v7541_v16 = vmax.f32 %v7434_v39, %v1677_v10  ;;  %vm10683_vm8 = vmmov %vm10642_vm6 }
 0x34d   : > { %v5060_v22 = vpack.i.bf16 %v7449_v53, %v7464_v25  ;;  %v1787_v57 = vrot.slane %v7464_v25, 6  ;;  %v1747_v1 = vrot.slane %v7464_v25, 4  ;;  %v1675_v39 = vsel %vm10617_vm1, %v5053_v7, %v5054_v56  ;;  %vm10685_vm9 = vmmov %vm10642_vm6 }
 0x34e   : > { %v5080_v17 = vpack.i.bf16 %v7469_v45, %v7472_v31  ;;  %v5100_v34 = vpack.i.bf16 %v7472_v31, %v7486_v44  ;;  %v5090_v60 = vpack.i.bf16 %v7472_v31, %v7489_v47  ;;  %v5105_v42 = vpack.i.bf16 %v7469_v45, %v7464_v25  ;;  %vm10687_vm1 = vmmov %vm10642_vm6 }
 0x34f   : > { %5061 = vrot.lane.b32.xlu1 %v5060_v22, %s5828_s16  ;;  %v5075_v19 = vpack.i.bf16 %v1794_v11, %v1787_v57  ;;  %v5070_v9 = vpack.i.bf16 %v7489_v47, %v1747_v1  ;;  %v5095_v33 = vpack.i.bf16 %v7486_v44, %v7469_v45  ;;  %v1709_v52 = vrot.slane %v7472_v31, 2 }
 0x350   : > { %5081 = vrot.lane.b32.xlu0 %v5080_v17, %s5827_s14  ;;  %v1710_v54 = vrot.slane %v7469_v45, 2  ;;  %v7511_v61 = vrot.slane %v7472_v31, 4  ;;  %v7514_v55 = vrot.slane %v7469_v45, 4  ;;  %v1789_v12 = vrot.slane %v7472_v31, 6 }
 0x351   : > { %5076 = vrot.lane.b32.xlu2 %v5075_v19, %s5819_s20  ;;  %v1790_v51 = vrot.slane %v7469_v45, 6  ;;  %v7538_v29 = vrot.slane %v7486_v44, 6  ;;  %v5185_v6 = vpack.i.bf16 %v7449_v53, %v7541_v16  ;;  %v7552_v13 = vrot.slane %v7486_v44, 2 }
 0x352   : > { %10612 = vst [vmem:[#allocation22_spill] sm:$0xff] %v7511_v61  ;;  %v5120_v27 = vpack.i.bf16 %v1710_v54, %v1709_v52  ;;  %v5110_v63 = vpack.i.bf16 %v7514_v55, %v7511_v61  ;;  %v5140_v38 = vpack.i.bf16 %v1789_v12, %v7528_v0  ;;  %v7558_v20 = vmax.f32 %v7429_v43, %v1676_v21 }
 0x353   : > { %10613 = vst [vmem:[#allocation18_spill] sm:$0xff] %v7514_v55  ;;  %v5115_v3 = vpack.i.bf16 %v1790_v51, %v1789_v12  ;;  %v5160_v18 = vpack.i.bf16 %v7538_v29, %v1790_v51  ;;  %v1707_v49 = vrot.slane %v7464_v25, 2  ;;  %v7562_v58 = vmax.f32 %v7427_v2, %v1675_v39 }
 0x354   : > { %v5165_v15 = vpack.i.bf16 %v1709_v52, %v7552_v13  ;;  %v7574_v2 = vpack.i.bf16 %v7541_v16, %v7558_v20  ;;  %v7580_v36 = vrot.slane %v7486_v44, 4  ;;  %v1712_v32 = vrot.slane %v7558_v20, 2 }
 0x355   : > { %v5170_v11 = vpack.i.bf16 %v1707_v49, %v7552_v13  ;;  %v5190_v46 = vpack.i.bf16 %v7558_v20, %v7562_v58  ;;  %v5175_v43 = vpack.i.bf16 %v1710_v54, %v1707_v49  ;;  %v7583_v41 = vrot.slane %v7562_v58, 4 }
 0x356   : > { %10618 = vst [vmem:[#allocation12_spill] sm:$0xff] %v7574_v2  ;;  %v1711_v7 = vrot.slane %v7562_v58, 2  ;;  %v5195_v24 = vpack.i.bf16 %v7486_v44, %v7541_v16  ;;  %v7595_v14 = vrot.slane %v7558_v20, 4  ;;  %v7598_v62 = vrot.slane %v7541_v16, 4 }
 0x357   : > { %5071 = vrot.lane.b32.xlu1 %v5070_v9, %s5818_s19  ;;  %10619 = vst [vmem:[#allocation14_spill] sm:$0xff] %v7580_v36  ;;  %v5210_v35 = vpack.i.bf16 %v7580_v36, %v7583_v41  ;;  %v1792_v50 = vrot.slane %v7558_v20, 6  ;;  %v1793_v22 = vrot.slane %v7541_v16, 6  ;;  %v5200_v19 = vpack.i.bf16 %v1747_v1, %v7562_v58 }
 0x358   : > { %5101 = vrot.lane.b32.xlu0 %v5100_v34, %s5830_s29  ;;  %10620 = vst [vmem:[#allocation13_spill] sm:$0xff] %v7583_v41  ;;  %v5220_v30 = vpack.i.bf16 %v1712_v32, %v1711_v7  ;;  %v7611_v9 = vrot.slane %v7541_v16, 2  ;;  %v1791_v34 = vrot.slane %v7562_v58, 6  ;;  %v5270_v52 = vpack.i.bf16 %v7583_v41, %v7580_v36 }
 0x359   : > { %5091 = vrot.lane.b32.xlu2 %v5090_v60, %s5822_s26  ;;  %10621 = vst [vmem:[#allocation10_spill] sm:$0xff] %v7595_v14  ;;  %v5235_v59 = vpack.i.bf16 %v1793_v22, %v1792_v50  ;;  %v5225_v54 = vpack.i.bf16 %v7552_v13, %v1711_v7  ;;  %v5285_v10 = vpack.i.bf16 %v1712_v32, %v1787_v57  ;;  %vm2306_vm2 = vcmask 539648  }
 0x35a   : > { %10622 = vst [vmem:[#allocation15_spill] sm:$0xff] %v7598_v62  ;;  %v5245_v60 = vpack.i.bf16 %v7528_v0, %v7611_v9  ;;  %v5255_v1 = vpack.i.bf16 %v1792_v50, %v1791_v34  ;;  %v5275_v12 = vpack.i.bf16 %v1791_v34, %v7538_v29  ;;  %v5260_v21 = vpack.i.bf16 %v7538_v29, %v1793_v22 }
 0x35b   : > { %10623 = vst [vmem:[#allocation21_spill] sm:$0xff] %v7611_v9  ;;  %vm1979_vm12 = vcmask 474112  }
 0x35f   : > { %5086 = vrot.lane.b32.xlu1 %v5080_v17, %s5828_s16  ;;  %v5230_v17 = vpack.i.bf16 %v7598_v62, %v7595_v14 }
 0x360   : > { %5106 = vrot.lane.b32.xlu0 %v5105_v42, %s5830_s29  ;;  %v5215_v42 = vpack.i.bf16 %v7538_v29, %v1791_v34 }
 0x361   : > { %5096 = vrot.lane.b32.xlu2 %v5095_v33, %s5822_s26 }
 0x367   : > { %5121 = vrot.lane.b32.xlu1 %v5120_v27, %s5817_s18 }
 0x368   : > { %5111 = vrot.lane.b32.xlu0 %v5110_v63, %s5822_s26 }
 0x369   : > { %5116 = vrot.lane.b32.xlu2 %v5115_v3, %s5829_s23 }
 0x36f   : > { %5136 = vrot.lane.b32.xlu1 %v5115_v3, %s5819_s20 }
 0x370   : > { %5131 = vrot.lane.b32.xlu0 %v5110_v63, %s5818_s19 }
 0x371   : > { %5126 = vrot.lane.b32.xlu2 %v5120_v27, %s5809_s28 }
 0x377   : > { %5156 = vrot.lane.b32.xlu1 %v5115_v3, %s5817_s18 }
 0x378   : > { %5141 = vrot.lane.b32.xlu0 %v5140_v38, %s5809_s28  ;;  %v5250_v38 = vpack.i.bf16 %v7595_v14, %v7583_v41 }
 0x379   : > { %5146 = vrot.lane.b32.xlu2 %v5120_v27, %s5829_s23  ;;  %v5240_v27 = vpack.i.bf16 %v7611_v9, %v1712_v32 }
 0x37f   : > { %5161 = vrot.lane.b32.xlu1 %v5160_v18, %s5809_s28 }
 0x380   : > { %5151 = vrot.lane.b32.xlu0 %v5110_v63, %s5830_s29  ;;  %v5280_v63 = vpack.i.bf16 %v1707_v49, %v1791_v34 }
 0x381   : > { %5186 = vrot.lane.b32.xlu2 %v5185_v6, %s5827_s14 }
 0x387   : > { %5166 = vrot.lane.b32.xlu1 %v5165_v15, %s5831_s30 }
 0x388   : > { %5171 = vrot.lane.b32.xlu0 %v5170_v11, %s5817_s18 }
 0x389   : > { %5191 = vrot.lane.b32.xlu2 %v5190_v46, %s5828_s16 }
 0x38f   : > { %5181 = vrot.lane.b32.xlu1 %v5190_v46, %s5827_s14  ;;  %v5265_v46 = vpack.i.bf16 %v1711_v7, %v7552_v13  ;;  %s5835_s14 = smov 112  }
 0x390   : > { %5176 = vrot.lane.b32.xlu0 %v5175_v43, %s5831_s30 }
 0x391   : > { %5206 = vrot.lane.b32.xlu2 %v7574_v2, %s5822_s26 }
 0x397   : > { %5211 = vrot.lane.b32.xlu1 %v5210_v35, %s5822_s26 }
 0x398   : > { %5196 = vrot.lane.b32.xlu0 %v5195_v24, %s5828_s16  ;;  %s4359_s16 = sshll.u32 %s10996_s22, 3 }
 0x399   : > { %5221 = vrot.lane.b32.xlu2 %v5220_v30, %s5817_s18 }
 0x39f   : > { %5231 = vrot.lane.b32.xlu1 %v5230_v17, %s5822_s26 }
 0x3a0   : > { %5201 = vrot.lane.b32.xlu0 %v5200_v19, %s5822_s26 }
 0x3a1   : > { %5236 = vrot.lane.b32.xlu2 %v5235_v59, %s5829_s23 }
 0x3a3   : > { %v7635_v3 = vpop.permute.xlu0 %5066 }
 0x3a7   : > { %5246 = vrot.lane.b32.xlu1 %v5245_v60, %s5817_s18 }
 0x3a8   : > { %5216 = vrot.lane.b32.xlu0 %v5215_v42, %s5829_s23 }
 0x3a9   : > { %5256 = vrot.lane.b32.xlu2 %v5255_v1, %s5819_s20 }
 0x3ab   : > { %v7620_v33 = vpop.permute.xlu2 %5076 }
 0x3ac   : > { %10624 = vst [vmem:[#allocation20_spill] sm:$0xff] %v7620_v33 }
 0x3af   : > { %5271 = vrot.lane.b32.xlu1 %v5270_v52, %s5830_s29 }
 0x3b0   : > { %5226 = vrot.lane.b32.xlu0 %v5225_v54, %s5809_s28 }
 0x3b1   : > { %5276 = vrot.lane.b32.xlu2 %v5275_v12, %s5817_s18 }
 0x3b3   : > { %v7629_v51 = vpop.permute.xlu2 %5091 }
 0x3b7   : > { %5291 = vrot.lane.b32.xlu1 %v5245_v60, %s5829_s23 }
 0x3b8   : > { %5241 = vrot.lane.b32.xlu0 %v5240_v27, %s5809_s28 }
 0x3b9   : > { %5281 = vrot.lane.b32.xlu2 %v5280_v63, %s5809_s28 }
 0x3bb   : > { %v7637_v48 = vpop.permute.xlu2 %5096 }
 0x3bc   : > { %10625 = vst [vmem:[#allocation24_spill] sm:$0xff] %v7637_v48 }
 0x3bf   : > { %5306 = vrot.lane.b32.xlu1 %v5235_v59, %s5809_s28 }
 0x3c0   : > { %5251 = vrot.lane.b32.xlu0 %v5250_v38, %s5818_s19 }
 0x3c1   : > { %v7645_v18 = vpop.permute.xlu1 %5061  ;;  %5286 = vrot.lane.b32.xlu2 %v5285_v10, %s5829_s23 }
 0x3c2   : > { %10626 = vst [vmem:[#allocation25_spill] sm:$0xff] %v7645_v18  ;;  %v7648_v56 = vpop.permute.xlu0 %5081 }
 0x3c3   : > { %v7650_v6 = vpop.permute.xlu2 %5116 }
 0x3c4   : > { %v10280_v7 = vunpack.i.h.bf16 %v7650_v6  ;;  %v10282_v50 = vunpack.i.l.bf16 %v7650_v6  ;;  %v10667_v33 = vunpack.i.h.bf16 %v7650_v6 }
 0x3c6   : > { %v1816_v12 = vsel %vm1813_vm15, %v10282_v50, %v10280_v7 }
 0x3c7   : > { %5311 = vrot.lane.b32.xlu1 %v5220_v30, %s5831_s30 }
 0x3c8   : > { %5261 = vrot.lane.b32.xlu0 %v5260_v21, %s5819_s20  ;;  %s411_s20 = scalar_lea.vmem %s10166_s12, %s4359_s16 }
 0x3c9   : > { %v7655_v39 = vpop.permute.xlu1 %5071  ;;  %5296 = vrot.lane.b32.xlu2 %v5230_v17, %s5830_s29 }
 0x3ca   : > { %v7658_v57 = vpop.permute.xlu0 %5101 }
 0x3cb   : > { %10627 = vst [vmem:[#allocation2_spill] sm:$0xff] %v7658_v57  ;;  %v7660_v49 = vpop.permute.xlu2 %5126  ;;  %v10286_v22 = vunpack.i.h.bf16 %v7658_v57  ;;  %v10655_v18 = vunpack.i.h.bf16 %v7658_v57 }
 0x3cc   : > { %v10278_v15 = vunpack.i.h.bf16 %v7660_v49  ;;  %v10279_v11 = vunpack.i.l.bf16 %v7660_v49 }
 0x3ce   : > { %v7669_v29 = vsel %vm10628_vm14, %v10279_v11, %v10278_v15  ;;  %vm10696_vm14 = vmmov %vm10687_vm1 }
 0x3cf   : > { %v7675_v43 = vsel %vm1045_vm3, %v7472_v31, %v7669_v29 }
 0x3d0   : > { %10629 = vst [vmem:[#allocation26_spill] sm:$0xff] %v7675_v43  ;;  %5266 = vrot.lane.b32.xlu0 %v5265_v46, %s5829_s23  ;;  %v5330_v35 = vpack.i.bf16 %v7675_v43, %v7598_v62 }
 0x3d1   : > { %v7678_v32 = vpop.permute.xlu1 %5086 }
 0x3d2   : > { %v7682_v24 = vpop.permute.xlu0 %5106  ;;  %5331 = vrot.lane.b32.xlu1 %v5330_v35, %s5818_s19 }
 0x3d3   : > { %10630 = vst [vmem:[#allocation27_spill] sm:$0xff] %v7682_v24  ;;  %v7685_v30 = vpop.permute.xlu2 %5146  ;;  %v10277_v13 = vunpack.i.h.bf16 %v7682_v24 }
 0x3d5   : > { %v1851_v52 = vsel %vm1848_vm11, %v10286_v22, %v10277_v13 }
 0x3d8   : > { %5301 = vrot.lane.b32.xlu0 %v5235_v59, %s5817_s18 }
 0x3d9   : > { %v7690_v31 = vpop.permute.xlu1 %5121 }
 0x3da   : > { %v5124_v17 = vunpack.i.h.bf16 %v7690_v31  ;;  %v7696_v19 = vunpack.i.l.bf16 %v7690_v31  ;;  %v7698_v34 = vpop.permute.xlu0 %5111 }
 0x3db   : > { %v7700_v60 = vpop.permute.xlu2 %5186  ;;  %v10283_v59 = vunpack.i.h.bf16 %v7698_v34  ;;  %v10284_v1 = vunpack.i.l.bf16 %v7698_v34  ;;  %v10663_v2 = vunpack.i.l.bf16 %v7698_v34 }
 0x3dc   : > { %v1883_v42 = vsel %vm844_vm10, %v7696_v19, %v5124_v17 }
 0x3dd   : > { %v7712_v54 = vsel %vm1045_vm3, %v1851_v52, %v1883_v42  ;;  %v7724_v27 = vsel %vm607_vm4, %v10284_v1, %v10283_v59  ;;  %v10290_v1 = vunpack.i.l.bf16 %v7629_v51 }
 0x3de   : > { %10631 = vst [vmem:[#allocation28_spill] sm:$0xff] %v7712_v54  ;;  %v7728_v63 = vsel %vm1081_vm7, %v7724_v27, %v1816_v12  ;;  %v5084_v54 = vunpack.i.h.bf16 %v7648_v56 }
 0x3df   : > { %10632 = vst [vmem:[#allocation29_spill] sm:$0xff] %v7728_v63 }
 0x3e1   : > { %v7732_v10 = vpop.permute.xlu1 %5136 }
 0x3e2   : > { %v10281_v21 = vunpack.i.h.bf16 %v7732_v10  ;;  %v7736_v46 = vunpack.i.l.bf16 %v7732_v10  ;;  %v7738_v35 = vpop.permute.xlu0 %5131 }
 0x3e3   : > { %v7740_v31 = vpop.permute.xlu2 %5191  ;;  %v10285_v12 = vunpack.i.h.bf16 %v7738_v35  ;;  %v7748_v13 = vunpack.i.l.bf16 %v7738_v35 }
 0x3e4   : > { %10633 = vst [vmem:[#allocation30_spill] sm:$0xff] %v7736_v46  ;;  %v1947_v52 = vsel %vm10634_vm5, %v7736_v46, %v10281_v21  ;;  %vm10697_vm5 = vmmov %vm10687_vm1 }
 0x3e5   : > { %10635 = vst [vmem:[#allocation31_spill] sm:$0xff] %v7748_v13  ;;  %v1915_v38 = vsel %vm10636_vm0, %v7748_v13, %v10285_v12  ;;  %v2340_v15 = vsel %vm1081_vm7, %v7748_v13, %v7736_v46  ;;  %v10657_v46 = vunpack.i.h.bf16 %v7678_v32  ;;  %vm10698_vm0 = vmmov %vm10687_vm1 }
 0x3e6   : > { %v7758_v11 = vsel %vm1063_vm13, %v1883_v42, %v1915_v38  ;;  %v7761_v7 = vsel %vm1081_vm7, %v1915_v38, %v1947_v52  ;;  %v10641_v38 = vld [vmem:[#allocation19_spill] sm:$0xff] }
 0x3e7   : > { %10637 = vst [vmem:[#allocation32_spill] sm:$0xff] %v7758_v11  ;;  %v5335_v21 = vpack.i.bf16 %v2340_v15, %v7758_v11  ;;  %v1778_v15 = vsel %vm607_vm4, %v10290_v1, %v7380_v26  ;;  %v5340_v62 = vpack.i.bf16 %v7580_v36, %v7761_v7 }
 0x3e8   : > { %10638 = vst [vmem:[#allocation33_spill] sm:$0xff] %v7761_v7 }
 0x3e9   : > { %v7764_v50 = vpop.permute.xlu1 %5156  ;;  %5336 = vrot.lane.b32.xlu1 %v5335_v21, %s5818_s19 }
 0x3ea   : > { %10639 = vst [vmem:[#allocation34_spill] sm:$0xff] %v7764_v50  ;;  %v7770_v12 = vpop.permute.xlu0 %5141 }
 0x3eb   : > { %v7772_v22 = vpop.permute.xlu2 %5206  ;;  %v10291_v28 = vunpack.i.l.bf16 %v7770_v12 }
 0x3ec   : > { %10640 = vst [vmem:[#allocation35_spill] sm:$0xff] %v7772_v22 }
 0x3ed   : > { %v1738_v52 = vsel %vm10642_vm6, %v10291_v28, %v10641_v38  ;;  %vm10712_vm6 = vcmask 490496  }
 0x3ee   : > { %v7785_v59 = vsel %vm1045_vm3, %v7449_v53, %v1738_v52  ;;  %v7788_v21 = vsel %vm1063_vm13, %v1738_v52, %v1778_v15 }
 0x3ef   : > { %10643 = vst [vmem:[#allocation36_spill] sm:$0xff] %v7785_v59  ;;  %v5320_v43 = vpack.i.bf16 %v7788_v21, %v7785_v59  ;;  %v5083_v59 = vunpack.i.l.bf16 %v7648_v56 }
 0x3f0   : > { %10644 = vst [vmem:[#allocation37_spill] sm:$0xff] %v7788_v21 }
 0x3f1   : > { %v7794_v11 = vpop.permute.xlu1 %5161  ;;  %5321 = vrot.lane.b32.xlu2 %v5320_v43, %s5818_s19 }
 0x3f2   : > { %10645 = vst [vmem:[#allocation38_spill] sm:$0xff] %v7794_v11  ;;  %v7797_v1 = vpop.permute.xlu0 %5151 }
 0x3f3   : > { %10646 = vst [vmem:[#allocation39_spill] sm:$0xff] %v7797_v1  ;;  %v7799_v28 = vpop.permute.xlu2 %5221 }
 0x3f4   : > { %v10313_v43 = vunpack.i.l.bf16 %v7799_v28 }
 0x3f9   : > { %v7803_v55 = vpop.permute.xlu1 %5166  ;;  %5341 = vrot.lane.b32.xlu2 %v5340_v62, %s5818_s19  ;;  %v2307_v62 = vsel %vm2306_vm2, %v5083_v59, %v5084_v54 }
 0x3fa   : > { %10647 = vst [vmem:[#allocation40_spill] sm:$0xff] %v7803_v55  ;;  %v7806_v52 = vpop.permute.xlu0 %5171  ;;  %v7824_v55 = vsel %vm844_vm10, %v5124_v17, %v10313_v43  ;;  %v2331_v48 = vsel %vm1045_vm3, %v2307_v62, %v1883_v42  ;;  %v10322_v43 = vunpack.i.h.bf16 %v7635_v3  ;;  %v7862_v42 = vsel %vm1063_vm13, %v7696_v19, %v7748_v13 }
 0x3fb   : > { %10648 = vst [vmem:[#allocation41_spill] sm:$0xff] %v7806_v52  ;;  %v7808_v24 = vpop.permute.xlu2 %5236  ;;  %v7899_v13 = vsel %vm1063_vm13, %v7669_v29, %v7724_v27  ;;  %v10660_v29 = vunpack.i.l.bf16 %v7806_v52  ;;  %v10665_v52 = vunpack.i.h.bf16 %v7698_v34 }
 0x3fc   : > { %10650 = vst [vmem:[#allocation43_spill] sm:$0xff] %v7824_v55 }
 0x3fd   : > { %10659 = vst [vmem:[#allocation48_spill] sm:$0xff] %v7899_v13  ;;  %v7914_v27 = vsel %vm844_vm10, %v10660_v29, %v7696_v19 }
 0x3fe   : > { %10661 = vst [vmem:[#allocation49_spill] sm:$0xff] %v7914_v27 }
 0x401   : > { %v7813_v21 = vpop.permute.xlu1 %5181 }
 0x402   : > { %v10314_v61 = vunpack.i.l.bf16 %v7813_v21  ;;  %v7816_v7 = vpop.permute.xlu0 %5176 }
 0x403   : > { %10649 = vst [vmem:[#allocation42_spill] sm:$0xff] %v7816_v7  ;;  %v7818_v36 = vpop.permute.xlu2 %5256 }
 0x404   : > { %v2308_v56 = vsel %vm2306_vm2, %v5084_v54, %v10314_v61  ;;  %v10323_v54 = vunpack.i.l.bf16 %v7635_v3  ;;  %v10656_v61 = vunpack.i.l.bf16 %v7658_v57 }
 0x405   : > { %v2332_v11 = vsel %vm1045_vm3, %v2308_v56, %v7824_v55 }
 0x406   : > { %v5350_v0 = vpack.i.bf16 %v2332_v11, %v2331_v48  ;;  %v7850_v48 = vunpack.i.l.bf16 %v7678_v32  ;;  %v5189_v11 = vunpack.i.h.bf16 %v7700_v60  ;;  %v1821_v9 = vsel %vm1813_vm15, %v10323_v54, %v10322_v43 }
 0x407   : > { %v7866_v37 = vsel %vm1081_vm7, %v1778_v15, %v1821_v9  ;;  %v1850_v26 = vsel %vm1848_vm11, %v10656_v61, %v10655_v18  ;;  %v7888_v15 = vsel %vm1045_vm3, %v5083_v59, %v7696_v19 }
 0x408   : > { %5351 = vrot.lane.b32.xlu2 %v5350_v0, %s5818_s19  ;;  %10654 = vst [vmem:[#allocation47_spill] sm:$0xff] %v7866_v37  ;;  %v7877_v43 = vsel %vm1979_vm12, %v7850_v48, %v10657_v46  ;;  %v2312_v54 = vsel %vm2306_vm2, %v5189_v11, %v7418_v40  ;;  %v10658_v0 = vunpack.i.l.bf16 %v7700_v60 }
 0x409   : > { %v7833_v7 = vpop.permute.xlu1 %5211 }
 0x40a   : > { %v7835_v4 = vpop.permute.xlu0 %5196  ;;  %v7884_v9 = vsel %vm2306_vm2, %v10658_v0, %v5189_v11  ;;  %v5214_v61 = vunpack.i.h.bf16 %v7833_v7  ;;  %v10664_v53 = vunpack.i.l.bf16 %v7833_v7 }
 0x40b   : > { %10651 = vst [vmem:[#allocation44_spill] sm:$0xff] %v7835_v4  ;;  %v7837_v5 = vpop.permute.xlu2 %5276 }
 0x40c   : > { %10652 = vst [vmem:[#allocation45_spill] sm:$0xff] %v7837_v5  ;;  %v1772_v40 = vsel %vm607_vm4, %v5214_v61, %v10663_v2  ;;  %v1774_v19 = vsel %vm607_vm4, %v10665_v52, %v10664_v53  ;;  %v5278_v34 = vunpack.i.l.bf16 %v7837_v5 }
 0x411   : > { %v7839_v17 = vpop.permute.xlu1 %5231 }
 0x412   : > { %v7844_v62 = vpop.permute.xlu0 %5201 }
 0x413   : > { %10653 = vst [vmem:[#allocation46_spill] sm:$0xff] %v7844_v62  ;;  %v7846_v56 = vpop.permute.xlu2 %5281  ;;  %v5204_v11 = vunpack.i.h.bf16 %v7844_v62 }
 0x419   : > { %v7892_v57 = vpop.permute.xlu1 %5246 }
 0x41a   : > { %v10334_v38 = vunpack.i.h.bf16 %v7892_v57  ;;  %v5217_v46 = vpop.permute.xlu0 %5216 }
 0x41b   : > { %v7908_v4 = vpop.permute.xlu2 %5286  ;;  %v5219_v59 = vunpack.i.h.bf16 %v5217_v46  ;;  %v5218_v0 = vunpack.i.l.bf16 %v5217_v46 }
 0x41c   : > { %v7921_v18 = vsel %vm844_vm10, %v10334_v38, %v7249_v8  ;;  %v5288_v29 = vunpack.i.l.bf16 %v7908_v4  ;;  %v10666_v38 = vunpack.i.l.bf16 %v7650_v6 }
 0x41d   : > { %10662 = vst [vmem:[#allocation50_spill] sm:$0xff] %v7921_v18  ;;  %v2336_v46 = vsel %vm1045_vm3, %v2312_v54, %v7921_v18  ;;  %v1817_v2 = vsel %vm1813_vm15, %v10667_v33, %v5218_v0  ;;  %v7956_v33 = vsel %vm1045_vm3, %v1850_v26, %v7914_v27 }
 0x41e   : > { %v1815_v8 = vsel %vm1813_vm15, %v5219_v59, %v10666_v38  ;;  %v5315_v62 = vpack.i.bf16 %v2336_v46, %v7866_v37  ;;  %v1814_v53 = vsel %vm1813_vm15, %v5288_v29, %v5219_v59  ;;  %v7945_v52 = vsel %vm1081_vm7, %v1774_v19, %v1817_v2  ;;  %10669 = vst [vmem:[#allocation52_spill] sm:$0xff] %v7956_v33 }
 0x41f   : > { %10668 = vst [vmem:[#allocation51_spill] sm:$0xff] %v7945_v52  ;;  %v7948_v54 = vsel %vm1081_vm7, %v1772_v40, %v1815_v8  ;;  %v5345_v6 = vpack.i.bf16 %v7945_v52, %v7728_v63  ;;  %v1771_v38 = vsel %vm607_vm4, %v5204_v11, %v5214_v61  ;;  %v10670_v29 = vunpack.i.h.bf16 %v7799_v28 }
 0x420   : > { %5316 = vrot.lane.b32.xlu0 %v5315_v62, %s5818_s19  ;;  %v10671_v8 = vunpack.i.l.bf16 %v7799_v28  ;;  %v7970_v41 = vsel %vm1081_vm7, %v1771_v38, %v1814_v53  ;;  %v10674_v61 = vunpack.i.h.bf16 %v7813_v21  ;;  %v10675_v11 = vunpack.i.l.bf16 %v7813_v21 }
 0x421   : > { %v5272_v2 = vpop.permute.xlu1 %5271  ;;  %10673 = vst [vmem:[#allocation54_spill] sm:$0xff] %v7970_v41  ;;  %5346 = vrot.lane.b32.xlu1 %v5345_v6, %s5818_s19  ;;  %v10677_v52 = vunpack.i.h.bf16 %v7764_v50  ;;  %v10678_v53 = vunpack.i.l.bf16 %v7764_v50  ;;  %v5234_v63 = vunpack.i.h.bf16 %v7839_v17  ;;  %v5284_v41 = vunpack.i.h.bf16 %v7846_v56 }
 0x422   : > { %v7965_v46 = vsel %vm844_vm10, %v10671_v8, %v10670_v29  ;;  %v2309_v59 = vsel %vm2306_vm2, %v10675_v11, %v10674_v61  ;;  %v5274_v37 = vunpack.i.h.bf16 %v5272_v2  ;;  %v5273_v29 = vunpack.i.l.bf16 %v5272_v2  ;;  %v5227_v33 = vpop.permute.xlu0 %5226 }
 0x423   : > { %10672 = vst [vmem:[#allocation53_spill] sm:$0xff] %v7965_v46  ;;  %v10676_v8 = vunpack.i.h.bf16 %v7837_v5  ;;  %v2179_v26 = vsel %vm844_vm10, %v5278_v34, %v10678_v53  ;;  %v7989_v61 = vpop.permute.xlu2 %5296  ;;  %v5229_v6 = vunpack.i.h.bf16 %v5227_v33  ;;  %v5228_v11 = vunpack.i.l.bf16 %v5227_v33 }
 0x424   : > { %v10679_v2 = vunpack.i.h.bf16 %v7797_v1  ;;  %v5233_v34 = vunpack.i.l.bf16 %v7839_v17  ;;  %v5298_v53 = vunpack.i.l.bf16 %v7989_v61 }
 0x425   : > { %v2181_v62 = vsel %vm844_vm10, %v10677_v52, %v10676_v8  ;;  %v10680_v52 = vunpack.i.l.bf16 %v7797_v1  ;;  %v1731_v1 = vsel %vm10683_vm8, %v5284_v41, %v5229_v6  ;;  %v10690_v41 = vpack.i.bf16 %v7862_v42, %v7877_v43  ;;  %vm10714_vm8 = vmmov %vm10712_vm6 }
 0x426   : > { %v7994_v18 = vsel %vm1848_vm11, %v10679_v2, %v5274_v37  ;;  %v10682_v2 = vunpack.i.l.bf16 %v7808_v24  ;;  %v10693_v42 = vunpack.i.l.bf16 %v7629_v51 }
 0x427   : > { %v7999_v8 = vsel %vm1848_vm11, %v5273_v29, %v10680_v52  ;;  %v8009_v33 = vsel %vm1081_vm7, %v7994_v18, %v2181_v62  ;;  %v10684_v29 = vunpack.i.l.bf16 %v7660_v49  ;;  %v10686_v52 = vunpack.i.h.bf16 %v7660_v49 }
 0x428   : > { %v8005_v50 = vsel %vm1081_vm7, %v7999_v8, %v2179_v26  ;;  %v1818_v27 = vsel %vm1813_vm15, %v5218_v0, %v10682_v2  ;;  %v10353_v26 = vunpack.i.h.bf16 %v7989_v61  ;;  %5326 = vrot.lane.b32.xlu0 %v10690_v41, %s5818_s19  ;;  %v5258_v41 = vunpack.i.l.bf16 %v7818_v36 }
 0x429   : > { %10681 = vst [vmem:[#allocation55_spill] sm:$0xff] %v8005_v50  ;;  %v1732_v17 = vsel %vm10685_vm9, %v5229_v6, %v10684_v29  ;;  %v1734_v5 = vsel %vm10687_vm1, %v10686_v52, %v5228_v11  ;;  %v8023_v50 = vsel %vm1848_vm11, %v5274_v37, %v5298_v53  ;;  %v8050_v2 = vpop.permute.xlu1 %5291  ;;  %v8056_v29 = vsel %vm1045_vm3, %v7464_v25, %v1731_v1  ;;  %vm10720_vm9 = vmmov %vm10698_vm0 }
 0x42a   : > { %v8027_v62 = vsel %vm1045_vm3, %v7469_v45, %v1734_v5  ;;  %v8030_v0 = vsel %vm1063_vm13, %v1734_v5, %v1774_v19  ;;  %v8042_v37 = vsel %vm1045_vm3, %v7486_v44, %v1732_v17  ;;  %v8045_v45 = vsel %vm1063_vm13, %v1732_v17, %v1772_v40 }
 0x42b   : > { %10688 = vst [vmem:[#allocation56_spill] sm:$0xff] %v8027_v62  ;;  %v5355_v49 = vpack.i.bf16 %v7899_v13, %v8027_v62  ;;  %v5360_v6 = vpack.i.bf16 %v7948_v54, %v8030_v0  ;;  %v10691_v5 = vunpack.i.l.bf16 %v7833_v7  ;;  %v8059_v52 = vsel %vm1063_vm13, %v1731_v1, %v1771_v38  ;;  %v5242_v1 = vpop.permute.xlu0 %5241  ;;  %v10810_v13 = vld [vmem:[#allocation34_spill] sm:$0xff] }
 0x42c   : > { %10689 = vst [vmem:[#allocation57_spill] sm:$0xff] %v8030_v0  ;;  %v10355_v44 = vunpack.i.h.bf16 %v7908_v4  ;;  %v10354_v40 = vunpack.i.l.bf16 %v8050_v2  ;;  %v5243_v7 = vunpack.i.l.bf16 %v5242_v1  ;;  %v5248_v25 = vunpack.i.l.bf16 %v7892_v57 }
 0x42d   : > { %v1775_v19 = vsel %vm607_vm4, %v10691_v5, %v5233_v34  ;;  %5356 = vrot.lane.b32.xlu1 %v5355_v49, %s5818_s19  ;;  %5361 = vrot.lane.b32.xlu2 %v5360_v6, %s5818_s19  ;;  %v2333_v49 = vsel %vm1045_vm3, %v2309_v59, %v7965_v46  ;;  %v8079_v6 = vsel %vm1848_vm11, %v5298_v53, %v10353_v26  ;;  %v5244_v5 = vunpack.i.h.bf16 %v5242_v1 }
 0x42e   : > { %v8072_v38 = vsel %vm1081_vm7, %v1775_v19, %v1818_v27  ;;  %v2121_v17 = vsel %vm1813_vm15, %v10355_v44, %v10354_v40  ;;  %v8089_v27 = vsel %vm607_vm4, %v5234_v63, %v10693_v42  ;;  %v8092_v59 = vsel %vm607_vm4, %v5233_v34, %v5234_v63 }
 0x42f   : > { %10692 = vst [vmem:[#allocation58_spill] sm:$0xff] %v8072_v38  ;;  %v8097_v53 = vsel %vm1063_vm13, %v2121_v17, %v8079_v6  ;;  %v10695_v1 = vunpack.i.l.bf16 %v7770_v12  ;;  %v1735_v40 = vsel %vm10697_vm5, %v5228_v11, %v5243_v7  ;;  %v1736_v44 = vsel %vm10698_vm0, %v5243_v7, %v5244_v5  ;;  %vm10742_vm5 = vmmov %vm10712_vm6 }
 0x430   : > { %10694 = vst [vmem:[#allocation59_spill] sm:$0xff] %v8097_v53  ;;  %v5365_v42 = vpack.i.bf16 %v7888_v15, %v8072_v38  ;;  %v8108_v63 = vsel %vm1045_vm3, %v7562_v58, %v1735_v40  ;;  %v8111_v34 = vsel %vm1063_vm13, %v1735_v40, %v1775_v19  ;;  %v8115_v62 = vsel %vm1045_vm3, %v7558_v20, %v1736_v44  ;;  %v10775_v53 = vld [vmem:[#allocation31_spill] sm:$0xff] }
 0x431   : > { %v1737_v26 = vsel %vm10696_vm14, %v5244_v5, %v10695_v1  ;;  %10699 = vst [vmem:[#allocation60_spill] sm:$0xff] %v8108_v63  ;;  %v5370_v15 = vpack.i.bf16 %v8042_v37, %v2333_v49  ;;  %v5375_v7 = vpack.i.bf16 %v8045_v45, %v8108_v63  ;;  %v8128_v19 = vsel %vm1063_vm13, %v1736_v44, %v8092_v59 }
 0x432   : > { %10700 = vst [vmem:[#allocation61_spill] sm:$0xff] %v8111_v34  ;;  %v8119_v1 = vsel %vm1045_vm3, %v7541_v16, %v1737_v26  ;;  %5366 = vrot.lane.b32.xlu0 %v5365_v42, %s5818_s19  ;;  %v10704_v20 = vunpack.i.h.bf16 %v7799_v28  ;;  %v8135_v16 = vpop.permute.xlu1 %5306  ;;  %v8139_v5 = vsel %vm1063_vm13, %v1737_v26, %v8089_v27  ;;  %v10707_v44 = vunpack.i.h.bf16 %v7892_v57 }
 0x433   : > { %10701 = vst [vmem:[#allocation62_spill] sm:$0xff] %v8115_v62  ;;  %v5308_v26 = vunpack.i.l.bf16 %v8135_v16  ;;  %v10709_v49 = vunpack.i.l.bf16 %v7700_v60  ;;  %v10710_v42 = vunpack.i.h.bf16 %v7813_v21  ;;  %v8167_v28 = vpop.permute.xlu0 %5251  ;;  %v10715_v63 = vunpack.i.h.bf16 %v7772_v22 }
 0x434   : > { %10702 = vst [vmem:[#allocation63_spill] sm:$0xff] %v8119_v1  ;;  %v8133_v40 = vsel %vm844_vm10, %v10704_v20, %v5248_v25  ;;  %v8148_v11 = vsel %vm844_vm10, %v5248_v25, %v10707_v44  ;;  %v10711_v25 = vunpack.i.h.bf16 %v7732_v10  ;;  %v10716_v20 = vunpack.i.l.bf16 %v7772_v22 }
 0x435   : > { %10703 = vst [vmem:[#allocation64_spill] sm:$0xff] %v8128_v19  ;;  %5371 = vrot.lane.b32.xlu1 %v5370_v15, %s5818_s19  ;;  %5376 = vrot.lane.b32.xlu2 %v5375_v7, %s5818_s19  ;;  %v2310_v57 = vsel %vm2306_vm2, %v10710_v42, %v10709_v49  ;;  %v10713_v15 = vunpack.i.h.bf16 %v7818_v36  ;;  %v5254_v21 = vunpack.i.h.bf16 %v8167_v28  ;;  %v5253_v49 = vunpack.i.l.bf16 %v8167_v28  ;;  %vm10718_vm2 = vmmov %vm10698_vm0 }
 0x436   : > { %10705 = vst [vmem:[#allocation65_spill] sm:$0xff] %v8133_v40  ;;  %v1948_v44 = vsel %vm10712_vm6, %v10711_v25, %v5258_v41  ;;  %v2090_v60 = vsel %vm607_vm4, %v10716_v20, %v10715_v63  ;;  %v10717_v10 = vunpack.i.l.bf16 %v7846_v56  ;;  %v10719_v25 = vunpack.i.h.bf16 %v8135_v16 }
 0x437   : > { %10706 = vst [vmem:[#allocation66_spill] sm:$0xff] %v8139_v5  ;;  %v1949_v7 = vsel %vm10714_vm8, %v5258_v41, %v10713_v15  ;;  %v2334_v15 = vsel %vm1045_vm3, %v2310_v57, %v8133_v40  ;;  %v2335_v63 = vsel %vm1045_vm3, %v7884_v9, %v8148_v11  ;;  %v8194_v28 = vsel %vm1045_vm3, %v2090_v60, %v2121_v17  ;;  %vm10748_vm8 = vmmov %vm10742_vm5 }
 0x438   : > { %10708 = vst [vmem:[#allocation67_spill] sm:$0xff] %v8148_v11  ;;  %v8179_v42 = vsel %vm10718_vm2, %v10717_v10, %v5308_v26  ;;  %v2059_v41 = vsel %vm10720_vm9, %v5308_v26, %v10719_v25  ;;  %v10723_v10 = vunpack.i.h.bf16 %v7738_v35  ;;  %vm10724_vm1 = vcmask 506880   ;;  %vm10774_vm2 = vmmov %vm10742_vm5 }
 0x439   : > { %v8191_v20 = vsel %vm1081_vm7, %v7595_v14, %v2059_v41  ;;  %10722 = vst [vmem:[#allocation69_spill] sm:$0xff] %v8194_v28  ;;  %vm10725_vm14 = vmmov %vm10724_vm1  ;;  %v5380_v57 = vpack.i.bf16 %v7850_v48, %v8111_v34  ;;  %v5239_v60 = vunpack.i.h.bf16 %v7808_v24  ;;  %v10771_v28 = vld [vmem:[#allocation19_spill] sm:$0xff] }
 0x43a   : > { %10721 = vst [vmem:[#allocation68_spill] sm:$0xff] %v8191_v20  ;;  %v1916_v38 = vsel %vm10724_vm1, %v10723_v10, %v5253_v49  ;;  %v1917_v26 = vsel %vm10725_vm14, %v5253_v49, %v5254_v21  ;;  %v5400_v49 = vpack.i.bf16 %v2335_v63, %v2334_v15  ;;  %v10361_v10 = vunpack.i.h.bf16 %v7740_v31  ;;  %vm10743_vm0 = vmmov %vm10724_vm1  ;;  %v10762_v20 = vld [vmem:[#allocation16_spill] sm:$0xff] }
 0x43b   : > { %v8205_v9 = vsel %vm1081_vm7, %v1916_v38, %v1948_v44  ;;  %v8208_v41 = vsel %vm1081_vm7, %v1917_v26, %v1949_v7  ;;  %v8212_v17 = vsel %vm1063_vm13, %v7824_v55, %v1916_v38  ;;  %v8216_v35 = vsel %vm1063_vm13, %v7965_v46, %v1917_v26  ;;  %5381 = vrot.lane.b32.xlu0 %v5380_v57, %s5818_s19  ;;  %v8229_v26 = vpop.permute.xlu0 %5261  ;;  %vm10745_vm6 = vmmov %vm10743_vm0 }
 0x43c   : > { %10726 = vst [vmem:[#allocation70_spill] sm:$0xff] %v8205_v9  ;;  %v5193_v38 = vunpack.i.l.bf16 %v7740_v31  ;;  %v10730_v57 = vunpack.i.l.bf16 %v7635_v3  ;;  %v10731_v63 = vunpack.i.l.bf16 %v7808_v24  ;;  %v10732_v7 = vunpack.i.h.bf16 %v7678_v32  ;;  %vm10776_vm9 = vmmov %vm10743_vm0 }
 0x43d   : > { %10727 = vst [vmem:[#allocation71_spill] sm:$0xff] %v8208_v41  ;;  %5391 = vrot.lane.b32.xlu1 %v7453_v23, %s5817_s18  ;;  %5401 = vrot.lane.b32.xlu2 %v5400_v49, %s5818_s19  ;;  %v8247_v49 = vpop.permute.xlu1 %5311  ;;  %v5385_v32 = vpack.i.bf16 %v7562_v58, %v7489_v47  ;;  %v10738_v58 = vld [vmem:[#allocation46_spill] sm:$0xff]  ;;  %v10773_v14 = vunpack.i.h.bf16 %v8229_v26  ;;  %vm10783_vm1 = vmmov %vm10743_vm0 }
 0x43e   : > { %10728 = vst [vmem:[#allocation72_spill] sm:$0xff] %v8212_v17  ;;  %v1820_v15 = vsel %vm1813_vm15, %v5239_v60, %v10730_v57  ;;  %v1819_v25 = vsel %vm1813_vm15, %v10731_v63, %v5239_v60  ;;  %v8240_v44 = vsel %vm1979_vm12, %v10732_v7, %v5193_v38  ;;  %v8245_v34 = vsel %vm1979_vm12, %v5193_v38, %v10361_v10  ;;  %vm10789_vm14 = vmmov %vm10774_vm2 }
 0x43f   : > { %10729 = vst [vmem:[#allocation73_spill] sm:$0xff] %v8216_v35  ;;  %v8251_v46 = vsel %vm1081_vm7, %v8092_v59, %v1819_v25  ;;  %v8255_v24 = vsel %vm1081_vm7, %v8089_v27, %v1820_v15  ;;  %v5405_v7 = vpack.i.bf16 %v8245_v34, %v8240_v44  ;;  %v10365_v25 = vunpack.i.h.bf16 %v7685_v30 }
 0x440   : > { %10733 = vst [vmem:[#allocation74_spill] sm:$0xff] %v8240_v44  ;;  %v5395_v60 = vpack.i.bf16 %v8255_v24, %v8251_v46  ;;  %v10366_v27 = vunpack.i.l.bf16 %v7685_v30  ;;  %v5263_v15 = vunpack.i.l.bf16 %v8229_v26 }
 0x441   : > { %10734 = vst [vmem:[#allocation75_spill] sm:$0xff] %v8245_v34 }
 0x442   : > { %10735 = vst [vmem:[#allocation76_spill] sm:$0xff] %v8251_v46  ;;  %v10744_v46 = vunpack.i.h.bf16 %v7655_v39 }
 0x443   : > { %10736 = vst [vmem:[#allocation77_spill] sm:$0xff] %v8255_v24  ;;  %5386 = vrot.lane.b32.xlu0 %v5385_v32, %s5830_s29  ;;  %v5267_v59 = vpop.permute.xlu0 %5266 }
 0x444   : > { %v5269_v38 = vunpack.i.h.bf16 %v5267_v59  ;;  %v5268_v57 = vunpack.i.l.bf16 %v5267_v59  ;;  %v5410_v59 = vpack.i.bf16 %v8119_v1, %v8115_v62  ;;  %v10756_v1 = vld [vmem:[#allocation13_spill] sm:$0xff] }
 0x445   : > { %5396 = vrot.lane.b32.xlu1 %v5395_v60, %s5818_s19  ;;  %5406 = vrot.lane.b32.xlu2 %v5405_v7, %s5818_s19  ;;  %v8270_v63 = vpop.permute.xlu1 %5331  ;;  %v10737_v60 = vunpack.i.h.bf16 %v7908_v4 }
 0x446   : > { %v8275_v32 = vsel %vm1813_vm15, %v10365_v25, %v5269_v38  ;;  %v8283_v10 = vsel %vm1813_vm15, %v5268_v57, %v10366_v27  ;;  %v5333_v47 = vunpack.i.l.bf16 %v8270_v63  ;;  %v10740_v27 = vld [vmem:[#allocation55_spill] sm:$0xff] }
 0x447   : > { %v2120_v7 = vsel %vm1813_vm15, %v5269_v38, %v10737_v60  ;;  %v8292_v25 = vsel %vm1063_vm13, %v8283_v10, %v7999_v8  ;;  %v8297_v4 = vsel %vm1063_vm13, %v8275_v32, %v7994_v18  ;;  %v10739_v38 = vld [vmem:[#allocation20_spill] sm:$0xff]  ;;  %v5415_v60 = vpack.i.bf16 %v8139_v5, %v8128_v19 }
 0x448   : > { %v10741_v8 = vunpack.i.h.bf16 %v7818_v36  ;;  %v1918_v18 = vsel %vm10743_vm0, %v5254_v21, %v5333_v47  ;;  %v1919_v57 = vsel %vm10745_vm6, %v5333_v47, %v10744_v46  ;;  %v10747_v5 = vunpack.i.h.bf16 %v10739_v38  ;;  %vm10804_vm6 = vmmov %vm10743_vm0 }
 0x449   : > { %v8326_v36 = vsel %vm1063_vm13, %v8133_v40, %v1918_v18  ;;  %v8335_v46 = vsel %vm1063_vm13, %v8148_v11, %v1919_v57  ;;  %v8352_v11 = vsel %vm1081_vm7, %v10756_v1, %v8179_v42  ;;  %v5430_v42 = vpack.i.bf16 0.0, %v10762_v20 }
 0x44a   : > { %v1950_v62 = vsel %vm10742_vm5, %v10741_v8, %v5263_v15  ;;  %v1951_v24 = vsel %vm10748_vm8, %v5263_v15, %v10747_v5  ;;  %10749 = vst [vmem:[#allocation20_spill] sm:$0xff] %v8326_v36  ;;  %v10753_v15 = vunpack.i.l.bf16 %v7772_v22  ;;  %vm10798_vm5 = vmmov %vm10743_vm0  ;;  %v10811_v1 = vunpack.i.h.bf16 %v10810_v13 }
 0x44b   : > { %5411 = vrot.lane.b32.xlu0 %v5410_v59, %s5818_s19  ;;  %v8316_v59 = vsel %vm1063_vm13, %v2120_v7, %v8023_v50  ;;  %v8329_v21 = vsel %vm1081_vm7, %v1918_v18, %v1950_v62  ;;  %v8331_v47 = vpop.permute.xlu0 %5301  ;;  %10751 = vst [vmem:[#allocation78_spill] sm:$0xff] %v8335_v46  ;;  %v8338_v5 = vsel %vm1081_vm7, %v1919_v57, %v1951_v24  ;;  %v8347_v18 = vpop.permute.xlu2 %5321  ;;  %vm10805_vm8 = vmmov %vm10743_vm0 }
 0x44c   : > { %10746 = vst [vmem:[#allocation46_spill] sm:$0xff] %v8316_v59  ;;  %v5303_v62 = vunpack.i.l.bf16 %v8331_v47  ;;  %v10761_v40 = vunpack.i.h.bf16 %v8331_v47 }
 0x44d   : > { %5416 = vrot.lane.b32.xlu1 %v5415_v60, %s5818_s19  ;;  %5426 = vrot.lane.b32.xlu2 %v7453_v23, %s5809_s28  ;;  %10750 = vst [vmem:[#allocation55_spill] sm:$0xff] %v8329_v21  ;;  %v10754_v23 = vunpack.i.l.bf16 %v10738_v58 }
 0x44e   : > { %10752 = vst [vmem:[#allocation79_spill] sm:$0xff] %v8338_v5  ;;  %v2183_v0 = vsel %vm844_vm10, %v5303_v62, %v10761_v40  ;;  %v10769_v40 = vunpack.i.h.bf16 %v7740_v31 }
 0x44f   : > { %v2089_v60 = vsel %vm607_vm4, %v10754_v23, %v10753_v15  ;;  %10755 = vst [vmem:[#allocation80_spill] sm:$0xff] %v8347_v18  ;;  %v10759_v23 = vld [vmem:[#allocation45_spill] sm:$0xff]  ;;  %v8376_v15 = vsel %vm1081_vm7, %v8079_v6, %v2183_v0  ;;  %v10772_v0 = vld [vmem:[#allocation30_spill] sm:$0xff] }
 0x450   : > { %10757 = vst [vmem:[#allocation81_spill] sm:$0xff] %v8352_v11  ;;  %v8355_v24 = vsel %vm1045_vm3, %v2089_v60, %v2120_v7  ;;  %v10760_v8 = vunpack.i.h.bf16 %v10759_v23  ;;  %v10768_v7 = vld [vmem:[#allocation7_spill] sm:$0xff]  ;;  %v1946_v34 = vsel %vm10774_vm2, %v10773_v14, %v10772_v0  ;;  %vm10807_vm2 = vmmov %vm10743_vm0  ;;  %v10808_v11 = vunpack.i.h.bf16 %v7685_v30 }
 0x451   : > { %10758 = vst [vmem:[#allocation82_spill] sm:$0xff] %v8355_v24 }
 0x452   : > { %v2182_v19 = vsel %vm844_vm10, %v10760_v8, %v5303_v62  ;;  %10764 = vst [vmem:[#allocation16_spill] sm:$0xff] %v8376_v15  ;;  %v5445_v8 = vpack.i.bf16 %v8208_v41, %v8205_v9  ;;  %v10765_v62 = vld [vmem:[#allocation44_spill] sm:$0xff] }
 0x453   : > { %v8372_v60 = vsel %vm1081_vm7, %v8023_v50, %v2182_v19  ;;  %5431 = vrot.lane.b32.xlu0 %v5430_v42, %s5822_s26  ;;  %v5198_v23 = vunpack.i.l.bf16 %v10765_v62  ;;  %v10766_v50 = vld [vmem:[#allocation12_spill] sm:$0xff]  ;;  %v8390_v6 = vpop.permute.xlu2 %5341  ;;  %v10767_v19 = vld [vmem:[#allocation5_spill] sm:$0xff] }
 0x454   : > { %10763 = vst [vmem:[#allocation45_spill] sm:$0xff] %v8372_v60  ;;  %v2337_v57 = vsel %vm1045_vm3, %v10768_v7, %v10767_v19  ;;  %v10384_v20 = vunpack.i.h.bf16 %v8390_v6 }
 0x455   : > { %5421 = vrot.lane.b32.xlu1 %v10766_v50, %s5830_s29  ;;  %5446 = vrot.lane.b32.xlu2 %v5445_v8, %s5818_s19  ;;  %v8398_v41 = vsel %vm1979_vm12, %v10769_v40, %v5198_v23  ;;  %v2327_v8 = vsel %vm1045_vm3, 0.0, %v10771_v28  ;;  %v5440_v40 = vpack.i.bf16 %v8326_v36, %v8216_v35  ;;  %v10792_v36 = vld [vmem:[#allocation3_spill] sm:$0xff] }
 0x456   : > { %10770 = vst [vmem:[#allocation44_spill] sm:$0xff] %v8398_v41  ;;  %v5435_v50 = vpack.i.bf16 %v8212_v17, %v8398_v41  ;;  %v1914_v31 = vsel %vm10776_vm9, %v10384_v20, %v10775_v53  ;;  %v5450_v7 = vpack.i.bf16 %v2327_v8, %v2337_v57  ;;  %v10777_v41 = vld [vmem:[#allocation49_spill] sm:$0xff]  ;;  %v10778_v53 = vunpack.i.h.bf16 %v7635_v3  ;;  %v10779_v57 = vld [vmem:[#allocation6_spill] sm:$0xff] }
 0x457   : > { %v8418_v15 = vsel %vm1063_vm13, %v10777_v41, %v1914_v31  ;;  %v8421_v17 = vsel %vm1081_vm7, %v1914_v31, %v1946_v34  ;;  %v10780_v41 = vld [vmem:[#allocation25_spill] sm:$0xff]  ;;  %v10782_v31 = vunpack.i.h.bf16 %v7655_v39  ;;  %v2328_v14 = vsel %vm1063_vm13, %v10771_v28, %v10779_v57 }
 0x458   : > { %v2329_v0 = vsel %vm1081_vm7, %v10779_v57, %v10778_v53  ;;  %v5064_v8 = vunpack.i.h.bf16 %v10780_v41  ;;  %v10781_v34 = vld [vmem:[#allocation9_spill] sm:$0xff]  ;;  %v10787_v53 = vld [vmem:[#allocation11_spill] sm:$0xff]  ;;  %vm10814_vm9 = vcmask 1042432  }
 0x459   : > { %v1920_v20 = vsel %vm10783_vm1, %v10782_v31, %v10781_v34  ;;  %v2339_v28 = vsel %vm1063_vm13, %v10767_v19, %v10781_v34  ;;  %v10796_v19 = vld [vmem:[#allocation23_spill] sm:$0xff]  ;;  %vm10816_vm1 = vcmask 1031168  }
 0x45a   : > { %v8443_v3 = vsel %vm1979_vm12, %v5198_v23, %v5064_v8 }
 0x45b   : > { %5436 = vrot.lane.b32.xlu0 %v5435_v50, %s5818_s19  ;;  %v5455_v50 = vpack.i.bf16 %v2329_v0, %v8329_v21  ;;  %10786 = vst [vmem:[#allocation12_spill] sm:$0xff] %v8443_v3  ;;  %v10788_v0 = vunpack.i.h.bf16 %v10739_v38 }
 0x45d   : > { %5441 = vrot.lane.b32.xlu1 %v5440_v40, %s5818_s19  ;;  %5451 = vrot.lane.b32.xlu2 %v5450_v7, %s5818_s19  ;;  %v10784_v40 = vld [vmem:[#allocation21_spill] sm:$0xff]  ;;  %v10785_v7 = vld [vmem:[#allocation4_spill] sm:$0xff] }
 0x463   : > { %5456 = vrot.lane.b32.xlu0 %v5455_v50, %s5818_s19  ;;  %v1952_v50 = vsel %vm10789_vm14, %v10788_v0, %v10787_v53  ;;  %vm2014_vm14 = vcmask 457728  }
 0x464   : > { %v8453_v31 = vsel %vm1081_vm7, %v1920_v20, %v1952_v50  ;;  %v10794_v50 = vld [vmem:[#allocation50_spill] sm:$0xff] }
 0x465   : > { %2008 = vrot.lane.b32.xlu1 %v10784_v40, %s5831_s30  ;;  %2146 = vrot.lane.b32.xlu2 %v10785_v7, %s5830_s29  ;;  %10790 = vst [vmem:[#allocation5_spill] sm:$0xff] %v8453_v31  ;;  %v5460_v40 = vpack.i.bf16 %v8443_v3, %v2328_v14  ;;  %v10791_v7 = vld [vmem:[#allocation8_spill] sm:$0xff]  ;;  %v2341_v14 = vsel %vm1081_vm7, %v10781_v34, %v10787_v53  ;;  %v8487_v53 = vpop.permute.xlu2 %5351 }
 0x466   : > { %v5475_v23 = vpack.i.bf16 %v10791_v7, %v8453_v31  ;;  %v8464_v0 = vsel %vm1979_vm12, %v5064_v8, %v10791_v7  ;;  %v5490_v7 = vpack.i.bf16 %v2341_v14, %v2339_v28  ;;  %v5480_v34 = vpack.i.bf16 %v10792_v36, %v10796_v19  ;;  %v8494_v28 = vpop.permute.xlu1 %5336 }
 0x467   : > { %10793 = vst [vmem:[#allocation7_spill] sm:$0xff] %v8464_v0  ;;  %v5465_v57 = vpack.i.bf16 %v8335_v46, %v8464_v0  ;;  %v5334_v31 = vunpack.i.h.bf16 %v8270_v63 }
 0x46b   : > { %5461 = vrot.lane.b32.xlu0 %v5460_v40, %s5818_s19  ;;  %v8476_v40 = vsel %vm1063_vm13, %v10794_v50, %v1920_v20  ;;  %v1698_v20 = vld [vmem:[%s10159_s5 + $0x8] sm:$0xff] }
 0x46c   : > { %10795 = vst [vmem:[#allocation19_spill] sm:$0xff] %v8476_v40  ;;  %v5470_v8 = vpack.i.bf16 %v8338_v5, %v8476_v40 }
 0x46d   : > { %2115 = vrot.lane.b32.xlu1 %v10792_v36, %s5829_s23  ;;  %5476 = vrot.lane.b32.xlu2 %v5475_v23, %s5818_s19  ;;  %v10393_v36 = vunpack.i.h.bf16 %v8487_v53 }
 0x473   : > { %5466 = vrot.lane.b32.xlu0 %v5465_v57, %s5818_s19 }
 0x475   : > { %5471 = vrot.lane.b32.xlu1 %v5470_v8, %s5818_s19  ;;  %5491 = vrot.lane.b32.xlu2 %v5490_v7, %s5818_s19  ;;  %v5353_v8 = vunpack.i.l.bf16 %v8487_v53 }
 0x47b   : > { %5481 = vrot.lane.b32.xlu0 %v5480_v34, %s5831_s30 }
 0x47d   : > { %5486 = vrot.lane.b32.xlu1 %v5430_v42, %s5830_s29 }
 0x485   : > { %2698 = vperm.xlu1 %5018, %v1698_v20   ;;  %v2527_v20 = vsel %vm10798_vm5, %v5353_v8, %v10393_v36  ;;  %vm10818_vm5 = vmmov %vm10743_vm0 }
 0x487   : > { %v8492_v23 = vpop.permute.xlu2 %5361 }
 0x488   : > { %v10404_v21 = vunpack.i.l.bf16 %v8492_v23 }
 0x48f   : > { %v8496_v14 = vpop.permute.xlu2 %5376 }
 0x492   : > { %v8498_v57 = vpop.permute.xlu0 %5316 }
 0x493   : > { %10797 = vst [vmem:[#allocation30_spill] sm:$0xff] %v8498_v57  ;;  %v8502_v42 = vpop.permute.xlu1 %5346 }
 0x494   : > { %v10395_v19 = vunpack.i.h.bf16 %v8502_v42  ;;  %v5348_v34 = vunpack.i.l.bf16 %v8502_v42 }
 0x496   : > { %v2519_v46 = vsel %vm10743_vm0, %v5348_v34, %v10395_v19 }
 0x497   : > { %v8504_v7 = vpop.permute.xlu2 %5401  ;;  %v2668_v5 = vpack.c.bf16 %v2527_v20, %v2519_v46  ;;  %v10800_v46 = vld [vmem:[#allocation38_spill] sm:$0xff]  ;;  %v10801_v20 = vld [vmem:[#allocation39_spill] sm:$0xff] }
 0x498   : > { %v10802_v9 = vunpack.i.h.bf16 %v10801_v20  ;;  %v10803_v3 = vunpack.i.l.bf16 %v10801_v20  ;;  %v10809_v20 = vunpack.i.l.bf16 %v7685_v30  ;;  %v5199_v30 = vunpack.i.h.bf16 %v10765_v62 }
 0x499   : > { %2766 = vmatpush.bf16.msrb.mxu2 %v2668_v5 }
 0x49a   : > { %v8514_v50 = vpop.permute.xlu0 %5326  ;;  %v2149_v63 = vsel %vm1848_vm11, %v10803_v3, %v10802_v9  ;;  %v2118_v9 = vsel %vm1813_vm15, %v10809_v20, %v10808_v11  ;;  %v5144_v3 = vunpack.i.h.bf16 %v7770_v12  ;;  %v1981_v22 = vsel %vm1979_vm12, %v5199_v30, %v7850_v48 }
 0x49b   : > { %v10806_v57 = vunpack.i.l.bf16 %v8514_v50  ;;  %v2275_v60 = vsel %vm1063_vm13, %v2118_v9, %v2149_v63 }
 0x49f   : > { %v8518_v40 = vpop.permute.xlu1 %5356  ;;  %v8520_v0 = vpop.permute.xlu2 %5406 }
 0x4a0   : > { %10799 = vst [vmem:[#allocation31_spill] sm:$0xff] %v8520_v0  ;;  %v5359_v36 = vunpack.i.h.bf16 %v8518_v40  ;;  %v10402_v35 = vunpack.i.l.bf16 %v8518_v40  ;;  %v10407_v19 = vunpack.i.l.bf16 %v8520_v0 }
 0x4a2   : > { %v2503_v55 = vsel %vm10804_vm6, %v5334_v31, %v10402_v35  ;;  %v2511_v18 = vsel %vm10805_vm8, %v5359_v36, %v10404_v21  ;;  %v2549_v5 = vsel %vm10807_vm2, %v10806_v57, %v10407_v19  ;;  %v10812_v21 = vunpack.i.l.bf16 %v10810_v13  ;;  %v10813_v19 = vld [vmem:[#allocation24_spill] sm:$0xff]  ;;  %vm10821_vm6 = vmmov %vm10743_vm0 }
 0x4a3   : > { %v2660_v24 = vpack.c.bf16 %v2511_v18, %v2503_v55  ;;  %v2684_v35 = vpack.c.bf16 %v2549_v5, %v2549_v5  ;;  %v10815_v55 = vunpack.i.l.bf16 %v10800_v46  ;;  %v5094_v13 = vunpack.i.h.bf16 %v7629_v51  ;;  %v10819_v51 = vld [vmem:[#allocation22_spill] sm:$0xff]  ;;  %vm10823_vm8 = vmmov %vm10743_vm0 }
 0x4a4   : > { %v2180_v59 = vsel %vm844_vm10, %v10812_v21, %v10811_v1  ;;  %v8559_v12 = vpop.permute.xlu0 %5366  ;;  %v5364_v1 = vunpack.i.h.bf16 %v8492_v23  ;;  %v10817_v21 = vld [vmem:[#allocation40_spill] sm:$0xff]  ;;  %v10820_v0 = vunpack.i.l.bf16 %v10813_v19  ;;  %vm10826_vm2 = vmmov %vm10816_vm1 }
 0x4a5   : > { %v2283_v57 = vsel %vm1081_vm7, %v2149_v63, %v2180_v59  ;;  %2767 = vmatpush.bf16.msrb.mxu2 %v2660_v24  ;;  %v2718_v11 = vsel %vm10814_vm9, %v2684_v35, 0  ;;  %v2056_v18 = vsel %vm10816_vm1, %v5144_v3, %v10815_v55  ;;  %v5369_v59 = vunpack.i.h.bf16 %v8559_v12  ;;  %vm10828_vm9 = vmmov %vm10743_vm0 }
 0x4a6   : > { %2786 = vmatpush.bf16.msrb.mxu3 %v2718_v11  ;;  %v5168_v62 = vunpack.i.l.bf16 %v10817_v21  ;;  %v2652_v35 = vpack.c.bf16 %v2283_v57, %v2275_v60  ;;  %v2518_v63 = vsel %vm10818_vm5, %v5364_v1, %v5348_v34  ;;  %v2259_v44 = vsel %vm1081_vm7, %v10819_v51, %v2056_v18  ;;  %vm10832_vm1 = vmmov %vm10743_vm0 }
 0x4a7   : > { %v8569_v24 = vpop.permute.xlu1 %5371  ;;  %v2526_v20 = vsel %vm10743_vm0, %v5369_v59, %v5353_v8  ;;  %v2087_v5 = vsel %vm607_vm4, %v5094_v13, %v10820_v0  ;;  %v5379_v60 = vunpack.i.h.bf16 %v8496_v14  ;;  %v5099_v57 = vunpack.i.h.bf16 %v10813_v19  ;;  %vm10834_vm5 = vmmov %vm10743_vm0 }
 0x4a8   : > { %v5374_v55 = vunpack.i.h.bf16 %v8569_v24  ;;  %v2667_v11 = vpack.c.bf16 %v2526_v20, %v2518_v63  ;;  %v2267_v34 = vsel %vm1045_vm3, %v2087_v5, %v2118_v9  ;;  %v10822_v18 = vunpack.i.h.bf16 %v10817_v21  ;;  %v10824_v63 = vld [vmem:[#allocation42_spill] sm:$0xff] }
 0x4a9   : > { %2768 = vmatpush.bf16.msrb.mxu2 %v2652_v35  ;;  %v2644_v1 = vpack.c.bf16 %v2267_v34, %v2259_v44  ;;  %v5164_v35 = vunpack.i.h.bf16 %v10800_v46  ;;  %v2510_v0 = vsel %vm10823_vm8, %v5379_v60, %v5359_v36  ;;  %v5178_v20 = vunpack.i.l.bf16 %v10824_v63  ;;  %v10825_v60 = vld [vmem:[#allocation41_spill] sm:$0xff]  ;;  %vm10841_vm8 = vmmov %vm10743_vm0 }
 0x4aa   : > { %v2502_v8 = vsel %vm10821_vm6, %v5374_v55, %v5334_v31  ;;  %2738 = vmatpush.bf16.msra.mxu0 %v2667_v11  ;;  %v2016_v59 = vsel %vm2014_vm14, %v5168_v62, %v10822_v18  ;;  %v5063_v5 = vunpack.i.l.bf16 %v10780_v41  ;;  %v5078_v11 = vunpack.i.l.bf16 %v10739_v38  ;;  %vm10837_vm6 = vmmov %vm10743_vm0 }
 0x4ab   : > { %v2243_v48 = vsel %vm1045_vm3, %v1981_v22, %v2016_v59  ;;  %v2659_v31 = vpack.c.bf16 %v2510_v0, %v2502_v8  ;;  %v2251_v55 = vsel %vm1063_vm13, %v2016_v59, %v10819_v51  ;;  %v2086_v22 = vsel %vm607_vm4, %v5099_v57, %v5094_v13 }
 0x4ac   : > { %v2636_v36 = vpack.c.bf16 %v2251_v55, %v2243_v48  ;;  %v5329_v18 = vunpack.i.h.bf16 %v8514_v50  ;;  %v2055_v8 = vsel %vm10826_vm2, %v5164_v35, %v5144_v3  ;;  %v1980_v41 = vsel %vm1979_vm12, %v5063_v5, %v5199_v30  ;;  %v8625_v55 = vpop.permute.xlu2 %5426 }
 0x4ad   : > { %2769 = vmatpush.bf16.msrb.mxu2 %v2644_v1  ;;  %v8592_v9 = vpop.permute.xlu0 %5381  ;;  %v5174_v1 = vunpack.i.h.bf16 %v10825_v60  ;;  %v5368_v0 = vunpack.i.l.bf16 %v8559_v12  ;;  %v5373_v51 = vunpack.i.l.bf16 %v8569_v24  ;;  %v10827_v38 = vunpack.i.l.bf16 %v8514_v50  ;;  %v10830_v50 = vld [vmem:[#allocation14_spill] sm:$0xff] }
 0x4ae   : > { %v5384_v44 = vunpack.i.h.bf16 %v8592_v9  ;;  %2739 = vmatpush.bf16.msra.mxu0 %v2659_v31  ;;  %v2015_v48 = vsel %vm2014_vm14, %v5178_v20, %v5168_v62  ;;  %v5339_v13 = vunpack.i.h.bf16 %v8494_v28  ;;  %v5338_v57 = vunpack.i.l.bf16 %v8494_v28 }
 0x4af   : > { %v8599_v34 = vpop.permute.xlu1 %5391  ;;  %v2266_v3 = vsel %vm1045_vm3, %v2086_v22, %v8283_v10  ;;  %v5073_v30 = vunpack.i.l.bf16 %v7655_v39  ;;  %v5294_v35 = vunpack.i.h.bf16 %v8050_v2  ;;  %v10829_v5 = vpack.c.bf16 %v10740_v27, %v8292_v25 }
 0x4b0   : > { %v2548_v59 = vsel %vm10828_vm9, %v5384_v44, %v10827_v38  ;;  %v2258_v44 = vsel %vm1081_vm7, %v10830_v50, %v2055_v8  ;;  %v2242_v62 = vsel %vm1045_vm3, %v1980_v41, %v2015_v48  ;;  %v5343_v20 = vunpack.i.l.bf16 %v8390_v6  ;;  %vm10848_vm9 = vmmov %vm10743_vm0 }
 0x4b1   : > { %2770 = vmatpush.bf16.msrb.mxu2 %v2636_v36  ;;  %v2683_v31 = vpack.c.bf16 %v2548_v59, %v2548_v59  ;;  %vm10831_vm12 = vcmask 1042432   ;;  %v2534_v39 = vsel %vm10832_vm1, %v5329_v18, %v5338_v57  ;;  %v2250_v10 = vsel %vm1063_vm13, %v2015_v48, %v10830_v50  ;;  %vm10852_vm1 = vmmov %vm10743_vm0 }
 0x4b2   : > { %2740 = vmatpush.bf16.msra.mxu0 %v10829_v5  ;;  %v10833_v25 = vunpack.i.h.bf16 %v8502_v42  ;;  %v10835_v22 = vunpack.i.h.bf16 %v8487_v53  ;;  %v5383_v41 = vunpack.i.l.bf16 %v8592_v9  ;;  %v10836_v18 = vpack.c.bf16 %v8421_v17, %v8418_v15  ;;  %v4534_v42 = vld [vmem:[%s10158_s4 + $0x4] sm:$0xf]  ;;  %v4372_v53 = vld [vmem:[%s10158_s4 + $0x8] sm:$0xf0] }
 0x4b3   : > { %v2715_v36 = vsel %vm10831_vm12, %v2683_v31, 0  ;;  %v2643_v59 = vpack.c.bf16 %v2266_v3, %v2258_v44  ;;  %v2541_v31 = vsel %vm10837_vm6, %v5339_v13, %v5343_v20  ;;  %v2635_v17 = vpack.c.bf16 %v2250_v10, %v2242_v62  ;;  %vm10865_vm6 = vmmov %vm10743_vm0 }
 0x4b4   : > { %v2520_v27 = vsel %vm10834_vm5, %v10833_v25, %v5368_v0  ;;  %v2528_v8 = vsel %vm10743_vm0, %v10835_v22, %v5373_v51  ;;  %2758 = vmatpush.bf16.msra.mxu1 %v2715_v36  ;;  %v10838_v15 = vunpack.i.l.bf16 %v10825_v60  ;;  %v10839_v3 = vunpack.i.l.bf16 %v8050_v2 }
 0x4b5   : > { %2771 = vmatpush.bf16.msrb.mxu2 %v10836_v18  ;;  %v8647_v38 = vpop.permute.xlu0 %5386  ;;  %v10840_v44 = vunpack.i.h.bf16 %v8390_v6  ;;  %v5393_v25 = vunpack.i.l.bf16 %v8599_v34  ;;  %v2675_v13 = vpack.c.bf16 %v2541_v31, %v2534_v39  ;;  %v10842_v60 = vunpack.i.h.bf16 %v8229_v26  ;;  %v4535_v39 = vld [vmem:[%s10158_s4 + $0x4] sm:$0xf0] }
 0x4b6   : > { %v5388_v48 = vunpack.i.l.bf16 %v8647_v38  ;;  %v1881_v5 = vsel %vm844_vm10, %v5174_v1, %v10838_v15  ;;  %v8667_v50 = vsel %vm1813_vm15, %v10839_v3, %v5294_v35  ;;  %2741 = vmatpush.bf16.msra.mxu0 %v2643_v59  ;;  %vm10843_vm2 = vcmask 490496   ;;  %v10845_v3 = vld [vmem:[#allocation52_spill] sm:$0xff] }
 0x4b7   : > { %v1913_v36 = vsel %vm10841_vm8, %v5073_v30, %v10840_v44  ;;  %v8673_v22 = vpop.permute.xlu1 %5396  ;;  %v1945_v1 = vsel %vm10843_vm2, %v5078_v11, %v10842_v60  ;;  %v2669_v62 = vpack.c.bf16 %v2528_v8, %v2520_v27  ;;  %v10844_v10 = vunpack.i.h.bf16 %v7989_v61  ;;  %v4370_v61 = vld [vmem:[%s10158_s4] sm:$0xf]  ;;  %v10849_v27 = vld [vmem:[#allocation27_spill] sm:$0xff]  ;;  %vm10869_vm2 = vmmov %vm10743_vm0 }
 0x4b8   : > { %v8683_v15 = vor.u32 %v4534_v42, %v4372_v53  ;;  %v5378_v30 = vunpack.i.l.bf16 %v8496_v14  ;;  %v10846_v44 = vpack.c.bf16 %v10845_v3, %v7948_v54  ;;  %2759 = vmatpush.bf16.msra.mxu1 %v2675_v13  ;;  %v10847_v26 = vunpack.i.l.bf16 %v8492_v23  ;;  %v8733_v3 = vpop.permute.xlu2 %5446 }
 0x4b9   : > { %v2153_v18 = vsel %vm1848_vm11, %v10844_v10, %v5388_v48  ;;  %vm2710_vm12 = vcmask 179200   ;;  %v2226_v14 = vsel %vm1063_vm13, %v1881_v5, %v1913_v36  ;;  %v2234_v23 = vsel %vm1081_vm7, %v1913_v36, %v1945_v1 }
 0x4ba   : > { %2772 = vmatpush.bf16.msrb.mxu2 %v10846_v44  ;;  %v2512_v11 = vsel %vm10848_vm9, %v10847_v26, %v5383_v41  ;;  %v8702_v54 = vsel %vm1063_vm13, %v8667_v50, %v2153_v18  ;;  %v5108_v8 = vunpack.i.l.bf16 %v10849_v27  ;;  %v10850_v59 = vunpack.i.h.bf16 %v8331_v47  ;;  %2742 = vmatpush.bf16.msra.mxu0 %v2635_v17  ;;  %vm10870_vm9 = vmmov %vm10743_vm0 }
 0x4bb   : > { %v10851_v53 = vunpack.i.l.bf16 %v8518_v40  ;;  %v8715_v60 = vor.u32 %v4535_v39, %v4370_v61  ;;  %4376 = vmatmul.msk.bf16.vlgmr.msra.gmra.mxu1 %vm2710_vm12, %v8683_v15  ;;  %v10853_v1 = vpack.c.bf16 %v8045_v45, %v8042_v37  ;;  %v2627_v17 = vpack.c.bf16 %v2234_v23, %v2226_v14  ;;  %v1697_v40 = vld [vmem:[%s10159_s5] sm:$0xff]  ;;  %v10861_v23 = vld [vmem:[#allocation54_spill] sm:$0xff] }
 0x4bc   : > { %2794 = vmatpush.bf16.msrb.mxu1 %v2669_v62  ;;  %v2184_v42 = vsel %vm844_vm10, %v10850_v59, %v5393_v25  ;;  %v5179_v10 = vunpack.i.h.bf16 %v10824_v63  ;;  %2693 = vperm.xlu0 %5495, %v1697_v40   ;;  %v10855_v37 = vunpack.i.l.bf16 %v10800_v46  ;;  %vm10856_vm5 = vcmask 1031168  }
 0x4bd   : > { %v2504_v31 = vsel %vm10852_vm1, %v10851_v53, %v5378_v30  ;;  %v8720_v36 = vsel %vm1081_vm7, %v2153_v18, %v2184_v42  ;;  %v8725_v47 = vpop.permute.xlu0 %5411  ;;  %v10854_v18 = vunpack.i.l.bf16 %v7846_v56  ;;  %v5398_v44 = vunpack.i.l.bf16 %v8673_v22  ;;  %vm10867_vm8 = vmmov %vm10856_vm5 }
 0x4be   : > { %v2661_v13 = vpack.c.bf16 %v2512_v11, %v2504_v31  ;;  %2773 = vmatpush.bf16.msrb.mxu2 %v10853_v1  ;;  %v2656_v62 = vpack.c.bf16 %v8720_v36, %v8702_v54  ;;  %2743 = vmatpush.bf16.msra.mxu0 %v2627_v17  ;;  %v10857_v11 = vld [vmem:[#allocation2_spill] sm:$0xff]  ;;  %v10859_v14 = vunpack.i.l.bf16 %v10738_v58  ;;  %v10860_v56 = vunpack.i.l.bf16 %v10813_v19  ;;  %vm10876_vm1 = vmmov %vm10743_vm0 }
 0x4bf   : > { %v2057_v45 = vsel %vm10856_vm5, %v10855_v37, %v10854_v18  ;;  %v8741_v26 = vpop.permute.xlu1 %5416  ;;  %v10858_v61 = vunpack.i.l.bf16 %v10857_v11  ;;  %v5428_v53 = vunpack.i.l.bf16 %v8625_v55  ;;  %v10863_v31 = vld [vmem:[#allocation18_spill] sm:$0xff]  ;;  %v10864_v58 = vunpack.i.h.bf16 %v10817_v21  ;;  %vm10885_vm5 = vmmov %vm10743_vm0 }
 0x4c0   : > { %2795 = vmatpush.bf16.msrb.mxu1 %v2661_v13  ;;  %v2088_v46 = vsel %vm607_vm4, %v10860_v56, %v10859_v14  ;;  %v5403_v13 = vunpack.i.l.bf16 %v8504_v7  ;;  %v2521_v1 = vsel %vm10743_vm0, %v5368_v0, %v5398_v44  ;;  %v5418_v17 = vunpack.i.l.bf16 %v8741_v26  ;;  %v10873_v14 = vld [vmem:[#allocation31_spill] sm:$0xff] }
 0x4c1   : > { %v1849_v39 = vsel %vm1848_vm11, %v5108_v8, %v10858_v61  ;;  %2774 = vmatmul.bf16.vlgmr.msrb.gmra.mxu2 %v8715_v60  ;;  %v2268_v42 = vsel %vm1045_vm3, %v2088_v46, %v8275_v32  ;;  %v10862_v8 = vpack.c.bf16 %v8009_v33, %v8297_v4  ;;  %v2017_v19 = vsel %vm2014_vm14, %v10864_v58, %v5179_v10  ;;  %v8800_v61 = vpop.permute.xlu2 %5451  ;;  %v10874_v56 = vld [vmem:[#allocation15_spill] sm:$0xff] }
 0x4c2   : > { %v2218_v63 = vsel %vm1045_vm3, %v1849_v39, %v1881_v5  ;;  %v2260_v5 = vsel %vm1081_vm7, %v10863_v31, %v2057_v45  ;;  %v5413_v32 = vunpack.i.l.bf16 %v8725_v47  ;;  %v2529_v4 = vsel %vm10865_vm6, %v5373_v51, %v5403_v13  ;;  %v10871_v39 = vld [vmem:[#allocation35_spill] sm:$0xff]  ;;  %vm10886_vm6 = vmmov %vm10743_vm0 }
 0x4c3   : > { %v2619_v59 = vpack.c.bf16 %v2218_v63, %v10861_v23  ;;  %v2645_v33 = vpack.c.bf16 %v2268_v42, %v2260_v5  ;;  %v2244_v21 = vsel %vm1045_vm3, %v7877_v43, %v2017_v19  ;;  %v2252_v12 = vsel %vm1063_vm13, %v2017_v19, %v10863_v31 }
 0x4c4   : > { %2796 = vmatpush.bf16.msrb.mxu1 %v10862_v8  ;;  %v10866_v0 = vunpack.i.h.bf16 %v8135_v16  ;;  %v2670_v37 = vpack.c.bf16 %v2529_v4, %v2521_v1  ;;  %v10868_v51 = vpack.c.bf16 %v8059_v52, %v8056_v29  ;;  %v2505_v43 = vsel %vm10869_vm2, %v5378_v30, %v5413_v32  ;;  %v10877_v1 = vld [vmem:[#allocation33_spill] sm:$0xff]  ;;  %vm10891_vm2 = vmmov %vm10743_vm0 }
 0x4c5   : > { %2744 = vmatpush.bf16.msra.mxu0 %v2619_v59  ;;  %v8774_v40 = vpop.permute.xlu0 %5431  ;;  %v2513_v16 = vsel %vm10870_vm9, %v5383_v41, %v5418_v17  ;;  %v5313_v11 = vunpack.i.l.bf16 %v8247_v49  ;;  %v10872_v63 = vunpack.i.h.bf16 %v10871_v39  ;;  %v2637_v52 = vpack.c.bf16 %v2252_v12, %v2244_v21  ;;  %v10880_v12 = vld [vmem:[#allocation74_spill] sm:$0xff]  ;;  %v10884_v39 = vld [vmem:[#allocation13_spill] sm:$0xff] }
 0x4c6   : > { %v2060_v18 = vsel %vm10867_vm8, %v10866_v0, %v5428_v53  ;;  %v5433_v45 = vunpack.i.l.bf16 %v8774_v40  ;;  %v5409_v30 = vunpack.i.h.bf16 %v10873_v14  ;;  %v2662_v41 = vpack.c.bf16 %v2513_v16, %v2505_v43  ;;  %vm10887_vm8 = vmmov %vm10743_vm0 }
 0x4c7   : > { %v8786_v24 = vpop.permute.xlu1 %5421  ;;  %v8810_v46 = vsel %vm1081_vm7, %v10874_v56, %v2060_v18  ;;  %v2018_v59 = vsel %vm2014_vm14, %v5179_v10, %v5313_v11  ;;  %v5448_v42 = vunpack.i.l.bf16 %v8733_v3  ;;  %v5399_v8 = vunpack.i.h.bf16 %v8673_v22 }
 0x4c8   : > { %2797 = vmatpush.bf16.msrb.mxu1 %v2645_v33  ;;  %v2091_v29 = vsel %vm607_vm4, %v10872_v63, %v5433_v45  ;;  %v10878_v33 = vld [vmem:[#allocation32_spill] sm:$0xff]  ;;  %v5404_v10 = vunpack.i.h.bf16 %v8504_v7  ;;  %v2245_v22 = vsel %vm1045_vm3, %v10880_v12, %v2018_v59  ;;  %v5449_v0 = vunpack.i.h.bf16 %v8733_v3 }
 0x4c9   : > { %2745 = vmatpush.bf16.msra.mxu0 %v10868_v51  ;;  %v8814_v9 = vsel %vm1045_vm3, %v2091_v29, %v8667_v50  ;;  %v10875_v50 = vunpack.i.l.bf16 %v10873_v14  ;;  %v10879_v4 = vpack.c.bf16 %v10877_v1, %v10878_v33  ;;  %v10882_v51 = vld [vmem:[#allocation46_spill] sm:$0xff]  ;;  %v2253_v63 = vsel %vm1063_vm13, %v2018_v59, %v10884_v39  ;;  %v10888_v59 = vld [vmem:[#allocation28_spill] sm:$0xff] }
 0x4ca   : > { %v2648_v23 = vpack.c.bf16 %v8814_v9, %v8810_v46  ;;  %v2522_v29 = vsel %vm10885_vm5, %v5398_v44, %v5399_v8  ;;  %v2542_v3 = vsel %vm10886_vm6, %v5343_v20, %v5448_v42  ;;  %v5414_v14 = vunpack.i.h.bf16 %v8725_v47  ;;  %v10889_v44 = vld [vmem:[#allocation29_spill] sm:$0xff]  ;;  %v10892_v1 = vld [vmem:[#allocation26_spill] sm:$0xff]  ;;  %v10893_v20 = vld [vmem:[#allocation48_spill] sm:$0xff] }
 0x4cb   : > { %v2550_v5 = vsel %vm10876_vm1, %v10875_v50, %v5409_v30  ;;  %v8858_v50 = vpop.permute.xlu2 %2146  ;;  %v2530_v6 = vsel %vm10891_vm2, %v5403_v13, %v5404_v10  ;;  %v2613_v33 = vpack.c.bf16 %v10893_v20, %v10892_v1  ;;  %vm10894_vm9 = vcmask 1042432   ;;  %vm10899_vm5 = vmmov %vm10743_vm0 }
 0x4cc   : > { %2798 = vmatpush.bf16.msrb.mxu1 %v2637_v52  ;;  %2746 = vmatmul.bf16.vlgmr.msra.gmra.mxu0 %v8715_v60  ;;  %v2685_v16 = vpack.c.bf16 %v2550_v5, %v2550_v5  ;;  %v10890_v5 = vpack.c.bf16 %v10888_v59, %v10889_v44  ;;  %vm10898_vm1 = vmmov %vm10894_vm9  ;;  %v2671_v59 = vpack.c.bf16 %v2530_v6, %v2522_v29 }
 0x4cd   : > { %2822 = vmatpush.bf16.msrb.mxu0 %v2670_v37  ;;  %v8824_v31 = vpop.permute.xlu0 %5436  ;;  %v10881_v37 = vld [vmem:[#allocation45_spill] sm:$0xff]  ;;  %v2543_v44 = vsel %vm10743_vm0, %v5448_v42, %v5449_v0  ;;  %vm10901_vm6 = vmmov %vm10743_vm0 }
 0x4ce   : > { %v5439_v58 = vunpack.i.h.bf16 %v8824_v31  ;;  %v5438_v19 = vunpack.i.l.bf16 %v8824_v31  ;;  %v10883_v43 = vpack.c.bf16 %v10881_v37, %v10882_v51  ;;  %v2721_v12 = vsel %vm10894_vm9, %v2685_v16, 0  ;;  %v10895_v37 = vld [vmem:[#allocation82_spill] sm:$0xff]  ;;  %v10896_v51 = vld [vmem:[#allocation81_spill] sm:$0xff]  ;;  %vm10904_vm2 = vmmov %vm10743_vm0 }
 0x4cf   : > { %v8835_v21 = vpop.permute.xlu1 %5441  ;;  %vm10905_vm9 = vmmov %vm10743_vm0 }
 0x4d0   : > { %2799 = vmatpush.bf16.msrb.mxu1 %v10879_v4  ;;  %v5443_v18 = vunpack.i.l.bf16 %v8835_v21  ;;  %v2535_v7 = vsel %vm10743_vm0, %v5338_v57, %v5439_v58  ;;  %v2551_v52 = vsel %vm10887_vm8, %v5409_v30, %v5438_v19  ;;  %v2638_v4 = vpack.c.bf16 %v2253_v63, %v2245_v22  ;;  %vm10902_vm8 = vmmov %vm10743_vm0 }
 0x4d1   : > { %2823 = vmatpush.bf16.msrb.mxu0 %v2662_v41  ;;  %v5419_v41 = vunpack.i.h.bf16 %v8741_v26  ;;  %v2676_v28 = vpack.c.bf16 %v2542_v3, %v2535_v7  ;;  %v2686_v57 = vpack.c.bf16 %v2551_v52, %v2551_v52  ;;  %v5389_v30 = vunpack.i.h.bf16 %v8647_v38  ;;  %v10900_v3 = vld [vmem:[#allocation30_spill] sm:$0xff] }
 0x4d2   : > { %v2536_v7 = vsel %vm10899_vm5, %v5439_v58, %v5443_v18  ;;  %v5319_v52 = vunpack.i.h.bf16 %v10900_v3  ;;  %v5318_v13 = vunpack.i.l.bf16 %v10900_v3  ;;  %v5444_v22 = vunpack.i.h.bf16 %v8835_v21  ;;  %vm10908_vm5 = vmmov %vm10743_vm0 }
 0x4d3   : > { %2787 = vmatpush.bf16.msrb.mxu3 %v2676_v28  ;;  %v2724_v39 = vsel %vm10898_vm1, %v2686_v57, 0  ;;  %v2506_v58 = vsel %vm10901_vm6, %v5413_v32, %v5414_v14  ;;  %v2677_v28 = vpack.c.bf16 %v2543_v44, %v2536_v7  ;;  %v10903_v57 = vunpack.i.h.bf16 %v10849_v27  ;;  %vm10906_vm1 = vmmov %vm10743_vm0  ;;  %v10907_v27 = vld [vmem:[#allocation80_spill] sm:$0xff] }
 0x4d4   : > { %2800 = vmatpush.bf16.msrb.mxu1 %v10890_v5  ;;  %2842 = vmatpush.bf16.msra.mxu2 %v2724_v39  ;;  %v2514_v5 = vsel %vm10902_vm8, %v5418_v17, %v5419_v41  ;;  %v2523_v47 = vsel %vm10904_vm2, %v5399_v8, %v5318_v13  ;;  %v2537_v17 = vsel %vm10906_vm1, %v5443_v18, %v5444_v22  ;;  %v5324_v6 = vunpack.i.h.bf16 %v10907_v27  ;;  %v5797_v18 = vld [vmem:[%s10155_s1] ss:$0 sm:$0xff]  ;;  %vm10913_vm6 = vmmov %vm10743_vm0 }
 0x4d5   : > { %2824 = vmatpush.bf16.msrb.mxu0 %v10883_v43  ;;  %v10897_v43 = vpack.c.bf16 %v10895_v37, %v10896_v51  ;;  %v8876_v63 = vpop.permute.xlu0 %5456  ;;  %v1852_v42 = vsel %vm1848_vm11, %v10903_v57, %v5389_v30  ;;  %v2663_v32 = vpack.c.bf16 %v2514_v5, %v2506_v58  ;;  %v5323_v1 = vunpack.i.l.bf16 %v10907_v27  ;;  %v8916_v51 = vpop.permute.xlu2 %5476  ;;  %v10914_v5 = vld [vmem:[#allocation51_spill] sm:$0xff]  ;;  %vm10929_vm8 = vmmov %vm10743_vm0 }
 0x4d6   : > { %v5458_v16 = vunpack.i.l.bf16 %v8876_v63  ;;  %4377 = vmatmul.msk.bf16.vlgmr.msrb.gmra.mxu3 %vm2710_vm12, %v8683_v15  ;;  %v2531_v8 = vsel %vm10908_vm5, %v5404_v10, %v5319_v52  ;;  %v10911_v10 = vld [vmem:[#allocation72_spill] sm:$0xff]  ;;  %v5394_v44 = vunpack.i.h.bf16 %v8599_v34  ;;  %vm10931_vm2 = vmmov %vm10743_vm0 }
 0x4d7   : > { %2814 = vmatpush.bf16.msra.mxu3 %v2721_v12  ;;  %v8886_v29 = vpop.permute.xlu1 %2008  ;;  %v10909_v12 = vld [vmem:[#allocation43_spill] sm:$0xff]  ;;  %v2507_v7 = vsel %vm10743_vm0, %v5414_v14, %v5323_v1  ;;  %v2154_v14 = vsel %vm1848_vm11, %v5388_v48, %v8858_v50  ;;  %vm10937_vm5 = vmmov %vm10743_vm0 }
 0x4d8   : > { %2801 = vmatpush.bf16.msrb.mxu1 %v2613_v33  ;;  %v2544_v26 = vsel %vm10905_vm9, %v5449_v0, %v5458_v16  ;;  %v5832_v33 = vmov 1   ;;  %v5314_v0 = vunpack.i.h.bf16 %v8247_v49  ;;  %v2221_v37 = vsel %vm1045_vm3, %v1852_v42, %v10909_v12  ;;  %v10921_v12 = vld [vmem:[#allocation68_spill] sm:$0xff] }
 0x4d9   : > { %2825 = vmatpush.bf16.msrb.mxu0 %v10897_v43  ;;  %v2678_v20 = vpack.c.bf16 %v2544_v26, %v2537_v17  ;;  %5496 = vset.pattern.permute.xlu2 %v5832_v33  ;;  %v10910_v43 = vld [vmem:[#allocation70_spill] sm:$0xff]  ;;  %v2185_v48 = vsel %vm844_vm10, %v5393_v25, %v5394_v44  ;;  %v5423_v33 = vunpack.i.l.bf16 %v8786_v24  ;;  %vm10935_vm9 = vcmask 1042432  }
 0x4da   : > { %2979 = vperm.xlu2 %5496, %v5797_v18   ;;  %v10912_v39 = vpack.c.bf16 %v10910_v43, %v10911_v10  ;;  %v2019_v57 = vsel %vm2014_vm14, %v5313_v11, %v5314_v0  ;;  %v10918_v11 = vld [vmem:[#allocation75_spill] sm:$0xff]  ;;  %v10923_v18 = vmov 0   ;;  %v2020_v43 = vsel %vm2014_vm14, %v5314_v0, %v8886_v29  ;;  %v10924_v10 = vld [vmem:[#allocation57_spill] sm:$0xff]  ;;  %vm10936_vm1 = vmmov %vm10935_vm9 }
 0x4db   : > { %2802 = vmatmul.bf16.vlgmr.msrb.gmra.mxu1 %v8715_v60  ;;  %2815 = vmatpush.bf16.msra.mxu3 %v2677_v28  ;;  %v2622_v28 = vpack.c.bf16 %v2221_v37, %v10914_v5  ;;  %v2246_v17 = vsel %vm1045_vm3, %v10918_v11, %v2019_v57  ;;  %v2255_v36 = vsel %vm1063_vm13, %v2020_v43, %v10874_v56 }
 0x4dc   : > { %2850 = vmatpush.bf16.msra.mxu1 %v2671_v59  ;;  %2843 = vmatpush.bf16.msra.mxu2 %v2678_v20  ;;  %v2515_v59 = vsel %vm10913_vm6, %v5419_v41, %v5324_v6  ;;  %v10916_v41 = vld [vmem:[#allocation59_spill] sm:$0xff]  ;;  %vm10938_vm6 = vmmov %vm10743_vm0 }
 0x4dd   : > { %2826 = vmatpush.bf16.msrb.mxu0 %v2638_v4  ;;  %v2672_v4 = vpack.c.bf16 %v2531_v8, %v2523_v47  ;;  %v8928_v58 = vpop.permute.xlu0 %5461  ;;  %v10915_v47 = vld [vmem:[#allocation16_spill] sm:$0xff]  ;;  %v10919_v8 = vld [vmem:[#allocation10_spill] sm:$0xff] }
 0x4de   : > { %v10917_v26 = vpack.c.bf16 %v10915_v47, %v10916_v41  ;;  %v2254_v20 = vsel %vm1063_vm13, %v2019_v57, %v10919_v8  ;;  %v8984_v57 = vunpack.i.h.bf16 %v8916_v51  ;;  %v5464_v47 = vunpack.i.h.bf16 %v8928_v58 }
 0x4df   : > { %v8938_v42 = vpop.permute.xlu1 %2115  ;;  %4379 = vmatmul.msk.bf16.vlgmr.msra.gmra.mxu2 %vm2710_vm12, %v8683_v15 }
 0x4e0   : > { %2851 = vmatpush.bf16.msra.mxu1 %v2663_v32  ;;  %2878 = vmatpush.bf16.msrb.mxu2 %v2672_v4  ;;  %v2664_v32 = vpack.c.bf16 %v2515_v59, %v2507_v7  ;;  %v8949_v49 = vsel %vm1813_vm15, %v5294_v35, %v8938_v42  ;;  %v8965_v35 = vsel %vm1081_vm7, %v2154_v14, %v2185_v48  ;;  %v10920_v4 = vld [vmem:[#allocation69_spill] sm:$0xff]  ;;  %v5424_v59 = vunpack.i.h.bf16 %v8786_v24  ;;  %v10927_v48 = vld [vmem:[#allocation44_spill] sm:$0xff]  ;;  %vm10928_vm15 = vmmov %vm10743_vm0 }
 0x4e1   : > { %2827 = vmatpush.bf16.msrb.mxu0 %v10912_v39  ;;  %v8962_v2 = vsel %vm1063_vm13, %v8949_v49, %v2154_v14  ;;  %v10922_v37 = vpack.c.bf16 %v10920_v4, %v10921_v12  ;;  %v10925_v39 = vld [vmem:[#allocation56_spill] sm:$0xff]  ;;  %v8986_v14 = vpop.permute.xlu2 %5491  ;;  %v2247_v54 = vsel %vm1045_vm3, %v10927_v48, %v2020_v43  ;;  %v5459_v4 = vunpack.i.h.bf16 %v8876_v63 }
 0x4e2   : > { %v2657_v25 = vpack.c.bf16 %v8965_v35, %v8962_v2  ;;  %5767 = vset.pattern.permute.xlu2 %v10923_v18  ;;  %v10926_v7 = vpack.c.bf16 %v10924_v10, %v10925_v39  ;;  %v5493_v8 = vunpack.i.l.bf16 %v8986_v14  ;;  %v2640_v12 = vpack.c.bf16 %v2255_v36, %v2247_v54  ;;  %v10932_v39 = vld [vmem:[#allocation71_spill] sm:$0xff]  ;;  %v10939_v54 = vld [vmem:[#allocation58_spill] sm:$0xff] }
 0x4e3   : > { %v5453_v48 = vunpack.i.l.bf16 %v8800_v61 }
 0x4e4   : > { %2852 = vmatpush.bf16.msra.mxu1 %v10917_v26  ;;  %2879 = vmatpush.bf16.msrb.mxu2 %v2664_v32  ;;  %v1853_v26 = vsel %vm1848_vm11, %v5389_v30, %v5423_v33  ;;  %v5478_v32 = vunpack.i.l.bf16 %v8916_v51  ;;  %v5494_v51 = vunpack.i.h.bf16 %v8986_v14 }
 0x4e5   : > { %2828 = vmatpush.bf16.msrb.mxu0 %v2622_v28  ;;  %v5467_v5 = vpop.permute.xlu0 %5466  ;;  %v2639_v28 = vpack.c.bf16 %v2254_v20, %v2246_v17 }
 0x4e6   : > { %v5469_v0 = vunpack.i.h.bf16 %v5467_v5  ;;  %v5468_v41 = vunpack.i.l.bf16 %v5467_v5  ;;  %4378 = vmatmul.msk.bf16.vlgmr.msra.gmra.mxu3 %vm2710_vm12, %v8683_v15 }
 0x4e8   : > { %2853 = vmatpush.bf16.msra.mxu1 %v10922_v37  ;;  %2880 = vmatpush.bf16.msrb.mxu2 %v2656_v62  ;;  %v5472_v62 = vpop.permute.xlu1 %5471  ;;  %v2553_v38 = vsel %vm10928_vm15, %v5464_v47, %v5468_v41  ;;  %v2554_v30 = vsel %vm10929_vm8, %v5468_v41, %v8984_v57  ;;  %v10930_v37 = vld [vmem:[#allocation53_spill] sm:$0xff]  ;;  %vm10940_vm15 = vmmov %vm10743_vm0 }
 0x4e9   : > { %2829 = vmatpush.bf16.msrb.mxu0 %v10926_v7  ;;  %v5474_v11 = vunpack.i.h.bf16 %v5472_v62  ;;  %v5473_v17 = vunpack.i.l.bf16 %v5472_v62  ;;  %v2688_v56 = vpack.c.bf16 %v2553_v38, %v2553_v38  ;;  %v2689_v20 = vpack.c.bf16 %v2554_v30, %v2554_v30  ;;  %v10933_v7 = vld [vmem:[#allocation73_spill] sm:$0xff]  ;;  %vm10949_vm8 = vmmov %vm10936_vm1 }
 0x4ea   : > { %v2222_v43 = vsel %vm1045_vm3, %v1853_v26, %v10930_v37  ;;  %v10934_v5 = vpack.c.bf16 %v10932_v39, %v10933_v7  ;;  %v2552_v26 = vsel %vm10938_vm6, %v5438_v19, %v5464_v47  ;;  %v2547_v62 = vsel %vm10940_vm15, %v5478_v32, %v5494_v51  ;;  %v10942_v47 = vld [vmem:[#allocation55_spill] sm:$0xff]  ;;  %v10946_v7 = vld [vmem:[#allocation61_spill] sm:$0xff]  ;;  %vm10957_vm6 = vmmov %vm10949_vm8 }
 0x4eb   : > { %v2539_v10 = vsel %vm10931_vm2, %v5469_v0, %v5473_v17  ;;  %v2733_v41 = vsel %vm10936_vm1, %v2689_v20, 0  ;;  %v2546_v46 = vsel %vm10937_vm5, %v5474_v11, %v5478_v32  ;;  %v2540_v9 = vsel %vm10743_vm0, %v5473_v17, %v5493_v8  ;;  %v10941_v20 = vld [vmem:[#allocation65_spill] sm:$0xff]  ;;  %v10945_v32 = vld [vmem:[#allocation76_spill] sm:$0xff]  ;;  %vm10950_vm2 = vmmov %vm10743_vm0 }
 0x4ec   : > { %2854 = vmatpush.bf16.msra.mxu1 %v2639_v28  ;;  %2830 = vmatmul.bf16.vlgmr.msrb.gmra.mxu0 %v8715_v60  ;;  %v2730_v28 = vsel %vm10935_vm9, %v2688_v56, 0  ;;  %v2623_v36 = vpack.c.bf16 %v2222_v43, %v10939_v54  ;;  %v2680_v17 = vpack.c.bf16 %v2546_v46, %v2539_v10  ;;  %v2681_v38 = vpack.c.bf16 %v2547_v62, %v2540_v9  ;;  %vm10951_vm9 = vmmov %vm10743_vm0  ;;  %v10959_v62 = vld [vmem:[#allocation4_spill] sm:$0xff] }
 0x4ed   : > { %2881 = vmatpush.bf16.msrb.mxu2 %v2648_v23  ;;  %v1854_v23 = vsel %vm1848_vm11, %v5423_v33, %v5424_v59  ;;  %2898 = vmatpush.bf16.msra.mxu0 %v2730_v28  ;;  %v2674_v30 = vpack.c.bf16 %v5453_v48, %v5459_v4  ;;  %v5463_v33 = vunpack.i.l.bf16 %v8928_v58  ;;  %v2687_v56 = vpack.c.bf16 %v2552_v26, %v2552_v26  ;;  %v5482_v39 = vpop.permute.xlu0 %5481  ;;  %v10947_v58 = vld [vmem:[#allocation60_spill] sm:$0xff]  ;;  %vm10952_vm1 = vmmov %vm10743_vm0 }
 0x4ee   : > { %2926 = vmatpush.bf16.msrb.mxu3 %v2733_v41  ;;  %v2223_v31 = vsel %vm1045_vm3, %v1854_v23, %v10941_v20  ;;  %v5454_v19 = vunpack.i.h.bf16 %v8800_v61  ;;  %v2538_v41 = vsel %vm10950_vm2, %v5444_v22, %v5469_v0  ;;  %v2545_v61 = vsel %vm10951_vm9, %v5458_v16, %v5474_v11  ;;  %vm10953_vm5 = vmmov %vm10743_vm0 }
 0x4ef   : > { %v2624_v43 = vpack.c.bf16 %v2223_v31, %v10945_v32  ;;  %v2727_v28 = vsel %vm10949_vm8, %v2687_v56, 0  ;;  %v2524_v46 = vsel %vm10952_vm1, %v5318_v13, %v5459_v4  ;;  %v2690_v9 = vpack.c.bf16 %v8984_v57, %v8984_v57  ;;  %v10954_v4 = vld [vmem:[#allocation64_spill] sm:$0xff]  ;;  %vm10958_vm15 = vmmov %vm10743_vm0  ;;  %v10966_v32 = vld [vmem:[#allocation50_spill] sm:$0xff] }
 0x4f0   : > { %2855 = vmatpush.bf16.msra.mxu1 %v10934_v5  ;;  %v2666_v10 = vpack.c.bf16 %v5463_v33, %v5454_v19  ;;  %v10948_v5 = vpack.c.bf16 %v10946_v7, %v10947_v58  ;;  %v2281_v23 = vsel %vm1063_vm13, %v8938_v42, %v8858_v50  ;;  %v2532_v21 = vsel %vm10953_vm5, %v5319_v52, %v5453_v48  ;;  %v5487_v54 = vpop.permute.xlu1 %5486  ;;  %v10969_v58 = vld [vmem:[#allocation79_spill] sm:$0xff] }
 0x4f1   : > { %2882 = vmatpush.bf16.msrb.mxu2 %v2640_v12  ;;  %2899 = vmatpush.bf16.msra.mxu0 %v2680_v17  ;;  %v10943_v12 = vld [vmem:[#allocation20_spill] sm:$0xff]  ;;  %v5484_v22 = vunpack.i.h.bf16 %v5482_v39  ;;  %v5483_v63 = vunpack.i.l.bf16 %v5482_v39  ;;  %v2679_v16 = vpack.c.bf16 %v2545_v61, %v2538_v41  ;;  %v5429_v13 = vunpack.i.h.bf16 %v8625_v55  ;;  %v10962_v55 = vld [vmem:[#allocation17_spill] sm:$0xff]  ;;  %v10968_v39 = vld [vmem:[#allocation67_spill] sm:$0xff] }
 0x4f2   : > { %2927 = vmatpush.bf16.msrb.mxu3 %v2681_v38  ;;  %v10944_v37 = vpack.c.bf16 %v10942_v47, %v10943_v12  ;;  %v2289_v57 = vsel %vm1081_vm7, %v8858_v50, %v5394_v44  ;;  %v5434_v0 = vunpack.i.h.bf16 %v8774_v40  ;;  %v2673_v11 = vpack.c.bf16 %v2532_v21, %v2524_v46  ;;  %v10955_v50 = vld [vmem:[#allocation62_spill] sm:$0xff]  ;;  %v10963_v47 = vld [vmem:[#allocation19_spill] sm:$0xff]  ;;  %v10972_v41 = vld [vmem:[#allocation37_spill] sm:$0xff] }
 0x4f3   : > { %v2658_v3 = vpack.c.bf16 %v2289_v57, %v2281_v23  ;;  %v2516_v52 = vsel %vm10743_vm0, %v5324_v6, %v5463_v33  ;;  %v10956_v44 = vpack.c.bf16 %v10954_v4, %v10955_v50  ;;  %v2736_v26 = vsel %vm10957_vm6, %v2690_v9, 0  ;;  %v10973_v61 = vld [vmem:[#allocation36_spill] sm:$0xff]  ;;  %v10975_v9 = vld [vmem:[#allocation77_spill] sm:$0xff]  ;;  %v10977_v23 = vld [vmem:[#allocation63_spill] sm:$0xff] }
 0x4f4   : > { %2856 = vmatpush.bf16.msra.mxu1 %v2623_v36  ;;  %v2273_v34 = vsel %vm1045_vm3, %v5434_v0, %v8938_v42  ;;  %v2022_v48 = vsel %vm2014_vm14, %v5483_v63, %v5484_v22  ;;  %v2508_v6 = vsel %vm10958_vm15, %v5323_v1, %v5454_v19  ;;  %v2265_v42 = vsel %vm1081_vm7, %v10959_v62, %v5429_v13 }
 0x4f5   : > { %2883 = vmatpush.bf16.msrb.mxu2 %v10944_v37  ;;  %2934 = vmatpush.bf16.msrb.mxu0 %v2674_v30  ;;  %v2665_v36 = vpack.c.bf16 %v2516_v52, %v2508_v6  ;;  %v2682_v17 = vpack.c.bf16 %v5494_v51, %v5493_v8  ;;  %v2650_v38 = vpack.c.bf16 %v2273_v34, %v2265_v42  ;;  %v10960_v30 = vld [vmem:[#allocation7_spill] sm:$0xff]  ;;  %v5489_v1 = vunpack.i.h.bf16 %v5487_v54  ;;  %v10965_v37 = vld [vmem:[#allocation12_spill] sm:$0xff] }
 0x4f6   : > { %4382 = vmatmul.msk.bf16.vlgmr.msrb.gmra.mxu3 %vm2710_vm12, %v8683_v15  ;;  %v2249_v33 = vsel %vm1045_vm3, %v10960_v30, %v2022_v48  ;;  %v2257_v27 = vsel %vm1063_vm13, %v2022_v48, %v10959_v62  ;;  %v5488_v56 = vunpack.i.l.bf16 %v5487_v54  ;;  %vm10961_vm8 = vcmask 1031168  }
 0x4f7   : > { %v2061_v20 = vsel %vm10961_vm8, %v5428_v53, %v5429_v13  ;;  %v2092_v14 = vsel %vm607_vm4, %v5433_v45, %v5434_v0  ;;  %v2642_v51 = vpack.c.bf16 %v2257_v27, %v2249_v33  ;;  %v2021_v31 = vsel %vm2014_vm14, %v8886_v29, %v5483_v63  ;;  %v10964_v45 = vld [vmem:[#allocation5_spill] sm:$0xff] }
 0x4f8   : > { %2857 = vmatpush.bf16.msra.mxu1 %v10948_v5  ;;  %v2272_v8 = vsel %vm1045_vm3, %v2092_v14, %v8949_v49  ;;  %v1856_v19 = vsel %vm1848_vm11, %v5488_v56, %v5489_v1  ;;  %v2264_v53 = vsel %vm1081_vm7, %v10962_v55, %v2061_v20  ;;  %v2634_v12 = vpack.c.bf16 %v10964_v45, %v10963_v47  ;;  %v10970_v5 = vld [vmem:[#allocation78_spill] sm:$0xff] }
 0x4f9   : > { %2884 = vmatpush.bf16.msrb.mxu2 %v2624_v43  ;;  %2935 = vmatpush.bf16.msrb.mxu0 %v2666_v10  ;;  %v2649_v40 = vpack.c.bf16 %v2272_v8, %v2264_v53  ;;  %v2248_v49 = vsel %vm1045_vm3, %v10965_v37, %v2021_v31  ;;  %v2256_v29 = vsel %vm1063_vm13, %v2021_v31, %v10962_v55 }
 0x4fa   : > { %v2225_v2 = vsel %vm1045_vm3, %v1856_v19, %v10966_v32  ;;  %v2641_v35 = vpack.c.bf16 %v2256_v29, %v2248_v49  ;;  %v1855_v10 = vsel %vm1848_vm11, %v5424_v59, %v5488_v56  ;;  %v10974_v46 = vpack.c.bf16 %v10972_v41, %v10973_v61  ;;  %v10976_v59 = vld [vmem:[#allocation66_spill] sm:$0xff]  ;;  %v9173_v19 = vpop.permute.xlu1 %2698 }
 0x4fb   : > { %2858 = vmatmul.bf16.vlgmr.msra.gmra.mxu1 %v8715_v60  ;;  %v2224_v7 = vsel %vm1045_vm3, %v1855_v10, %v10968_v39  ;;  %v10978_v21 = vpack.c.bf16 %v10976_v59, %v10977_v23  ;;  %v10979_v10 = vmov 0.0  }
 0x4fc   : > { %2870 = vmatpush.bf16.msrb.mxu1 %v2727_v28  ;;  %4381 = vmatmul.msk.bf16.vlgmr.msra.gmra.mxu0 %vm2710_vm12, %v8683_v15  ;;  %v10971_v28 = vpack.c.bf16 %v10969_v58, %v10970_v5  ;;  %v2625_v24 = vpack.c.bf16 %v2224_v7, %v10975_v9 }
 0x4fd   : > { %2885 = vmatpush.bf16.msrb.mxu2 %v10956_v44  ;;  %2936 = vmatpush.bf16.msrb.mxu0 %v2658_v3 }
 0x500   : > { %2871 = vmatpush.bf16.msrb.mxu1 %v2679_v16  ;;  %2886 = vmatmul.bf16.vlgmr.msrb.gmra.mxu2 %v8715_v60 }
 0x501   : > { %2954 = vmatpush.bf16.msra.mxu2 %v2736_v26  ;;  %2937 = vmatpush.bf16.msrb.mxu0 %v2650_v38 }
 0x504   : > { %2906 = vmatpush.bf16.msra.mxu1 %v2673_v11 }
 0x505   : > { %2955 = vmatpush.bf16.msra.mxu2 %v2682_v17  ;;  %2938 = vmatpush.bf16.msrb.mxu0 %v2642_v51 }
 0x508   : > { %2907 = vmatpush.bf16.msra.mxu1 %v2665_v36 }
 0x509   : > { %2939 = vmatpush.bf16.msrb.mxu0 %v2634_v12 }
 0x50b   : > { %4380 = vmatmul.msk.bf16.vlgmr.msrb.gmra.mxu1 %vm2710_vm12, %v8683_v15 }
 0x50c   : > { %2908 = vmatpush.bf16.msra.mxu1 %v2657_v25  ;;  %v10967_v25 = vld [vmem:[#allocation47_spill] sm:$0xff] }
 0x50d   : > { %v2626_v43 = vpack.c.bf16 %v2225_v2, %v10967_v25 }
 0x50f   : > { %2940 = vmatpush.bf16.msrb.mxu0 %v2626_v43 }
 0x510   : > { %2909 = vmatpush.bf16.msra.mxu1 %v2649_v40  ;;  %4383 = vmatmul.msk.bf16.vlgmr.msra.gmra.mxu2 %vm2710_vm12, %v8683_v15 }
 0x513   : > { %2941 = vmatpush.bf16.msrb.mxu0 %v10974_v46 }
 0x514   : > { %2910 = vmatpush.bf16.msra.mxu1 %v2641_v35 }
 0x516   : > { %2942 = vmatmul.bf16.vlgmr.msrb.gmra.mxu0 %v8715_v60 }
 0x518   : > { %2911 = vmatpush.bf16.msra.mxu1 %v10971_v28 }
 0x51c   : > { %2912 = vmatpush.bf16.msra.mxu1 %v2625_v24 }
 0x520   : > { %2913 = vmatpush.bf16.msra.mxu1 %v10978_v21 }
 0x523   : > { %2914 = vmatmul.bf16.vlgmr.msra.gmra.mxu1 %v8715_v60 }
 0x52e   : > { %v9142_v15 = vpop.permute.xlu0 %2693 }
 0x534   : > { %v9162_v17 = vpop.permute.xlu2 %2979 }
 0x538   : > { %v2761_v16 = vpop.f32.mrf.mxu1 }
 0x540   : > { %v9147_v57 = vpop.f32.mrf.mxu1 }
 0x544   : > { %v2775_v0 = vpop.f32.mrf.mxu2 }
 0x545   : > { %v2776_v53 = vadd.f32 %v2775_v0, %v9142_v15 }
 0x549   : > { %v2747_v22 = vpop.f32.mrf.mxu0 }
 0x54a   : > { %v2748_v63 = vadd.f32 %v2747_v22, %v9142_v15 }
 0x54c   : > { %v9145_v13 = vadd.f32 %v2761_v16, %v2748_v63  ;;  %v9153_v52 = vpop.f32.mrf.mxu2 }
 0x551   : > { %v9149_v11 = vpop.f32.mrf.mxu0 }
 0x558   : > { %v9151_v3 = vpop.f32.mrf.mxu1 }
 0x559   : > { %v2789_v50 = vpop.f32.mrf.mxu3 }
 0x55a   : > { %v2790_v49 = vadd.f32 %v2789_v50, %v2776_v53 }
 0x55c   : > { %v2983_v7 = vmul.f32 %v9162_v17, %v2790_v49  ;;  %vm2963_vm2 = vcmp.gt.f32.partialorder %v2790_v49, 0.0 }
 0x55e   : > { %v9190_v61 = vsel %vm2963_vm2, %v2790_v49, %v2983_v7  ;;  %vm2962_vm2 = vcmp.gt.f32.partialorder %v9145_v13, 0.0  ;;  %v2750_v49 = vadd.f32 %v9149_v11, %v9173_v19 }
 0x560   : > { %v9155_v4 = vpop.f32.mrf.mxu1 }
 0x561   : > { %v9159_v6 = vpop.f32.mrf.mxu3 }
 0x562   : > { %v9157_v60 = vpop.f32.mrf.mxu2 }
 0x569   : > { %v2831_v34 = vpop.f32.mrf.mxu0  ;;  %v9165_v33 = vpop.f32.mrf.mxu3 }
 0x56a   : > { %v2847_v48 = vpop.f32.mrf.mxu2  ;;  %v2832_v21 = vadd.f32 %v2831_v34, %v9142_v15 }
 0x571   : > { %v2833_v44 = vpop.f32.mrf.mxu0  ;;  %v2819_v37 = vpop.f32.mrf.mxu3 }
 0x572   : > { %v2834_v40 = vadd.f32 %v2833_v44, %v9173_v19 }
 0x574   : > { %v2848_v29 = vadd.f32 %v2847_v48, %v2834_v40 }
 0x576   : > { %v2993_v58 = vmul.f32 %v9162_v17, %v2848_v29  ;;  %vm2973_vm9 = vcmp.gt.f32.partialorder %v2848_v29, 0.0 }
 0x578   : > { %v2859_v26 = vpop.f32.mrf.mxu1  ;;  %v9192_v46 = vsel %vm2973_vm9, %v2848_v29, %v2993_v58 }
 0x579   : > { %v2901_v54 = vpop.f32.mrf.mxu0  ;;  %v2860_v38 = vadd.f32 %v2859_v26, %v9142_v15  ;;  %v2929_v28 = vpop.f32.mrf.mxu3  ;;  %v5522_v0 = vpack.i.bf16 %v9190_v61, %v9192_v46  ;;  %v2846_v26 = vadd.f32 %v9157_v60, %v2832_v21  ;;  %v2806_v60 = vadd.f32 %v9155_v4, %v9173_v19 }
 0x57b   : > { %vm2965_vm6 = vcmp.gt.f32.partialorder %v2846_v26, 0.0 }
 0x580   : > { %v2861_v36 = vpop.f32.mrf.mxu1 }
 0x581   : > { %v2903_v20 = vpop.f32.mrf.mxu0  ;;  %v2862_v47 = vadd.f32 %v2861_v36, %v9173_v19 }
 0x583   : > { %v2887_v62 = vpop.f32.mrf.mxu2 }
 0x584   : > { %v2888_v42 = vadd.f32 %v2887_v62, %v9142_v15 }
 0x586   : > { %v2902_v30 = vadd.f32 %v2901_v54, %v2888_v42 }
 0x588   : > { %v2873_v27 = vpop.f32.mrf.mxu1  ;;  %vm2967_vm3 = vcmp.gt.f32.partialorder %v2902_v30, 0.0  ;;  %v2987_v1 = vmul.f32 %v9162_v17, %v2902_v30 }
 0x589   : > { %v2874_v56 = vadd.f32 %v2873_v27, %v2860_v38  ;;  %v2931_v27 = vpop.f32.mrf.mxu3 }
 0x58a   : > { %v9169_v51 = vsel %vm2967_vm3, %v2902_v30, %v2987_v1  ;;  %v2804_v30 = vadd.f32 %v9151_v3, %v9142_v15  ;;  %v2985_v1 = vmul.f32 %v9162_v17, %v2846_v26 }
 0x58b   : > { %vm2966_vm14 = vcmp.gt.f32.partialorder %v2874_v56, 0.0  ;;  %v2986_v14 = vmul.f32 %v9162_v17, %v2874_v56  ;;  %v2889_v8 = vpop.f32.mrf.mxu2 }
 0x58c   : > { %v2890_v22 = vadd.f32 %v2889_v8, %v9173_v19  ;;  %v2818_v8 = vadd.f32 %v9165_v33, %v2804_v30  ;;  %v3001_v53 = vsel %vm2965_vm6, %v2846_v26, %v2985_v1 }
 0x58d   : > { %v9171_v31 = vsel %vm2966_vm14, %v2874_v56, %v2986_v14  ;;  %v2778_v14 = vadd.f32 %v9153_v52, %v9173_v19 }
 0x58e   : > { %v5497_v55 = vpack.i.bf16 %v9169_v51, %v9171_v31  ;;  %v2904_v48 = vadd.f32 %v2903_v20, %v2890_v22  ;;  %v2984_v33 = vmul.f32 %v9162_v17, %v2818_v8  ;;  %vm2964_vm3 = vcmp.gt.f32.partialorder %v2818_v8, 0.0 }
 0x58f   : > { %v2792_v4 = vadd.f32 %v9159_v6, %v2778_v14 }
 0x590   : > { %v2875_v45 = vpop.f32.mrf.mxu1  ;;  %5498 = vrot.lane.b32.xlu1 %v5497_v55, %s5809_s28  ;;  %v2995_v56 = vmul.f32 %v9162_v17, %v2904_v48  ;;  %vm2975_vm15 = vcmp.gt.f32.partialorder %v2904_v48, 0.0  ;;  %v9243_v29 = vsel %vm2964_vm3, %v2818_v8, %v2984_v33 }
 0x591   : > { %v2876_v12 = vadd.f32 %v2875_v45, %v2862_v47  ;;  %v2991_v6 = vmul.f32 %v9162_v17, %v2792_v4 }
 0x592   : > { %v9226_v40 = vsel %vm2975_vm15, %v2904_v48, %v2995_v56 }
 0x593   : > { %vm2974_vm12 = vcmp.gt.f32.partialorder %v2876_v12, 0.0  ;;  %v2994_v32 = vmul.f32 %v9162_v17, %v2876_v12  ;;  %v2943_v2 = vpop.f32.mrf.mxu0  ;;  %v2957_v35 = vpop.f32.mrf.mxu2 }
 0x594   : > { %v2944_v43 = vadd.f32 %v2943_v2, %v9142_v15 }
 0x595   : > { %v9182_v25 = vsel %vm2974_vm12, %v2876_v12, %v2994_v32  ;;  %vm2971_vm12 = vcmp.gt.f32.partialorder %v2792_v4, 0.0 }
 0x596   : > { %v5502_v39 = vpack.i.bf16 %v9182_v25, %v10979_v10  ;;  %v2958_v5 = vadd.f32 %v2957_v35, %v2944_v43  ;;  %v9247_v2 = vsel %vm2971_vm12, %v2792_v4, %v2991_v6 }
 0x597   : > { %v5527_v43 = vpack.i.bf16 %v9247_v2, %v9243_v29 }
 0x598   : > { %5503 = vrot.lane.b32.xlu0 %v5502_v39, %s5809_s28  ;;  %v2989_v63 = vmul.f32 %v9162_v17, %v2958_v5  ;;  %vm2969_vm1 = vcmp.gt.f32.partialorder %v2958_v5, 0.0  ;;  %v2764_v39 = vadd.f32 %v9147_v57, %v2750_v49 }
 0x59a   : > { %v9204_v54 = vsel %vm2969_vm1, %v2958_v5, %v2989_v63  ;;  %v2990_v11 = vmul.f32 %v9162_v17, %v2764_v39  ;;  %vm2970_vm9 = vcmp.gt.f32.partialorder %v2764_v39, 0.0  ;;  %vm10980_vm1 = vcmask 1031168  }
 0x59b   : > { %v2945_v24 = vpop.f32.mrf.mxu0  ;;  %v2959_v23 = vpop.f32.mrf.mxu2 }
 0x59c   : > { %v2946_v59 = vadd.f32 %v2945_v24, %v9173_v19 }
 0x59e   : > { %v2960_v44 = vadd.f32 %v2959_v23, %v2946_v59 }
 0x5a0   : > { %v2915_v41 = vpop.f32.mrf.mxu1  ;;  %5523 = vrot.lane.b32.xlu0 %v5522_v0, %s5809_s28  ;;  %v2997_v42 = vmul.f32 %v9162_v17, %v2960_v44  ;;  %vm2977_vm0 = vcmp.gt.f32.partialorder %v2960_v44, 0.0 }
 0x5a1   : > { %v2916_v9 = vadd.f32 %v2915_v41, %v9142_v15  ;;  %v2820_v15 = vadd.f32 %v2819_v37, %v2806_v60  ;;  %v2982_v37 = vmul.f32 %v9162_v17, %v9145_v13 }
 0x5a2   : > { %v9222_v3 = vsel %vm2977_vm0, %v2960_v44, %v2997_v42  ;;  %vm10982_vm0 = vmmov %vm10980_vm1 }
 0x5a3   : > { %v2930_v16 = vadd.f32 %v2929_v28, %v2916_v9  ;;  %v5517_v45 = vpack.i.bf16 %v3001_v53, %v9222_v3  ;;  %v2992_v12 = vmul.f32 %v9162_v17, %v2820_v15  ;;  %vm2972_vm14 = vcmp.gt.f32.partialorder %v2820_v15, 0.0  ;;  %vm10983_vm6 = vmmov %vm10982_vm0 }
 0x5a4   : > { %v9250_v35 = vsel %vm2962_vm2, %v9145_v13, %v2982_v37  ;;  %vm10984_vm15 = vmmov %vm10982_vm0 }
 0x5a5   : > { %vm2968_vm5 = vcmp.gt.f32.partialorder %v2930_v16, 0.0  ;;  %v2988_v50 = vmul.f32 %v9162_v17, %v2930_v16  ;;  %v9245_v32 = vsel %vm2972_vm14, %v2820_v15, %v2992_v12  ;;  %vm10986_vm3 = vmmov %vm10982_vm0 }
 0x5a6   : > { %v5532_v10 = vpack.i.bf16 %v9250_v35, %v9245_v32  ;;  %vm10987_vm14 = vmmov %vm10982_vm0 }
 0x5a7   : > { %v9206_v34 = vsel %vm2968_vm5, %v2930_v16, %v2988_v50  ;;  %vm10981_vm5 = vmmov %vm10980_vm1 }
 0x5a8   : > { %v2917_v36 = vpop.f32.mrf.mxu1  ;;  %v5507_v62 = vpack.i.bf16 %v9204_v54, %v9206_v34  ;;  %vm10988_vm12 = vmmov %vm10982_vm0 }
 0x5a9   : > { %v2918_v38 = vadd.f32 %v2917_v36, %v9173_v19  ;;  %v9260_v19 = vsel %vm2970_vm9, %v2764_v39, %v2990_v11  ;;  %vm10989_vm2 = vmmov %vm10982_vm0 }
 0x5aa   : > { %5508 = vrot.lane.b32.xlu2 %v5507_v62, %s5809_s28  ;;  %vm10990_vm9 = vmmov %vm10982_vm0 }
 0x5ab   : > { %v2932_v20 = vadd.f32 %v2931_v27, %v2918_v38 }
 0x5ad   : > { %vm2976_vm8 = vcmp.gt.f32.partialorder %v2932_v20, 0.0  ;;  %v2996_v55 = vmul.f32 %v9162_v17, %v2932_v20 }
 0x5af   : > { %v9228_v47 = vsel %vm2976_vm8, %v2932_v20, %v2996_v55  ;;  %vm10985_vm8 = vmmov %vm10982_vm0 }
 0x5b0   : > { %v5512_v52 = vpack.i.bf16 %v9228_v47, %v9226_v40 }
 0x5b2   : > { %5513 = vrot.lane.b32.xlu1 %v5512_v52, %s5809_s28  ;;  %5518 = vrot.lane.b32.xlu2 %v5517_v45, %s5809_s28 }
 0x5ba   : > { %5528 = vrot.lane.b32.xlu1 %v5527_v43, %s5809_s28  ;;  %5533 = vrot.lane.b32.xlu2 %v5532_v10, %s5809_s28 }
 0x5c2   : > { %3048 = vrot.lane.b32.xlu1 %v9260_v19, %s5809_s28  ;;  %s5833_s28 = smov 4  }
 0x602   : > { %v5499_v7 = vpop.permute.xlu1 %5498 }
 0x603   : > { %v5501_v5 = vunpack.i.h.bf16 %v5499_v7  ;;  %v5500_v28 = vunpack.i.l.bf16 %v5499_v7 }
 0x604   : > { %v5509_v13 = vpop.permute.xlu2 %5508 }
 0x605   : > { %v5510_v58 = vunpack.i.l.bf16 %v5509_v13  ;;  %v3068_v57 = vsel %vm10981_vm5, %v5500_v28, %v5501_v5  ;;  %v5511_v24 = vunpack.i.h.bf16 %v5509_v13  ;;  %vm10992_vm5 = vmmov %vm10982_vm0 }
 0x606   : > { %v9270_v17 = vmax.f32 %v9171_v31, %v3068_v57 }
 0x607   : > { %v3069_v41 = vsel %vm10980_vm1, %v5501_v5, %v5510_v58  ;;  %v3070_v21 = vsel %vm10982_vm0, %v5510_v58, %v5511_v24  ;;  %vm10991_vm1 = vmmov %vm10982_vm0 }
 0x608   : > { %v9267_v9 = vmax.f32 %v9169_v51, %v3069_v41  ;;  %v9278_v0 = vmax.f32 %v9206_v34, %v3070_v21 }
 0x60a   : > { %v5542_v59 = vpack.i.bf16 %v9267_v9, %v9270_v17  ;;  %v5504_v23 = vpop.permute.xlu0 %5503 }
 0x60b   : > { %v5505_v22 = vunpack.i.l.bf16 %v5504_v23  ;;  %v5506_v48 = vunpack.i.h.bf16 %v5504_v23 }
 0x60c   : > { %5543 = vrot.lane.b32.xlu0 %v5542_v59, %s5817_s18  ;;  %v5519_v63 = vpop.permute.xlu2 %5518 }
 0x60d   : > { %v3071_v16 = vsel %vm10983_vm6, %v5511_v24, %v5505_v22  ;;  %v5521_v31 = vunpack.i.h.bf16 %v5519_v63  ;;  %v5520_v34 = vunpack.i.l.bf16 %v5519_v63  ;;  %vm10993_vm6 = vmmov %vm10982_vm0 }
 0x60e   : > { %v3103_v51 = vmax.f32 %v9204_v54, %v3071_v16 }
 0x60f   : > { %v3067_v26 = vsel %vm10984_vm15, %v5521_v31, %v5500_v28  ;;  %v3079_v27 = vsel %vm10986_vm3, %v5520_v34, %v5505_v22  ;;  %vm10994_vm15 = vmmov %vm10982_vm0  ;;  %vm3296_vm3 = vcmask 916480  }
 0x610   : > { %v5547_v50 = vpack.i.bf16 %v3103_v51, %v9278_v0  ;;  %v3099_v42 = vmax.f32 %v3001_v53, %v3067_v26  ;;  %v3111_v8 = vmax.f32 %v9222_v3, %v3079_v27 }
 0x612   : > { %v5524_v44 = vpop.permute.xlu0 %5523  ;;  %5548 = vrot.lane.b32.xlu1 %v5547_v50, %s5817_s18 }
 0x613   : > { %v5525_v36 = vunpack.i.l.bf16 %v5524_v44  ;;  %v5526_v3 = vunpack.i.h.bf16 %v5524_v44 }
 0x614   : > { %v5534_v15 = vpop.permute.xlu2 %5533 }
 0x615   : > { %v3075_v62 = vsel %vm10985_vm8, %v5525_v36, %v5506_v48  ;;  %v5535_v52 = vunpack.i.l.bf16 %v5534_v15  ;;  %v5536_v11 = vunpack.i.h.bf16 %v5534_v15  ;;  %vm3283_vm8 = vcmask 949248  }
 0x616   : > { %v3107_v38 = vmax.f32 %v9192_v46, %v3075_v62 }
 0x617   : > { %v3064_v58 = vsel %vm10993_vm6, %v5536_v11, %v5526_v3 }
 0x618   : > { %v5537_v30 = vpack.i.bf16 %v3107_v38, %v3099_v42 }
 0x61a   : > { %5538 = vrot.lane.b32.xlu2 %v5537_v30, %s5817_s18 }
 0x624   : > { %v5514_v54 = vpop.permute.xlu1 %5513 }
 0x625   : > { %v5516_v60 = vunpack.i.h.bf16 %v5514_v54  ;;  %v5515_v1 = vunpack.i.l.bf16 %v5514_v54 }
 0x627   : > { %v3076_v56 = vsel %vm10987_vm14, %v5506_v48, %v5515_v1  ;;  %v3077_v20 = vsel %vm10988_vm12, %v5515_v1, %v5516_v60  ;;  %v3078_v14 = vsel %vm10989_vm2, %v5516_v60, %v5520_v34  ;;  %vm3762_vm14 = vcmask 130048  }
 0x628   : > { %v9293_v46 = vmax.f32 %v9182_v25, %v3076_v56  ;;  %v9296_v55 = vmax.f32 %v9226_v40, %v3077_v20  ;;  %v9299_v4 = vmax.f32 %v9228_v47, %v3078_v14  ;;  %v3074_v25 = vsel %vm10990_vm9, %v5535_v52, %v5525_v36 }
 0x629   : > { %v9311_v49 = vmax.f32 %v9245_v32, %v3074_v25 }
 0x62a   : > { %v5557_v53 = vpack.i.bf16 %v3111_v8, %v9299_v4  ;;  %v5552_v45 = vpack.i.bf16 %v9296_v55, %v9293_v46 }
 0x62c   : > { %v5529_v33 = vpop.permute.xlu1 %5528  ;;  %5558 = vrot.lane.b32.xlu0 %v5557_v53, %s5817_s18  ;;  %5553 = vrot.lane.b32.xlu2 %v5552_v45, %s5817_s18 }
 0x62d   : > { %v5531_v12 = vunpack.i.h.bf16 %v5529_v33  ;;  %v5530_v40 = vunpack.i.l.bf16 %v5529_v33 }
 0x62f   : > { %v3065_v6 = vsel %vm10991_vm1, %v5526_v3, %v5530_v40  ;;  %v3066_v47 = vsel %vm10992_vm5, %v5530_v40, %v5521_v31  ;;  %v3073_v37 = vsel %vm10982_vm0, %v5531_v12, %v5535_v52 }
 0x630   : > { %v9314_v43 = vmax.f32 %v9190_v61, %v3065_v6  ;;  %v9317_v10 = vmax.f32 %v9243_v29, %v3066_v47  ;;  %v9320_v39 = vmax.f32 %v9247_v2, %v3073_v37  ;;  %v3096_v29 = vmax.f32 %v9250_v35, %v3064_v58 }
 0x632   : > { %v5562_v13 = vpack.i.bf16 %v9317_v10, %v9314_v43  ;;  %v5567_v7 = vpack.i.bf16 %v9311_v49, %v9320_v39 }
 0x634   : > { %5563 = vrot.lane.b32.xlu0 %v5562_v13, %s5817_s18  ;;  %v3049_v32 = vpop.permute.xlu1 %3048  ;;  %5568 = vrot.lane.b32.xlu1 %v5567_v7, %s5817_s18 }
 0x635   : > { %v3072_v61 = vsel %vm10994_vm15, %v3049_v32, %v5531_v12 }
 0x636   : > { %v3104_v2 = vmax.f32 %v9260_v19, %v3072_v61 }
 0x638   : > { %v5572_v5 = vpack.i.bf16 %v3104_v2, %v3096_v29 }
 0x63a   : > { %5573 = vrot.lane.b32.xlu2 %v5572_v5, %s5817_s18  ;;  %s5834_s18 = smov 116  }
 0x674   : > { %v5539_v28 = vpop.permute.xlu2 %5538 }
 0x675   : > { %v5540_v24 = vunpack.i.l.bf16 %v5539_v28  ;;  %v5541_v23 = vunpack.i.h.bf16 %v5539_v28 }
 0x67e   : > { %v5544_v41 = vpop.permute.xlu0 %5543 }
 0x67f   : > { %v5545_v57 = vunpack.i.l.bf16 %v5544_v41  ;;  %v5546_v35 = vunpack.i.h.bf16 %v5544_v41 }
 0x681   : > { %v3163_v21 = vsel %vm844_vm10, %v5540_v24, %v5545_v57  ;;  %v3164_v48 = vsel %vm844_vm10, %v5545_v57, %v5546_v35 }
 0x682   : > { %v3191_v16 = vmax.f32 %v3099_v42, %v3163_v21  ;;  %v3192_v62 = vmax.f32 %v9270_v17, %v3164_v48 }
 0x684   : > { %v9335_v31 = vpop.permute.xlu1 %5548 }
 0x685   : > { %v5550_v19 = vunpack.i.l.bf16 %v9335_v31  ;;  %v5551_v61 = vunpack.i.h.bf16 %v9335_v31 }
 0x686   : > { %v5554_v59 = vpop.permute.xlu2 %5553 }
 0x687   : > { %v5555_v22 = vunpack.i.l.bf16 %v5554_v59  ;;  %v3165_v26 = vsel %vm844_vm10, %v5546_v35, %v5550_v19 }
 0x688   : > { %v3193_v36 = vmax.f32 %v9267_v9, %v3165_v26 }
 0x689   : > { %v3170_v63 = vsel %vm844_vm10, %v5541_v23, %v5555_v22 }
 0x68a   : > { %v3198_v51 = vmax.f32 %v3107_v38, %v3170_v63  ;;  %v5622_v42 = vpack.i.bf16 %v3193_v36, %v3192_v62  ;;  %v5556_v38 = vunpack.i.h.bf16 %v5554_v59 }
 0x68c   : > { %v9338_v50 = vpack.i.bf16 %v3198_v51, %v3191_v16  ;;  %v3531_v44 = vpack.c.bf16 %v3198_v51, %v3191_v16  ;;  %v3171_v34 = vsel %vm844_vm10, %v5555_v22, %v5556_v38 }
 0x68d   : > { %v3199_v60 = vmax.f32 %v9293_v46, %v3171_v34 }
 0x68e   : > { %5603 = vrot.lane.b32.xlu0 %v9338_v50, %s5822_s26  ;;  %3835 = vmatpush.bf16.msrb.mxu1 %v3531_v44 }
 0x694   : > { %v5574_v1 = vpop.permute.xlu2 %5573 }
 0x695   : > { %v5575_v56 = vunpack.i.l.bf16 %v5574_v1  ;;  %v5576_v52 = vunpack.i.h.bf16 %v5574_v1 }
 0x696   : > { %5623 = vrot.lane.b32.xlu0 %v5622_v42, %s5833_s28 }
 0x69e   : > { %v5559_v30 = vpop.permute.xlu0 %5558  ;;  %5628 = vrot.lane.b32.xlu0 %v5622_v42, %s5834_s18 }
 0x69f   : > { %v5560_v54 = vunpack.i.l.bf16 %v5559_v30  ;;  %v5561_v32 = vunpack.i.h.bf16 %v5559_v30 }
 0x6a1   : > { %v3172_v27 = vsel %vm844_vm10, %v5556_v38, %v5560_v54 }
 0x6a2   : > { %v3200_v9 = vmax.f32 %v9296_v55, %v3172_v27 }
 0x6a4   : > { %v5632_v17 = vpack.i.bf16 %v3200_v9, %v3199_v60 }
 0x6a6   : > { %v5564_v20 = vpop.permute.xlu0 %5563  ;;  %5633 = vrot.lane.b32.xlu0 %v5632_v17, %s5830_s29  ;;  %v5569_v14 = vpop.permute.xlu1 %5568 }
 0x6a7   : > { %v5566_v8 = vunpack.i.h.bf16 %v5564_v20  ;;  %v5565_v15 = vunpack.i.l.bf16 %v5564_v20  ;;  %v5571_v53 = vunpack.i.h.bf16 %v5569_v14  ;;  %v5570_v45 = vunpack.i.l.bf16 %v5569_v14 }
 0x6a9   : > { %v3160_v33 = vsel %vm844_vm10, %v5575_v56, %v5565_v15  ;;  %v3161_v3 = vsel %vm844_vm10, %v5565_v15, %v5566_v8  ;;  %v3162_v46 = vsel %vm844_vm10, %v5566_v8, %v5540_v24  ;;  %v3169_v55 = vsel %vm844_vm10, %v5571_v53, %v5541_v23 }
 0x6aa   : > { %v9358_v25 = vmax.f32 %v9314_v43, %v3161_v3  ;;  %v9361_v12 = vmax.f32 %v9317_v10, %v3162_v46  ;;  %v9364_v40 = vmax.f32 %v9311_v49, %v3169_v55  ;;  %v9366_v6 = vmax.f32 %v3096_v29, %v3160_v33 }
 0x6ab   : > { %v3167_v47 = vsel %vm844_vm10, %v5576_v52, %v5570_v45  ;;  %v3168_v37 = vsel %vm844_vm10, %v5570_v45, %v5571_v53  ;;  %v3173_v29 = vsel %vm844_vm10, %v5560_v54, %v5561_v32 }
 0x6ac   : > { %v9370_v11 = vmax.f32 %v3104_v2, %v3167_v47  ;;  %v9373_v13 = vmax.f32 %v9320_v39, %v3168_v37  ;;  %v9377_v43 = vpack.i.bf16 %v9364_v40, %v9361_v12  ;;  %v3526_v39 = vpack.c.bf16 %v9364_v40, %v9361_v12 }
 0x6ad   : > { %v3166_v2 = vsel %vm844_vm10, %v5550_v19, %v5551_v61  ;;  %v3201_v5 = vmax.f32 %v9299_v4, %v3173_v29  ;;  %vm3417_vm10 = vcmask 31744  }
 0x6ae   : > { %5643 = vrot.lane.b32.xlu0 %v5632_v17, %s5822_s26  ;;  %5588 = vrot.lane.b32.xlu2 %v9377_v43, %s5830_s29  ;;  %v5577_v49 = vpack.i.bf16 %v9373_v13, %v9358_v25  ;;  %v3521_v10 = vpack.c.bf16 %v9373_v13, %v9358_v25  ;;  %v9388_v7 = vpack.i.bf16 %v9370_v11, %v9366_v6 }
 0x6af   : > { %v3516_v58 = vpack.c.bf16 %v9370_v11, %v9366_v6  ;;  %v3194_v28 = vmax.f32 %v9278_v0, %v3166_v2  ;;  %v5687_v41 = vpack.i.bf16 %v9373_v13, %v9370_v11  ;;  %v5662_v0 = vpack.i.bf16 %v9358_v25, %v9366_v6 }
 0x6b0   : > { %5578 = vrot.lane.b32.xlu1 %v5577_v49, %s5830_s29 }
 0x6b1   : > { %v5637_v57 = vpack.i.bf16 %v3201_v5, %v3194_v28 }
 0x6b6   : > { %5673 = vrot.lane.b32.xlu0 %v9377_v43, %s5835_s14  ;;  %5593 = vrot.lane.b32.xlu2 %v9338_v50, %s5834_s18 }
 0x6b8   : > { %5583 = vrot.lane.b32.xlu1 %v5577_v49, %s5822_s26 }
 0x6be   : > { %5598 = vrot.lane.b32.xlu2 %v9338_v50, %s5830_s29  ;;  %5688 = vrot.lane.b32.xlu0 %v5687_v41, %s5834_s18 }
 0x6c0   : > { %5638 = vrot.lane.b32.xlu1 %v5637_v57, %s5830_s29 }
 0x6c6   : > { %5608 = vrot.lane.b32.xlu2 %v5622_v42, %s5830_s29  ;;  %5693 = vrot.lane.b32.xlu0 %v5637_v57, %s5834_s18 }
 0x6c8   : > { %5648 = vrot.lane.b32.xlu1 %v5637_v57, %s5822_s26 }
 0x6ce   : > { %5613 = vrot.lane.b32.xlu2 %v5622_v42, %s5822_s26 }
 0x6d0   : > { %5653 = vrot.lane.b32.xlu1 %v5632_v17, %s5833_s28  ;;  %s5837_s28 = smov 3  }
 0x6d6   : > { %5618 = vrot.lane.b32.xlu2 %v9377_v43, %s5822_s26 }
 0x6d8   : > { %5658 = vrot.lane.b32.xlu1 %v5632_v17, %s5834_s18 }
 0x6de   : > { %5668 = vrot.lane.b32.xlu2 %v5687_v41, %s5835_s14 }
 0x6e0   : > { %5663 = vrot.lane.b32.xlu1 %v5662_v0, %s5835_s14 }
 0x6e6   : > { %5683 = vrot.lane.b32.xlu2 %v5662_v0, %s5834_s18 }
 0x6e8   : > { %5678 = vrot.lane.b32.xlu1 %v9338_v50, %s5835_s14 }
 0x700   : > { %v9422_v4 = vpop.permute.xlu0 %5603 }
 0x701   : > { %v5606_v33 = vunpack.i.h.bf16 %v9422_v4  ;;  %v5605_v3 = vunpack.i.l.bf16 %v9422_v4 }
 0x708   : > { %v5624_v24 = vpop.permute.xlu0 %5623  ;;  %v5589_v59 = vpop.permute.xlu2 %5588 }
 0x709   : > { %v5626_v23 = vunpack.i.h.bf16 %v5624_v24  ;;  %v5625_v21 = vunpack.i.l.bf16 %v5624_v24  ;;  %v5591_v35 = vunpack.i.h.bf16 %v5589_v59  ;;  %v5590_v19 = vunpack.i.l.bf16 %v5589_v59 }
 0x70b   : > { %v3418_v22 = vsel %vm3417_vm10, %v5625_v21, %v5626_v23 }
 0x70c   : > { %v5712_v63 = vpack.i.bf16 %v3418_v22, %v5625_v21 }
 0x70e   : > { %5713 = vrot.lane.b32.xlu2 %v5712_v63, %s5822_s26 }
 0x710   : > { %v9426_v16 = vpop.permute.xlu0 %5628  ;;  %v9428_v51 = vpop.permute.xlu2 %5593 }
 0x711   : > { %v5631_v47 = vunpack.i.h.bf16 %v9426_v16  ;;  %v5630_v37 = vunpack.i.l.bf16 %v9426_v16  ;;  %v5595_v5 = vunpack.i.l.bf16 %v9428_v51 }
 0x713   : > { %v3406_v0 = vsel %vm3283_vm8, %v5630_v37, %v5631_v47  ;;  %v3405_v4 = vsel %vm3283_vm8, %v5595_v5, %v5630_v37 }
 0x718   : > { %v9430_v31 = vpop.permute.xlu2 %5598  ;;  %v9434_v26 = vpop.permute.xlu0 %5633 }
 0x719   : > { %v5601_v50 = vunpack.i.h.bf16 %v9430_v31  ;;  %v5600_v44 = vunpack.i.l.bf16 %v9430_v31  ;;  %v5636_v42 = vunpack.i.h.bf16 %v9434_v26  ;;  %v5635_v38 = vunpack.i.l.bf16 %v9434_v26 }
 0x71b   : > { %v9439_v48 = vsel %vm1848_vm11, %v5590_v19, %v5600_v44  ;;  %v9444_v36 = vsel %vm1848_vm11, %v5591_v35, %v5601_v50  ;;  %v3396_v60 = vsel %vm1848_vm11, %v5635_v38, %v5636_v42 }
 0x71c   : > { %v3528_v62 = vpack.c.bf16 %v9444_v36, %v9439_v48 }
 0x720   : > { %v5609_v30 = vpop.permute.xlu2 %5608  ;;  %v9456_v1 = vpop.permute.xlu0 %5643 }
 0x721   : > { %v5611_v34 = vunpack.i.h.bf16 %v5609_v30  ;;  %v5610_v54 = vunpack.i.l.bf16 %v5609_v30  ;;  %v5646_v15 = vunpack.i.h.bf16 %v9456_v1  ;;  %v5645_v53 = vunpack.i.l.bf16 %v9456_v1 }
 0x722   : > { %v9450_v27 = vpop.permute.xlu1 %5578 }
 0x723   : > { %v3394_v9 = vsel %vm1848_vm11, %v5610_v54, %v5611_v34  ;;  %v5581_v56 = vunpack.i.h.bf16 %v9450_v27  ;;  %v5580_v20 = vunpack.i.l.bf16 %v9450_v27  ;;  %v9476_v32 = vsel %vm607_vm4, %v5606_v33, %v5645_v53 }
 0x724   : > { %v5697_v17 = vpack.i.bf16 %v3396_v60, %v3394_v9  ;;  %v9479_v61 = vsel %vm607_vm4, %v5645_v53, %v5646_v15  ;;  %v5727_v9 = vpack.i.bf16 %v3406_v0, %v3405_v4 }
 0x725   : > { %v3316_v14 = vsel %vm1848_vm11, %v5581_v56, %v5591_v35  ;;  %v3315_v8 = vsel %vm1848_vm11, %v5580_v20, %v5590_v19 }
 0x726   : > { %5698 = vrot.lane.b32.xlu0 %v5697_v17, %s5822_s26  ;;  %v3523_v45 = vpack.c.bf16 %v3316_v14, %v3315_v8 }
 0x728   : > { %v5614_v52 = vpop.permute.xlu2 %5613  ;;  %3787 = vmatpush.bf16.msra.mxu3 %v3523_v45 }
 0x729   : > { %v5616_v46 = vunpack.i.h.bf16 %v5614_v52  ;;  %v5615_v55 = vunpack.i.l.bf16 %v5614_v52 }
 0x72a   : > { %v9473_v49 = vpop.permute.xlu1 %5583 }
 0x72b   : > { %v9482_v29 = vsel %vm607_vm4, %v5615_v55, %v5616_v46  ;;  %v9485_v2 = vsel %vm607_vm4, %v5605_v3, %v5615_v55  ;;  %v5586_v59 = vunpack.i.h.bf16 %v9473_v49  ;;  %v5585_v23 = vunpack.i.l.bf16 %v9473_v49  ;;  %v9520_v55 = vpop.permute.xlu0 %5673 }
 0x72c   : > { %v5722_v28 = vpack.i.bf16 %v9479_v61, %v9482_v29  ;;  %v3537_v41 = vpack.c.bf16 %v9479_v61, %v9482_v29  ;;  %v3532_v57 = vpack.c.bf16 %v9476_v32, %v9485_v2  ;;  %v9674_v61 = vld [vmem:[%s10155_s1] ss:$0 sm:$0xff] }
 0x72e   : > { %5723 = vrot.lane.b32.xlu2 %v5722_v28, %s5822_s26  ;;  %v3395_v28 = vsel %vm1848_vm11, %v5601_v50, %v5635_v38 }
 0x730   : > { %v5619_v24 = vpop.permute.xlu2 %5618 }
 0x731   : > { %v5621_v21 = vunpack.i.h.bf16 %v5619_v24  ;;  %v5620_v22 = vunpack.i.l.bf16 %v5619_v24 }
 0x732   : > { %v5639_v63 = vpop.permute.xlu1 %5638 }
 0x733   : > { %v5641_v35 = vunpack.i.h.bf16 %v5639_v63  ;;  %v5640_v19 = vunpack.i.l.bf16 %v5639_v63  ;;  %v3307_v30 = vsel %vm607_vm4, %v5585_v23, %v5620_v22  ;;  %v3308_v60 = vsel %vm607_vm4, %v5586_v59, %v5621_v21  ;;  %v9546_v50 = vpop.permute.xlu0 %5688 }
 0x734   : > { %v3522_v1 = vpack.c.bf16 %v3308_v60, %v3307_v30  ;;  %v9510_v17 = vsel %vm607_vm4, %v5620_v22, %v5605_v3  ;;  %v9513_v14 = vsel %vm607_vm4, %v5621_v21, %v5606_v33  ;;  %v3393_v33 = vsel %vm1848_vm11, %v5600_v44, %v5610_v54 }
 0x735   : > { %v3433_v8 = vsel %vm1848_vm11, %v5636_v42, %v5641_v35  ;;  %v3432_v53 = vsel %vm1848_vm11, %v5611_v34, %v5640_v19  ;;  %v3527_v45 = vpack.c.bf16 %v9513_v14, %v9510_v17  ;;  %v5676_v42 = vunpack.i.h.bf16 %v9520_v55 }
 0x736   : > { %v5702_v52 = vpack.i.bf16 %v3433_v8, %v3432_v53  ;;  %3788 = vmatpush.bf16.msra.mxu3 %v3522_v1  ;;  %5728 = vrot.lane.b32.xlu2 %v5727_v9, %s5822_s26  ;;  %v5737_v24 = vpack.i.bf16 %v3395_v28, %v3393_v33 }
 0x738   : > { %5703 = vrot.lane.b32.xlu1 %v5702_v52, %s5822_s26  ;;  %v5669_v3 = vpop.permute.xlu2 %5668  ;;  %v5675_v52 = vunpack.i.l.bf16 %v9520_v55  ;;  %v3243_v55 = vld [vmem:[%s10161_s7 + $0x58] sm:$0xff] }
 0x739   : > { %v5671_v37 = vunpack.i.h.bf16 %v5669_v3  ;;  %v5670_v1 = vunpack.i.l.bf16 %v5669_v3 }
 0x73a   : > { %v5649_v34 = vpop.permute.xlu1 %5648  ;;  %3789 = vmatpush.bf16.msra.mxu3 %v3521_v10 }
 0x73b   : > { %v5651_v0 = vunpack.i.h.bf16 %v5649_v34  ;;  %v5650_v4 = vunpack.i.l.bf16 %v5649_v34  ;;  %v9538_v44 = vsel %vm3296_vm3, %v5671_v37, %v5676_v42  ;;  %v5694_v19 = vpop.permute.xlu0 %5693 }
 0x73c   : > { %v5696_v60 = vunpack.i.h.bf16 %v5694_v19  ;;  %v5695_v9 = vunpack.i.l.bf16 %v5694_v19 }
 0x73d   : > { %v3427_v54 = vsel %vm607_vm4, %v5646_v15, %v5651_v0  ;;  %v3426_v21 = vsel %vm607_vm4, %v5616_v46, %v5650_v4  ;;  %v5596_v46 = vunpack.i.h.bf16 %v9428_v51  ;;  %v5757_v0 = vpack.i.bf16 %v9476_v32, %v9485_v2  ;;  %v3234_v32 = vld [vmem:[%s10161_s7 + $0x10] sm:$0xff] }
 0x73e   : > { %v5742_v25 = vpack.i.bf16 %v3427_v54, %v3426_v21  ;;  %5738 = vrot.lane.b32.xlu2 %v5737_v24, %s5822_s26  ;;  %v5691_v4 = vunpack.i.h.bf16 %v9546_v50  ;;  %v3438_v3 = vsel %vm3283_vm8, %v5631_v47, %v5695_v9  ;;  %v3298_v21 = vsel %vm3296_vm3, %v5670_v1, %v5671_v37  ;;  %v3238_v9 = vld [vmem:[%s10161_s7 + $0x30] sm:$0xff]  ;;  %v3236_v1 = vld [vmem:[%s10161_s7 + $0x20] sm:$0xff] }
 0x740   : > { %5708 = vrot.lane.b32.xlu1 %v9377_v43, %s5834_s18  ;;  %5743 = vrot.lane.b32.xlu0 %v5742_v25, %s5822_s26  ;;  %v9560_v8 = vpop.permute.xlu2 %5683 }
 0x741   : > { %v5685_v24 = vunpack.i.l.bf16 %v9560_v8 }
 0x742   : > { %v5654_v13 = vpop.permute.xlu1 %5653 }
 0x743   : > { %v5656_v10 = vunpack.i.h.bf16 %v5654_v13  ;;  %v5655_v31 = vunpack.i.l.bf16 %v5654_v13  ;;  %v5690_v13 = vunpack.i.l.bf16 %v9546_v50  ;;  %v4388_v50 = vld [vmem:[%s10160_s6 + $0x10] sm:$0xf0] }
 0x745   : > { %v3419_v26 = vsel %vm3417_vm10, %v5655_v31, %v5656_v10  ;;  %v3285_v37 = vsel %vm3283_vm8, %v5690_v13, %v5691_v4 }
 0x746   : > { %v5747_v38 = vpack.i.bf16 %v3419_v26, %v5655_v31 }
 0x748   : > { %5718 = vrot.lane.b32.xlu1 %v9388_v7, %s5830_s29  ;;  %5748 = vrot.lane.b32.xlu0 %v5747_v38, %s5822_s26 }
 0x74a   : > { %v5659_v15 = vpop.permute.xlu1 %5658 }
 0x74b   : > { %v5661_v22 = vunpack.i.h.bf16 %v5659_v15  ;;  %v5660_v43 = vunpack.i.l.bf16 %v5659_v15 }
 0x74d   : > { %v3407_v63 = vsel %vm3283_vm8, %v5596_v46, %v5660_v43  ;;  %v3408_v35 = vsel %vm3283_vm8, %v5660_v43, %v5661_v22  ;;  %v3439_v33 = vsel %vm3283_vm8, %v5661_v22, %v5696_v60  ;;  %v3242_v60 = vld [vmem:[%s10161_s7 + $0x50] sm:$0xff] }
 0x74e   : > { %v5752_v30 = vpack.i.bf16 %v3408_v35, %v3407_v63  ;;  %v5762_v10 = vpack.i.bf16 %v3439_v33, %v3438_v3  ;;  %v3244_v35 = vld [vmem:[%s10161_s7 + $0x60] sm:$0xff] }
 0x74f   : > { %v3232_v33 = vld [vmem:[%s10161_s7] sm:$0xff] }
 0x750   : > { %5733 = vrot.lane.b32.xlu1 %v9388_v7, %s5822_s26  ;;  %5753 = vrot.lane.b32.xlu0 %v5752_v30, %s5822_s26  ;;  %v5686_v7 = vunpack.i.h.bf16 %v9560_v8  ;;  %v3245_v30 = vld [vmem:[%s10161_s7 + $0x68] sm:$0xff]  ;;  %v3240_v8 = vld [vmem:[%s10161_s7 + $0x40] sm:$0xff] }
 0x752   : > { %v5664_v53 = vpop.permute.xlu1 %5663  ;;  %v3284_v16 = vsel %vm3283_vm8, %v5685_v24, %v5686_v7 }
 0x753   : > { %v5666_v34 = vunpack.i.h.bf16 %v5664_v53  ;;  %v5665_v28 = vunpack.i.l.bf16 %v5664_v53  ;;  %v3519_v22 = vpack.c.bf16 %v3285_v37, %v3284_v16  ;;  %v3237_v53 = vld [vmem:[%s10161_s7 + $0x28] sm:$0xff] }
 0x755   : > { %v3297_v54 = vsel %vm3296_vm3, %v5665_v28, %v5666_v34  ;;  %v9575_v25 = vsel %vm3296_vm3, %v5666_v34, %v5675_v52 }
 0x756   : > { %v3520_v31 = vpack.c.bf16 %v3298_v21, %v3297_v54  ;;  %v3525_v26 = vpack.c.bf16 %v9538_v44, %v9575_v25  ;;  %v4537_v44 = vld [vmem:[%s10160_s6 + $0xc] sm:$0xf]  ;;  %v4396_v25 = vld [vmem:[%s10160_s6 + $0x18] sm:$0xf0] }
 0x758   : > { %5758 = vrot.lane.b32.xlu0 %v5757_v0, %s5822_s26  ;;  %5763 = vrot.lane.b32.xlu1 %v5762_v10, %s5822_s26 }
 0x759   : > { %3790 = vmatpush.bf16.msra.mxu3 %v3520_v31 }
 0x75a   : > { %v5679_v47 = vpop.permute.xlu1 %5678 }
 0x75b   : > { %v5681_v38 = vunpack.i.h.bf16 %v5679_v47  ;;  %v5680_v15 = vunpack.i.l.bf16 %v5679_v47 }
 0x75d   : > { %3791 = vmatpush.bf16.msra.mxu3 %v3519_v22  ;;  %v3365_v43 = vsel %vm3296_vm3, %v5675_v52, %v5680_v15  ;;  %v3366_v63 = vsel %vm3296_vm3, %v5676_v42, %v5681_v38  ;;  %v3241_v42 = vld [vmem:[%s10161_s7 + $0x48] sm:$0xff]  ;;  %v3235_v52 = vld [vmem:[%s10161_s7 + $0x18] sm:$0xff] }
 0x75e   : > { %v3530_v19 = vpack.c.bf16 %v3366_v63, %v3365_v43 }
 0x760   : > { %3836 = vmatpush.bf16.msrb.mxu1 %v3530_v19  ;;  %3603 = vperm.xlu0 %5495, %v3244_v35  }
 0x761   : > { %3608 = vperm.xlu1 %5018, %v3245_v30  }
 0x768   : > { %3593 = vperm.xlu0 %5495, %v3242_v60   ;;  %v5714_v34 = vpop.permute.xlu2 %5713 }
 0x769   : > { %3598 = vperm.xlu1 %5018, %v3243_v55   ;;  %v5716_v51 = vunpack.i.h.bf16 %v5714_v34 }
 0x770   : > { %3588 = vperm.xlu0 %5495, %v3241_v42  }
 0x771   : > { %3573 = vperm.xlu1 %5018, %v3238_v9   ;;  %v3246_v9 = vld [vmem:[%s10161_s7 + $0x70] sm:$0xff] }
 0x772   : > { %3613 = vperm.xlu2 %5767, %v3246_v9   ;;  %v4386_v9 = vld [vmem:[%s10160_s6] sm:$0xf] }
 0x778   : > { %3563 = vperm.xlu0 %5495, %v3236_v1  }
 0x779   : > { %3568 = vperm.xlu1 %5018, %v3237_v53  }
 0x780   : > { %3558 = vperm.xlu0 %5495, %v3235_v52  }
 0x781   : > { %3543 = vperm.xlu1 %5018, %v3232_v33  }
 0x788   : > { %v9624_v24 = vpop.permute.xlu2 %5723 }
 0x789   : > { %v5726_v47 = vunpack.i.h.bf16 %v9624_v24  ;;  %v5725_v37 = vunpack.i.l.bf16 %v9624_v24  ;;  %v4539_v24 = vld [vmem:[%s10160_s6 + $0x14] sm:$0xf0] }
 0x790   : > { %v9640_v19 = vpop.permute.xlu2 %5728 }
 0x791   : > { %v5731_v27 = vunpack.i.h.bf16 %v9640_v19 }
 0x798   : > { %v9622_v28 = vpop.permute.xlu0 %5698 }
 0x799   : > { %v5701_v3 = vunpack.i.h.bf16 %v9622_v28  ;;  %v5700_v54 = vunpack.i.l.bf16 %v9622_v28 }
 0x7aa   : > { %v5704_v0 = vpop.permute.xlu1 %5703 }
 0x7ab   : > { %v5706_v21 = vunpack.i.h.bf16 %v5704_v0  ;;  %v5705_v13 = vunpack.i.l.bf16 %v5704_v0 }
 0x7ad   : > { %v3494_v10 = vsel %vm607_vm4, %v5700_v54, %v5705_v13  ;;  %v3495_v31 = vsel %vm607_vm4, %v5701_v3, %v5706_v21 }
 0x7ae   : > { %v3539_v16 = vpack.c.bf16 %v3495_v31, %v3494_v10 }
 0x7b0   : > { %3883 = vmatpush.bf16.msrb.mxu2 %v3539_v16 }
 0x7b2   : > { %v9636_v38 = vpop.permute.xlu1 %5708  ;;  %v5744_v15 = vpop.permute.xlu0 %5743 }
 0x7b3   : > { %v5711_v22 = vunpack.i.h.bf16 %v9636_v38  ;;  %v5710_v43 = vunpack.i.l.bf16 %v9636_v38  ;;  %v5746_v63 = vunpack.i.h.bf16 %v5744_v15  ;;  %v5745_v35 = vunpack.i.l.bf16 %v5744_v15 }
 0x7b4   : > { %v5836_v38 = vmov 2  }
 0x7b5   : > { %v3357_v30 = vsel %vm3283_vm8, %v5710_v43, %v5595_v5  ;;  %v3358_v60 = vsel %vm3283_vm8, %v5711_v22, %v5596_v46  ;;  %v3492_v55 = vsel %vm607_vm4, %v5725_v37, %v5745_v35  ;;  %v3493_v42 = vsel %vm607_vm4, %v5726_v47, %v5746_v63  ;;  %5795 = vset.pattern.permute.xlu0 %v5836_v38 }
 0x7b6   : > { %v3529_v1 = vpack.c.bf16 %v3358_v60, %v3357_v30  ;;  %v3538_v53 = vpack.c.bf16 %v3493_v42, %v3492_v55  ;;  %v5715_v5 = vunpack.i.l.bf16 %v5714_v34  ;;  %5768 = vset.pattern.permute.xlu2 %v5836_v38  ;;  %v3323_v12 = vsel %vm3283_vm8, %v5686_v7, %v5710_v43  ;;  %v4410_v38 = vld [vmem:[%s10160_s6 + $0x28] sm:$0xf] }
 0x7b7   : > { %3995 = vperm.xlu2 %5768, %v9674_v61   ;;  %v3324_v40 = vsel %vm3283_vm8, %v5691_v4, %v5711_v22 }
 0x7b8   : > { %3837 = vmatpush.bf16.msrb.mxu1 %v3529_v1  ;;  %3884 = vmatpush.bf16.msrb.mxu2 %v3538_v53  ;;  %v3490_v31 = vsel %vm607_vm4, %v5715_v5, %v5716_v51  ;;  %v3524_v28 = vpack.c.bf16 %v3324_v40, %v3323_v12  ;;  %v4549_v12 = vld [vmem:[%s10160_s6 + $0x6c] sm:$0xf]  ;;  %v4444_v40 = vld [vmem:[%s10160_s6 + $0x78] sm:$0xf0] }
 0x7ba   : > { %v5719_v46 = vpop.permute.xlu1 %5718  ;;  %v5749_v52 = vpop.permute.xlu0 %5748 }
 0x7bb   : > { %v5721_v33 = vunpack.i.h.bf16 %v5719_v46  ;;  %v5720_v0 = vunpack.i.l.bf16 %v5719_v46  ;;  %v5751_v21 = vunpack.i.h.bf16 %v5749_v52  ;;  %v5750_v13 = vunpack.i.l.bf16 %v5749_v52  ;;  %v3239_v52 = vld [vmem:[%s10161_s7 + $0x38] sm:$0xff] }
 0x7bc   : > { %3838 = vmatpush.bf16.msrb.mxu1 %v3528_v62  ;;  %3885 = vmatpush.bf16.msrb.mxu2 %v3537_v41  ;;  %v5739_v62 = vpop.permute.xlu2 %5738  ;;  %v4399_v46 = vor.u32 %v4537_v44, %v4396_v25  ;;  %v4466_v44 = vld [vmem:[%s10160_s6 + $0xa0] sm:$0xf]  ;;  %v4558_v25 = vld [vmem:[%s10160_s6 + $0xac] sm:$0xf0] }
 0x7bd   : > { %v3271_v10 = vsel %vm1848_vm11, %v5720_v0, %v5580_v20  ;;  %v3272_v34 = vsel %vm1848_vm11, %v5721_v33, %v5581_v56  ;;  %v3491_v16 = vsel %vm607_vm4, %v5750_v13, %v5751_v21  ;;  %v5730_v56 = vunpack.i.l.bf16 %v9640_v19  ;;  %v4402_v33 = vld [vmem:[%s10160_s6 + $0x20] sm:$0xf]  ;;  %v4542_v0 = vld [vmem:[%s10160_s6 + $0x2c] sm:$0xf0]  ;;  %v4540_v21 = vld [vmem:[%s10160_s6 + $0x24] sm:$0xf] }
 0x7be   : > { %v3518_v48 = vpack.c.bf16 %v3272_v34, %v3271_v10  ;;  %v3536_v36 = vpack.c.bf16 %v3491_v16, %v3490_v31  ;;  %v5741_v20 = vunpack.i.h.bf16 %v5739_v62  ;;  %v5740_v29 = vunpack.i.l.bf16 %v5739_v62  ;;  %v4404_v13 = vld [vmem:[%s10160_s6 + $0x30] sm:$0xf0]  ;;  %v4541_v10 = vld [vmem:[%s10160_s6 + $0x2c] sm:$0xf]  ;;  %v4412_v34 = vld [vmem:[%s10160_s6 + $0x38] sm:$0xf0] }
 0x7bf   : > { %5769 = vset.pattern.permute.xlu2 %v10923_v18  ;;  %v4403_v2 = vor.u32 %v4542_v0, %v4402_v33  ;;  %v4415_v31 = vor.u32 %v4541_v10, %v4412_v34  ;;  %v3233_v16 = vld [vmem:[%s10161_s7 + $0x8] sm:$0xff]  ;;  %v4418_v62 = vld [vmem:[%s10160_s6 + $0x40] sm:$0xf]  ;;  %v4562_v33 = vld [vmem:[%s10160_s6 + $0xcc] sm:$0xf0] }
 0x7c0   : > { %3792 = vmatpush.bf16.msra.mxu3 %v3518_v48  ;;  %3839 = vmatpush.bf16.msrb.mxu1 %v3527_v45  ;;  %v3488_v45 = vsel %vm607_vm4, %v5730_v56, %v5731_v27  ;;  %v3487_v49 = vsel %vm607_vm4, %v5741_v20, %v5701_v3  ;;  %v4543_v48 = vld [vmem:[%s10160_s6 + $0x34] sm:$0xf0]  ;;  %v4544_v56 = vld [vmem:[%s10160_s6 + $0x44] sm:$0xf]  ;;  %v4420_v20 = vld [vmem:[%s10160_s6 + $0x50] sm:$0xf0] }
 0x7c1   : > { %3886 = vmatpush.bf16.msrb.mxu2 %v3536_v36  ;;  %3583 = vperm.xlu2 %5769, %v3240_v8   ;;  %v4411_v36 = vor.u32 %v4543_v48, %v4410_v38  ;;  %v4554_v8 = vld [vmem:[%s10160_s6 + $0x8c] sm:$0xf0]  ;;  %v4560_v0 = vld [vmem:[%s10160_s6 + $0xc4] sm:$0xf]  ;;  %v4561_v10 = vld [vmem:[%s10160_s6 + $0xcc] sm:$0xf] }
 0x7c2   : > { %v5734_v41 = vpop.permute.xlu1 %5733  ;;  %v5754_v15 = vpop.permute.xlu0 %5753  ;;  %v4492_v34 = vld [vmem:[%s10160_s6 + $0xd8] sm:$0xf0]  ;;  %v4563_v38 = vld [vmem:[%s10160_s6 + $0xd4] sm:$0xf0] }
 0x7c3   : > { %v5736_v63 = vunpack.i.h.bf16 %v5734_v41  ;;  %v5735_v35 = vunpack.i.l.bf16 %v5734_v41  ;;  %v5756_v30 = vunpack.i.h.bf16 %v5754_v15  ;;  %v5755_v60 = vunpack.i.l.bf16 %v5754_v15  ;;  %v4545_v15 = vld [vmem:[%s10160_s6 + $0x4c] sm:$0xf] }
 0x7c4   : > { %3840 = vmatpush.bf16.msrb.mxu1 %v3526_v39  ;;  %v3486_v39 = vsel %vm607_vm4, %v5740_v29, %v5700_v54  ;;  %v4423_v41 = vor.u32 %v4544_v56, %v4420_v20 }
 0x7c5   : > { %v3259_v17 = vsel %vm607_vm4, %v5735_v35, %v5585_v23  ;;  %v3260_v14 = vsel %vm607_vm4, %v5736_v63, %v5586_v59  ;;  %v3489_v19 = vsel %vm607_vm4, %v5755_v60, %v5756_v30  ;;  %v4538_v59 = vld [vmem:[%s10160_s6 + $0xc] sm:$0xf0]  ;;  %v4536_v23 = vld [vmem:[%s10160_s6 + $0x4] sm:$0xf]  ;;  %v3534_v3 = vpack.c.bf16 %v3487_v49, %v3486_v39  ;;  %v4428_v63 = vld [vmem:[%s10160_s6 + $0x58] sm:$0xf0] }
 0x7c6   : > { %v3517_v55 = vpack.c.bf16 %v3260_v14, %v3259_v17  ;;  %v3535_v42 = vpack.c.bf16 %v3489_v19, %v3488_v45  ;;  %v4387_v54 = vor.u32 %v4538_v59, %v4386_v9  ;;  %v4391_v22 = vor.u32 %v4536_v23, %v4388_v50  ;;  %v4547_v60 = vld [vmem:[%s10160_s6 + $0x54] sm:$0xf0]  ;;  %v4434_v14 = vld [vmem:[%s10160_s6 + $0x60] sm:$0xf]  ;;  %v4550_v45 = vld [vmem:[%s10160_s6 + $0x6c] sm:$0xf0] }
 0x7c7   : > { %v4431_v35 = vor.u32 %v4545_v15, %v4428_v63  ;;  %v4548_v19 = vld [vmem:[%s10160_s6 + $0x64] sm:$0xf]  ;;  %v4447_v39 = vor.u32 %v4549_v12, %v4444_v40  ;;  %v4442_v49 = vld [vmem:[%s10160_s6 + $0x68] sm:$0xf]  ;;  %v4551_v59 = vld [vmem:[%s10160_s6 + $0x74] sm:$0xf0] }
 0x7c8   : > { %3793 = vmatpush.bf16.msra.mxu3 %v3517_v55  ;;  %3841 = vmatpush.bf16.msrb.mxu1 %v3525_v26  ;;  %v4436_v55 = vld [vmem:[%s10160_s6 + $0x70] sm:$0xf0]  ;;  %v4443_v23 = vor.u32 %v4551_v59, %v4442_v49  ;;  %v4450_v50 = vld [vmem:[%s10160_s6 + $0x80] sm:$0xf] }
 0x7c9   : > { %3887 = vmatpush.bf16.msrb.mxu2 %v3535_v42  ;;  %3578 = vperm.xlu2 %5769, %v3239_v52   ;;  %v4435_v42 = vor.u32 %v4550_v45, %v4434_v14  ;;  %v4439_v9 = vor.u32 %v4548_v19, %v4436_v55  ;;  %v4474_v52 = vld [vmem:[%s10160_s6 + $0xa8] sm:$0xf] }
 0x7ca   : > { %v5759_v4 = vpop.permute.xlu0 %5758  ;;  %v5764_v7 = vpop.permute.xlu1 %5763 }
 0x7cb   : > { %v5761_v43 = vunpack.i.h.bf16 %v5759_v4  ;;  %v5760_v1 = vunpack.i.l.bf16 %v5759_v4  ;;  %v5766_v18 = vunpack.i.h.bf16 %v5764_v7  ;;  %v5765_v53 = vunpack.i.l.bf16 %v5764_v7  ;;  %v4552_v4 = vld [vmem:[%s10160_s6 + $0x84] sm:$0xf]  ;;  %v4452_v7 = vld [vmem:[%s10160_s6 + $0x90] sm:$0xf0] }
 0x7cc   : > { %3794 = vmatpush.bf16.msra.mxu3 %v3516_v58  ;;  %3842 = vmatpush.bf16.msrb.mxu1 %v3524_v28  ;;  %v4451_v28 = vor.u32 %v4554_v8, %v4450_v50 }
 0x7cd   : > { %v3497_v26 = vsel %vm607_vm4, %v5756_v30, %v5766_v18  ;;  %v3496_v51 = vsel %vm607_vm4, %v5731_v27, %v5765_v53  ;;  %3888 = vmatpush.bf16.msrb.mxu2 %v3534_v3  ;;  %v3484_v5 = vsel %vm607_vm4, %v5760_v1, %v5725_v37  ;;  %v3485_v6 = vsel %vm607_vm4, %v5761_v43, %v5726_v47  ;;  %v4394_v37 = vld [vmem:[%s10160_s6 + $0x8] sm:$0xf]  ;;  %v4546_v27 = vld [vmem:[%s10160_s6 + $0x4c] sm:$0xf0]  ;;  %v4555_v18 = vld [vmem:[%s10160_s6 + $0x94] sm:$0xf0] }
 0x7ce   : > { %v3540_v11 = vpack.c.bf16 %v3497_v26, %v3496_v51  ;;  %v3533_v58 = vpack.c.bf16 %v3485_v6, %v3484_v5  ;;  %v4395_v47 = vor.u32 %v4539_v24, %v4394_v37  ;;  %v4419_v29 = vor.u32 %v4546_v27, %v4418_v62  ;;  %v4426_v30 = vld [vmem:[%s10160_s6 + $0x48] sm:$0xf]  ;;  %v4556_v26 = vld [vmem:[%s10160_s6 + $0xa4] sm:$0xf]  ;;  %v4468_v51 = vld [vmem:[%s10160_s6 + $0xb0] sm:$0xf0] }
 0x7cf   : > { %3795 = vmatmul.bf16.vlgmr.msra.gmra.mxu3 %v4387_v54  ;;  %3843 = vmatmul.bf16.vlgmr.msrb.gmra.mxu1 %v4391_v22  ;;  %v4427_v17 = vor.u32 %v4547_v60, %v4426_v30  ;;  %v4455_v3 = vor.u32 %v4552_v4, %v4452_v7  ;;  %v4553_v54 = vld [vmem:[%s10160_s6 + $0x8c] sm:$0xf]  ;;  %v4460_v22 = vld [vmem:[%s10160_s6 + $0x98] sm:$0xf0]  ;;  %v4458_v1 = vld [vmem:[%s10160_s6 + $0x88] sm:$0xf]  ;;  %v4467_v5 = vor.u32 %v4558_v25, %v4466_v44 }
 0x7d0   : > { %3938 = vmatpush.bf16.msra.mxu0 %v3540_v11  ;;  %v4463_v43 = vor.u32 %v4553_v54, %v4460_v22  ;;  %v4459_v53 = vor.u32 %v4555_v18, %v4458_v1  ;;  %v4471_v6 = vor.u32 %v4556_v26, %v4468_v51  ;;  %v4557_v11 = vld [vmem:[%s10160_s6 + $0xac] sm:$0xf]  ;;  %v4559_v37 = vld [vmem:[%s10160_s6 + $0xb4] sm:$0xf0]  ;;  %v3230_v27 = vld [vmem:[%s10160_s6 + $0xe0] sm:$0xff] }
 0x7d1   : > { %3889 = vmatpush.bf16.msrb.mxu2 %v3533_v58  ;;  %3553 = vperm.xlu2 %5769, %v3234_v32   ;;  %v4476_v58 = vld [vmem:[%s10160_s6 + $0xb8] sm:$0xf0]  ;;  %v4475_v24 = vor.u32 %v4559_v37, %v4474_v52  ;;  %v3702_v56 = vunpack.c.l.b16 %v3230_v27  ;;  %v3703_v20 = vunpack.c.h.b16 %v3230_v27 }
 0x7d2   : > { %v9929_v45 = vpop.permute.xlu0 %3603 }
 0x7d3   : > { %4496 = vmatmul.msk.bf16.vlgmr.msra.gmra.mxu0 %vm3762_vm14, %v4399_v46  ;;  %v4479_v46 = vor.u32 %v4557_v11, %v4476_v58  ;;  %v9899_v32 = vpop.permute.xlu1 %3608  ;;  %v3735_v15 = vpack.c.b16 %v3703_v20, %v3703_v20 }
 0x7d5   : > { %3890 = vmatpush.bf16.msrb.mxu2 %v3532_v57  ;;  %v4407_v57 = vor.u32 %v4540_v21, %v4404_v13  ;;  %v4484_v21 = vld [vmem:[%s10160_s6 + $0xd0] sm:$0xf0]  ;;  %v9897_v13 = vpop.permute.xlu2 %3613 }
 0x7d8   : > { %3891 = vmatmul.bf16.vlgmr.msrb.gmra.mxu2 %v4395_v47  ;;  %v4482_v47 = vld [vmem:[%s10160_s6 + $0xc0] sm:$0xf] }
 0x7d9   : > { %3548 = vperm.xlu2 %5769, %v3233_v16   ;;  %v4490_v16 = vld [vmem:[%s10160_s6 + $0xc8] sm:$0xf] }
 0x7da   : > { %v4491_v62 = vor.u32 %v4563_v38, %v4490_v16 }
 0x7df   : > { %3800 = vmatmul.bf16.gmra.mxu3 %v4403_v2  ;;  %3848 = vmatmul.bf16.gmra.mxu1 %v4407_v57  ;;  %v4483_v2 = vor.u32 %v4562_v33, %v4482_v47  ;;  %v4487_v57 = vor.u32 %v4560_v0, %v4484_v21 }
 0x7e3   : > { %4497 = vmatmul.msk.bf16.gmra.mxu0 %vm3762_vm14, %v4415_v31  ;;  %v4495_v31 = vor.u32 %v4561_v10, %v4492_v34 }
 0x7e8   : > { %3896 = vmatmul.bf16.gmra.mxu2 %v4411_v36  ;;  %v9916_v36 = vpop.permute.xlu1 %3598 }
 0x7ef   : > { %3805 = vmatmul.bf16.gmra.mxu3 %v4419_v29  ;;  %3853 = vmatmul.bf16.gmra.mxu1 %v4423_v41  ;;  %v3231_v29 = vld [vmem:[%s10160_s6 + $0xe8] sm:$0xff]  ;;  %v3734_v41 = vpack.c.b16 %v3702_v56, %v3702_v56 }
 0x7f0   : > { %v3705_v63 = vunpack.c.h.b16 %v3231_v29  ;;  %v9926_v30 = vpop.permute.xlu1 %3573 }
 0x7f2   : > { %v3737_v60 = vpack.c.b16 %v3705_v63, %v3705_v63 }
 0x7f3   : > { %4498 = vmatmul.msk.bf16.gmra.mxu0 %vm3762_vm14, %v4431_v35 }
 0x7f8   : > { %3901 = vmatmul.bf16.gmra.mxu2 %v4427_v17  ;;  %v3704_v17 = vunpack.c.l.b16 %v3231_v29  ;;  %v9933_v55 = vpop.permute.xlu1 %3568 }
 0x7fa   : > { %v3736_v14 = vpack.c.b16 %v3704_v17, %v3704_v17 }
 0x7ff   : > { %3810 = vmatmul.bf16.gmra.mxu3 %v4435_v42  ;;  %3858 = vmatmul.bf16.gmra.mxu1 %v4439_v9  ;;  %v9935_v9 = vpop.permute.xlu0 %3593 }
 0x803   : > { %4499 = vmatmul.msk.bf16.gmra.mxu0 %vm3762_vm14, %v4447_v39  ;;  %v3544_v39 = vpop.permute.xlu1 %3543 }
 0x807   : > { %v9937_v4 = vpop.permute.xlu0 %3588 }
 0x808   : > { %3906 = vmatmul.bf16.gmra.mxu2 %v4443_v23 }
 0x80f   : > { %3815 = vmatmul.bf16.gmra.mxu3 %v4451_v28  ;;  %3863 = vmatmul.bf16.gmra.mxu1 %v4455_v3  ;;  %v3564_v25 = vpop.permute.xlu0 %3563 }
 0x811   : > { %v9914_v48 = vpop.permute.xlu2 %3995 }
 0x813   : > { %4500 = vmatmul.msk.bf16.gmra.mxu0 %vm3762_vm14, %v4463_v43 }
 0x817   : > { %v3559_v10 = vpop.permute.xlu0 %3558 }
 0x818   : > { %3911 = vmatmul.bf16.gmra.mxu2 %v4459_v53 }
 0x81b   : > { %v9924_v35 = vpop.permute.xlu2 %3583 }
 0x81f   : > { %3820 = vmatmul.bf16.gmra.mxu3 %v4467_v5  ;;  %3868 = vmatmul.bf16.gmra.mxu1 %v4471_v6 }
 0x823   : > { %4501 = vmatmul.msk.bf16.gmra.mxu0 %vm3762_vm14, %v4479_v46  ;;  %v9931_v19 = vpop.permute.xlu2 %3578 }
 0x828   : > { %3916 = vmatmul.bf16.gmra.mxu2 %v4475_v24 }
 0x82b   : > { %v3554_v40 = vpop.permute.xlu2 %3553 }
 0x82f   : > { %3825 = vmatmul.bf16.gmra.mxu3 %v4483_v2  ;;  %3873 = vmatmul.bf16.gmra.mxu1 %v4487_v57 }
 0x833   : > { %4502 = vmatmul.msk.bf16.gmra.mxu0 %vm3762_vm14, %v4495_v31  ;;  %v3549_v28 = vpop.permute.xlu2 %3548 }
 0x838   : > { %3921 = vmatmul.bf16.gmra.mxu2 %v4491_v62 }
 0x83f   : > { %3830 = vmatmul.bf16.gmra.mxu3 %v3734_v41  ;;  %3878 = vmatmul.bf16.gmra.mxu1 %v3735_v15 }
 0x843   : > { %4503 = vmatmul.msk.bf16.gmra.mxu0 %vm3762_vm14, %v3737_v60 }
 0x848   : > { %3926 = vmatmul.bf16.gmra.mxu2 %v3736_v14 }
 0x84c   : > { %v3844_v42 = vpop.f32.mrf.mxu1 }
 0x850   : > { %v3940_v12 = vpop.f32.mrf.mxu0 }
 0x852   : > { %v3796_v49 = vpop.f32.mrf.mxu3 }
 0x853   : > { %v3797_v59 = vadd.f32 %v3796_v49, %v3544_v39 }
 0x854   : > { %v3846_v23 = vpop.f32.mrf.mxu1 }
 0x855   : > { %v3845_v50 = vadd.f32 %v3844_v42, %v3797_v59 }
 0x858   : > { %v3942_v8 = vpop.f32.mrf.mxu0 }
 0x85a   : > { %v3798_v7 = vpop.f32.mrf.mxu3 }
 0x85b   : > { %v3892_v3 = vpop.f32.mrf.mxu2  ;;  %v3799_v43 = vadd.f32 %v3798_v7, %v3549_v28 }
 0x85c   : > { %v3893_v54 = vadd.f32 %v3892_v3, %v3845_v50  ;;  %v3849_v22 = vpop.f32.mrf.mxu1 }
 0x85d   : > { %v3847_v44 = vadd.f32 %v3846_v23, %v3799_v43 }
 0x85e   : > { %v3941_v1 = vadd.f32 %v3940_v12, %v3893_v54 }
 0x860   : > { %v3945_v18 = vpop.f32.mrf.mxu0  ;;  %v3998_v58 = vmul.f32 %v9914_v48, %v3941_v1  ;;  %vm3979_vm4 = vcmp.gt.f32.partialorder %v3941_v1, 0.0 }
 0x862   : > { %v3801_v53 = vpop.f32.mrf.mxu3  ;;  %v9941_v47 = vsel %vm3979_vm4, %v3941_v1, %v3998_v58 }
 0x863   : > { %v3802_v26 = vadd.f32 %v3801_v53, %v3554_v40  ;;  %v3894_v51 = vpop.f32.mrf.mxu2 }
 0x864   : > { %v3895_v5 = vadd.f32 %v3894_v51, %v3847_v44  ;;  %v3851_v6 = vpop.f32.mrf.mxu1 }
 0x865   : > { %v3850_v11 = vadd.f32 %v3849_v22, %v3802_v26 }
 0x866   : > { %v3943_v46 = vadd.f32 %v3942_v8, %v3895_v5 }
 0x868   : > { %vm3980_vm12 = vcmp.gt.f32.partialorder %v3943_v46, 0.0  ;;  %v3999_v52 = vmul.f32 %v9914_v48, %v3943_v46  ;;  %v3947_v37 = vpop.f32.mrf.mxu0 }
 0x86a   : > { %v3803_v24 = vpop.f32.mrf.mxu3  ;;  %v9943_v33 = vsel %vm3980_vm12, %v3943_v46, %v3999_v52 }
 0x86b   : > { %v3897_v0 = vpop.f32.mrf.mxu2  ;;  %v4039_v21 = vpack.c.bf16 %v9943_v33, %v9941_v47  ;;  %v3804_v34 = vadd.f32 %v3803_v24, %v3559_v10  ;;  %v4568_v47 = vld [vmem:[%s10162_s8 + $0x20] sm:$0xff]  ;;  %v4038_v33 = vld [vmem:[%s10162_s8 + $0x28] sm:$0x3] }
 0x86c   : > { %v3898_v2 = vadd.f32 %v3897_v0, %v3850_v11  ;;  %v3854_v57 = vpop.f32.mrf.mxu1 }
 0x86d   : > { %v3852_v62 = vadd.f32 %v3851_v6, %v3804_v34 }
 0x86e   : > { %v3946_v31 = vadd.f32 %v3945_v18, %v3898_v2 }
 0x870   : > { %v3950_v16 = vpop.f32.mrf.mxu0  ;;  %v4000_v15 = vmul.f32 %v9914_v48, %v3946_v31  ;;  %vm3981_vm2 = vcmp.gt.f32.partialorder %v3946_v31, 0.0 }
 0x872   : > { %v3806_v38 = vpop.f32.mrf.mxu3  ;;  %v9949_v42 = vsel %vm3981_vm2, %v3946_v31, %v4000_v15 }
 0x873   : > { %v3807_v27 = vadd.f32 %v3806_v38, %v3564_v25  ;;  %v3899_v56 = vpop.f32.mrf.mxu2 }
 0x874   : > { %v3900_v20 = vadd.f32 %v3899_v56, %v3852_v62  ;;  %v3856_v29 = vpop.f32.mrf.mxu1 }
 0x875   : > { %v3855_v41 = vadd.f32 %v3854_v57, %v3807_v27 }
 0x876   : > { %v3948_v63 = vadd.f32 %v3947_v37, %v3900_v20 }
 0x878   : > { %vm3982_vm9 = vcmp.gt.f32.partialorder %v3948_v63, 0.0  ;;  %v4001_v60 = vmul.f32 %v9914_v48, %v3948_v63  ;;  %v3952_v17 = vpop.f32.mrf.mxu0 }
 0x87a   : > { %v3808_v14 = vpop.f32.mrf.mxu3  ;;  %v9951_v12 = vsel %vm3982_vm9, %v3948_v63, %v4001_v60 }
 0x87b   : > { %v3809_v40 = vadd.f32 %v3808_v14, %v9933_v55  ;;  %v3902_v39 = vpop.f32.mrf.mxu2  ;;  %v4040_v49 = vpack.c.bf16 %v9951_v12, %v9949_v42  ;;  %v4566_v42 = vld [vmem:[%s10162_s8 + $0x10] sm:$0xff]  ;;  %v4567_v12 = vld [vmem:[%s10162_s8 + $0x18] sm:$0xff] }
 0x87c   : > { %v3903_v59 = vadd.f32 %v3902_v39, %v3855_v41  ;;  %v3859_v23 = vpop.f32.mrf.mxu1 }
 0x87d   : > { %v3857_v50 = vadd.f32 %v3856_v29, %v3809_v40 }
 0x87e   : > { %v3951_v8 = vadd.f32 %v3950_v16, %v3903_v59 }
 0x880   : > { %v3955_v7 = vpop.f32.mrf.mxu0  ;;  %v4002_v18 = vmul.f32 %v9914_v48, %v3951_v8  ;;  %vm3983_vm1 = vcmp.gt.f32.partialorder %v3951_v8, 0.0 }
 0x882   : > { %v3811_v28 = vpop.f32.mrf.mxu3  ;;  %v9959_v26 = vsel %vm3983_vm1, %v3951_v8, %v4002_v18 }
 0x883   : > { %v3812_v3 = vadd.f32 %v3811_v28, %v9926_v30  ;;  %v3904_v54 = vpop.f32.mrf.mxu2 }
 0x884   : > { %v3905_v22 = vadd.f32 %v3904_v54, %v3857_v50  ;;  %v3861_v43 = vpop.f32.mrf.mxu1 }
 0x885   : > { %v3860_v1 = vadd.f32 %v3859_v23, %v3812_v3 }
 0x886   : > { %v3953_v53 = vadd.f32 %v3952_v17, %v3905_v22 }
 0x888   : > { %vm3984_vm5 = vcmp.gt.f32.partialorder %v3953_v53, 0.0  ;;  %v4003_v55 = vmul.f32 %v9914_v48, %v3953_v53  ;;  %v3957_v44 = vpop.f32.mrf.mxu0 }
 0x88a   : > { %v3813_v25 = vpop.f32.mrf.mxu3  ;;  %v9961_v51 = vsel %vm3984_vm5, %v3953_v53, %v4003_v55 }
 0x88b   : > { %v3814_v5 = vadd.f32 %v3813_v25, %v9931_v19  ;;  %v3907_v30 = vpop.f32.mrf.mxu2  ;;  %v4041_v6 = vpack.c.bf16 %v9961_v51, %v9959_v26 }
 0x88c   : > { %v3908_v11 = vadd.f32 %v3907_v30, %v3860_v1  ;;  %v3864_v58 = vpop.f32.mrf.mxu1 }
 0x88d   : > { %v3862_v46 = vadd.f32 %v3861_v43, %v3814_v5 }
 0x88e   : > { %v3956_v52 = vadd.f32 %v3955_v7, %v3908_v11 }
 0x890   : > { %v3960_v37 = vpop.f32.mrf.mxu0  ;;  %v4004_v31 = vmul.f32 %v9914_v48, %v3956_v52  ;;  %vm3985_vm0 = vcmp.gt.f32.partialorder %v3956_v52, 0.0 }
 0x892   : > { %v3816_v24 = vpop.f32.mrf.mxu3  ;;  %v9969_v27 = vsel %vm3985_vm0, %v3956_v52, %v4004_v31 }
 0x893   : > { %v3817_v0 = vadd.f32 %v3816_v24, %v9924_v35  ;;  %v3909_v2 = vpop.f32.mrf.mxu2 }
 0x894   : > { %v3910_v57 = vadd.f32 %v3909_v2, %v3862_v46  ;;  %v3866_v10 = vpop.f32.mrf.mxu1 }
 0x895   : > { %v3865_v34 = vadd.f32 %v3864_v58, %v3817_v0 }
 0x896   : > { %v3958_v16 = vadd.f32 %v3957_v44, %v3910_v57 }
 0x898   : > { %vm3986_vm6 = vcmp.gt.f32.partialorder %v3958_v16, 0.0  ;;  %v4005_v19 = vmul.f32 %v9914_v48, %v3958_v16  ;;  %v3962_v38 = vpop.f32.mrf.mxu0 }
 0x89a   : > { %v3818_v62 = vpop.f32.mrf.mxu3  ;;  %v9971_v56 = vsel %vm3986_vm6, %v3958_v16, %v4005_v19 }
 0x89b   : > { %v3912_v20 = vpop.f32.mrf.mxu2  ;;  %v4042_v35 = vpack.c.bf16 %v9971_v56, %v9969_v27  ;;  %v3819_v15 = vadd.f32 %v3818_v62, %v9937_v4  ;;  %v4565_v27 = vld [vmem:[%s10162_s8 + $0x8] sm:$0xff] }
 0x89c   : > { %v3913_v29 = vadd.f32 %v3912_v20, %v3865_v34  ;;  %v3869_v41 = vpop.f32.mrf.mxu1 }
 0x89d   : > { %v3867_v14 = vadd.f32 %v3866_v10, %v3819_v15 }
 0x89e   : > { %v3961_v63 = vadd.f32 %v3960_v37, %v3913_v29 }
 0x8a0   : > { %v3965_v60 = vpop.f32.mrf.mxu0  ;;  %v4006_v23 = vmul.f32 %v9914_v48, %v3961_v63  ;;  %vm3987_vm15 = vcmp.gt.f32.partialorder %v3961_v63, 0.0 }
 0x8a2   : > { %v3821_v17 = vpop.f32.mrf.mxu3  ;;  %v9978_v3 = vsel %vm3987_vm15, %v3961_v63, %v4006_v23 }
 0x8a3   : > { %v3914_v40 = vpop.f32.mrf.mxu2  ;;  %v3822_v34 = vadd.f32 %v3821_v17, %v9935_v9 }
 0x8a4   : > { %v3915_v39 = vadd.f32 %v3914_v40, %v3867_v14  ;;  %v3871_v59 = vpop.f32.mrf.mxu1 }
 0x8a5   : > { %v3870_v15 = vadd.f32 %v3869_v41, %v3822_v34  ;;  %v4050_v34 = vld [vmem:[%s10163_s9 + $0x18] sm:$0xff] }
 0x8a6   : > { %v3963_v50 = vadd.f32 %v3962_v38, %v3915_v39 }
 0x8a8   : > { %vm3988_vm10 = vcmp.gt.f32.partialorder %v3963_v50, 0.0  ;;  %v4007_v8 = vmul.f32 %v9914_v48, %v3963_v50  ;;  %v3967_v7 = vpop.f32.mrf.mxu0 }
 0x8aa   : > { %v3823_v28 = vpop.f32.mrf.mxu3  ;;  %v4022_v54 = vsel %vm3988_vm10, %v3963_v50, %v4007_v8 }
 0x8ab   : > { %v3917_v4 = vpop.f32.mrf.mxu2  ;;  %v4043_v22 = vpack.c.bf16 %v4022_v54, %v9978_v3  ;;  %v3824_v2 = vadd.f32 %v3823_v28, %v9916_v36 }
 0x8ac   : > { %v3874_v43 = vpop.f32.mrf.mxu1  ;;  %v3918_v40 = vadd.f32 %v3917_v4, %v3870_v15  ;;  %v4047_v15 = vld [vmem:[%s10163_s9] sm:$0xff] }
 0x8ad   : > { %v3872_v62 = vadd.f32 %v3871_v59, %v3824_v2 }
 0x8ae   : > { %v3966_v23 = vadd.f32 %v3965_v60, %v3918_v40 }
 0x8b0   : > { %v3970_v1 = vpop.f32.mrf.mxu0  ;;  %v4008_v54 = vmul.f32 %v9914_v48, %v3966_v23  ;;  %vm3989_vm12 = vcmp.gt.f32.partialorder %v3966_v23, 0.0 }
 0x8b2   : > { %v3826_v18 = vpop.f32.mrf.mxu3  ;;  %v4023_v60 = vsel %vm3989_vm12, %v3966_v23, %v4008_v54 }
 0x8b3   : > { %v3919_v53 = vpop.f32.mrf.mxu2  ;;  %v3827_v24 = vadd.f32 %v3826_v18, %v9929_v45 }
 0x8b4   : > { %v3876_v55 = vpop.f32.mrf.mxu1  ;;  %v3920_v63 = vadd.f32 %v3919_v53, %v3872_v62 }
 0x8b5   : > { %v3875_v31 = vadd.f32 %v3874_v43, %v3827_v24  ;;  %v4049_v24 = vld [vmem:[%s10163_s9 + $0x10] sm:$0xff] }
 0x8b6   : > { %v3968_v39 = vadd.f32 %v3967_v7, %v3920_v63 }
 0x8b8   : > { %v3972_v44 = vpop.f32.mrf.mxu0  ;;  %v4009_v41 = vmul.f32 %v9914_v48, %v3968_v39  ;;  %vm3990_vm4 = vcmp.gt.f32.partialorder %v3968_v39, 0.0 }
 0x8ba   : > { %v3828_v25 = vpop.f32.mrf.mxu3  ;;  %v4024_v43 = vsel %vm3990_vm4, %v3968_v39, %v4009_v41 }
 0x8bb   : > { %v3922_v5 = vpop.f32.mrf.mxu2  ;;  %v3829_v46 = vadd.f32 %v3828_v25, %v9899_v32 }
 0x8bc   : > { %v3879_v30 = vpop.f32.mrf.mxu1  ;;  %v3923_v20 = vadd.f32 %v3922_v5, %v3875_v31  ;;  %v4054_v5 = vld [vmem:[%s10163_s9 + $0x38] sm:$0xff]  ;;  %v4053_v31 = vld [vmem:[%s10163_s9 + $0x30] sm:$0xff] }
 0x8bd   : > { %v3877_v57 = vadd.f32 %v3876_v55, %v3829_v46  ;;  %v4055_v55 = vld [vmem:[%s10163_s9 + $0x40] sm:$0xff] }
 0x8c0   : > { %v3975_v11 = vpop.f32.mrf.mxu0 }
 0x8c2   : > { %v3831_v58 = vpop.f32.mrf.mxu3 }
 0x8c3   : > { %v3924_v52 = vpop.f32.mrf.mxu2  ;;  %v3832_v0 = vadd.f32 %v3831_v58, %v9897_v13  ;;  %v3971_v13 = vadd.f32 %v3970_v1, %v3923_v20  ;;  %v4044_v1 = vpack.c.bf16 %v4024_v43, %v4023_v60 }
 0x8c4   : > { %v3881_v37 = vpop.f32.mrf.mxu1  ;;  %v3925_v16 = vadd.f32 %v3924_v52, %v3877_v57  ;;  %v4051_v52 = vld [vmem:[%s10163_s9 + $0x20] sm:$0xff] }
 0x8c5   : > { %v3880_v38 = vadd.f32 %v3879_v30, %v3832_v0  ;;  %v4010_v59 = vmul.f32 %v9914_v48, %v3971_v13  ;;  %vm3991_vm14 = vcmp.gt.f32.partialorder %v3971_v13, 0.0  ;;  %v4056_v30 = vld [vmem:[%s10163_s9 + $0x48] sm:$0xff]  ;;  %v4057_v37 = vld [vmem:[%s10163_s9 + $0x50] sm:$0xf] }
 0x8c6   : > { %v3973_v14 = vadd.f32 %v3972_v44, %v3925_v16  ;;  %v4048_v16 = vld [vmem:[%s10163_s9 + $0x8] sm:$0xff] }
 0x8c7   : > { %v4025_v7 = vsel %vm3991_vm14, %v3971_v13, %v4010_v59  ;;  %vm4296_vm14 = vcmask 7168  }
 0x8c8   : > { %v3977_v10 = vpop.f32.mrf.mxu0  ;;  %v4011_v9 = vmul.f32 %v9914_v48, %v3973_v14  ;;  %vm3992_vm3 = vcmp.gt.f32.partialorder %v3973_v14, 0.0 }
 0x8ca   : > { %v3833_v19 = vpop.f32.mrf.mxu3  ;;  %v4026_v3 = vsel %vm3992_vm3, %v3973_v14, %v4011_v9  ;;  %vm4275_vm3 = vcmask 687104  }
 0x8cb   : > { %v3927_v29 = vpop.f32.mrf.mxu2  ;;  %v4045_v4 = vpack.c.bf16 %v4026_v3, %v4025_v7 }
 0x8cc   : > { %v3928_v32 = vadd.f32 %v3927_v29, %v3880_v38  ;;  %v4052_v29 = vld [vmem:[%s10163_s9 + $0x28] sm:$0xff] }
 0x8ce   : > { %v3976_v45 = vadd.f32 %v3975_v11, %v3928_v32 }
 0x8d0   : > { %vm3993_vm8 = vcmp.gt.f32.partialorder %v3976_v45, 0.0  ;;  %v4012_v36 = vmul.f32 %v9914_v48, %v3976_v45  ;;  %v4564_v48 = vld [vmem:[%s10162_s8] sm:$0xff] }
 0x8d2   : > { %v4027_v17 = vsel %vm3993_vm8, %v3976_v45, %v4012_v36 }
 0x8d3   : > { %v3929_v50 = vpop.f32.mrf.mxu2  ;;  %v4046_v8 = vpack.c.bf16 %v4027_v17, %v4027_v17 }
 0x8d5   : > { %v4105_v28 = vsel %vm1063_vm13, %v4046_v8, 0 }
 0x8d6   : > { %4107 = vmatpush.bf16.msrb.mxu3 %v4105_v28 }
 0x8da   : > { %4108 = vmatpush.bf16.msrb.mxu3 %v4045_v4 }
 0x8de   : > { %4109 = vmatpush.bf16.msrb.mxu3 %v4044_v1 }
 0x8e2   : > { %4110 = vmatpush.bf16.msrb.mxu3 %v4043_v22 }
 0x8e6   : > { %4111 = vmatpush.bf16.msrb.mxu3 %v4042_v35 }
 0x8ea   : > { %4112 = vmatpush.bf16.msrb.mxu3 %v4041_v6 }
 0x8ee   : > { %4113 = vmatpush.bf16.msrb.mxu3 %v4040_v49 }
 0x8f2   : > { %4114 = vmatpush.bf16.msrb.mxu3 %v4039_v21  ;;  %v4079_v21 = vunpack.c.l.b16 %v4038_v33 }
 0x8f4   : > { %v4085_v49 = vpack.c.b16 %v4079_v21, %v4079_v21 }
 0x8f5   : > { %4524 = vmatmul.msk.bf16.vlgmr.msrb.gmra.mxu3 %vm1848_vm11, %v4564_v48 }
 0x905   : > { %4525 = vmatmul.msk.bf16.gmra.mxu3 %vm1848_vm11, %v4565_v27 }
 0x915   : > { %4526 = vmatmul.msk.bf16.gmra.mxu3 %vm1848_vm11, %v4566_v42 }
 0x925   : > { %4527 = vmatmul.msk.bf16.gmra.mxu3 %vm1848_vm11, %v4567_v12 }
 0x935   : > { %4528 = vmatmul.msk.bf16.gmra.mxu3 %vm1848_vm11, %v4568_v47 }
 0x945   : > { %4529 = vmatmul.msk.bf16.gmra.mxu3 %vm1848_vm11, %v4085_v49 }
 0x978   : > { %v4116_v26 = vpop.f32.mrf.mxu3 }
 0x979   : > { %v10098_v63 = vadd.f32 %v4116_v26, %v4047_v15 }
 0x97b   : > { %vm4145_vm10 = vcmp.gt.f32.partialorder %v10098_v63, 0.0 }
 0x980   : > { %v4118_v51 = vpop.f32.mrf.mxu3 }
 0x981   : > { %v10080_v20 = vadd.f32 %v4118_v51, %v4048_v16 }
 0x983   : > { %vm4146_vm8 = vcmp.gt.f32.partialorder %v10080_v20, 0.0 }
 0x988   : > { %v4121_v6 = vpop.f32.mrf.mxu3 }
 0x989   : > { %v10060_v10 = vadd.f32 %v4121_v6, %v4049_v24 }
 0x98b   : > { %vm4147_vm6 = vcmp.gt.f32.partialorder %v10060_v10, 0.0 }
 0x990   : > { %v4123_v56 = vpop.f32.mrf.mxu3 }
 0x991   : > { %v10076_v38 = vadd.f32 %v4123_v56, %v4050_v34 }
 0x993   : > { %vm4148_vm15 = vcmp.gt.f32.partialorder %v10076_v38, 0.0 }
 0x998   : > { %v4126_v35 = vpop.f32.mrf.mxu3 }
 0x999   : > { %v10058_v2 = vadd.f32 %v4126_v35, %v4051_v52 }
 0x99b   : > { %vm4149_vm5 = vcmp.gt.f32.partialorder %v10058_v2, 0.0 }
 0x9a0   : > { %v4128_v22 = vpop.f32.mrf.mxu3 }
 0x9a1   : > { %v10091_v32 = vadd.f32 %v4128_v22, %v4052_v29 }
 0x9a3   : > { %vm4150_vm0 = vcmp.gt.f32.partialorder %v10091_v32, 0.0 }
 0x9a8   : > { %v4131_v18 = vpop.f32.mrf.mxu3 }
 0x9a9   : > { %v10078_v62 = vadd.f32 %v4131_v18, %v4053_v31 }
 0x9ab   : > { %vm4151_vm9 = vcmp.gt.f32.partialorder %v10078_v62, 0.0 }
 0x9b0   : > { %v4133_v53 = vpop.f32.mrf.mxu3 }
 0x9b1   : > { %v10041_v58 = vadd.f32 %v4133_v53, %v4054_v5 }
 0x9b3   : > { %vm4152_vm1 = vcmp.gt.f32.partialorder %v10041_v58, 0.0 }
 0x9b8   : > { %v4136_v44 = vpop.f32.mrf.mxu3 }
 0x9b9   : > { %v10031_v25 = vadd.f32 %v4136_v44, %v4055_v55 }
 0x9bb   : > { %4184 = vrot.lane.b32.xlu1 %v10031_v25, %s5837_s28  ;;  %vm4153_vm11 = vcmp.gt.f32.partialorder %v10031_v25, 0.0 }
 0x9c0   : > { %v4138_v11 = vpop.f32.mrf.mxu3 }
 0x9c1   : > { %v10043_v46 = vadd.f32 %v4138_v11, %v4056_v30 }
 0x9c3   : > { %4186 = vrot.lane.b32.xlu2 %v10043_v46, %s5837_s28  ;;  %4182 = vrot.lane.b32.xlu1 %v10041_v58, %s5837_s28  ;;  %vm4154_vm2 = vcmp.gt.f32.partialorder %v10043_v46, 0.0 }
 0x9c8   : > { %v4141_v0 = vpop.f32.mrf.mxu3 }
 0x9c9   : > { %v4142_v57 = vadd.f32 %v4141_v0, %v4057_v37 }
 0x9cb   : > { %4188 = vrot.lane.b32.xlu0 %v4142_v57, %s5837_s28  ;;  %4176 = vrot.lane.b32.xlu2 %v10058_v2, %s5837_s28  ;;  %vm4155_vm13 = vcmp.gt.f32.partialorder %v4142_v57, 0.0 }
 0x9cc   : > { %4172 = vrot.lane.b32.xlu1 %v10060_v10, %s5837_s28 }
 0x9d0   : > { %v4143_v19 = vpop.f32.mrf.mxu3 }
 0x9d3   : > { %4180 = vrot.lane.b32.xlu0 %v10078_v62, %s5837_s28  ;;  %4174 = vrot.lane.b32.xlu2 %v10076_v38, %s5837_s28 }
 0x9d4   : > { %4170 = vrot.lane.b32.xlu1 %v10080_v20, %s5837_s28 }
 0x9db   : > { %4178 = vrot.lane.b32.xlu0 %v10091_v32, %s5837_s28 }
 0x9e3   : > { %4168 = vrot.lane.b32.xlu0 %v10098_v63, %s5837_s28 }
 0xa1d   : > { %v4187_v14 = vpop.permute.xlu2 %4186 }
 0xa1e   : > { %v4210_v28 = vmul.f32 %v9674_v61, %v4187_v14 }
 0xa25   : > { %v4177_v40 = vpop.permute.xlu2 %4176 }
 0xa26   : > { %v4205_v36 = vmul.f32 %v9674_v61, %v4177_v40 }
 0xa2d   : > { %v4185_v45 = vpop.permute.xlu1 %4184  ;;  %v4175_v27 = vpop.permute.xlu2 %4174 }
 0xa2e   : > { %v4209_v23 = vmul.f32 %v9674_v61, %v4185_v45  ;;  %v4204_v12 = vmul.f32 %v9674_v61, %v4175_v27  ;;  %v4267_v45 = vld [vmem:[%s10164_s10] sm:$0x1] }
 0xa35   : > { %v4183_v13 = vpop.permute.xlu1 %4182 }
 0xa36   : > { %v4208_v39 = vmul.f32 %v9674_v61, %v4183_v13 }
 0xa38   : > { %v5780_v9 = vpack.i.bf16 %v4205_v36, %v4208_v39 }
 0xa3a   : > { %5781 = vrot.lane.b32.xlu1 %v5780_v9, %s5814_s15 }
 0xa3d   : > { %v4189_v17 = vpop.permute.xlu0 %4188 }
 0xa3e   : > { %v4211_v59 = vmul.f32 %v9674_v61, %v4189_v17  ;;  %v4173_v50 = vpop.permute.xlu1 %4172 }
 0xa3f   : > { %v4203_v60 = vmul.f32 %v9674_v61, %v4173_v50 }
 0xa40   : > { %v5770_v8 = vpack.i.bf16 %v4209_v23, %v4211_v59 }
 0xa42   : > { %5771 = vrot.lane.b32.xlu2 %v5770_v8, %s5814_s15 }
 0xa45   : > { %v4181_v41 = vpop.permute.xlu0 %4180 }
 0xa46   : > { %v4207_v3 = vmul.f32 %v9674_v61, %v4181_v41  ;;  %v4171_v54 = vpop.permute.xlu1 %4170 }
 0xa47   : > { %v4202_v7 = vmul.f32 %v9674_v61, %v4171_v54 }
 0xa48   : > { %v5775_v4 = vpack.i.bf16 %v4207_v3, %v4210_v28 }
 0xa49   : > { %4225 = vrot.lane.b32.xlu1 %v4202_v7, %s5814_s15 }
 0xa4a   : > { %5776 = vrot.lane.b32.xlu0 %v5775_v4, %s5814_s15 }
 0xa4d   : > { %v4179_v43 = vpop.permute.xlu0 %4178 }
 0xa4e   : > { %v4206_v1 = vmul.f32 %v9674_v61, %v4179_v43 }
 0xa50   : > { %v5785_v48 = vpack.i.bf16 %v4203_v60, %v4206_v1 }
 0xa52   : > { %5786 = vrot.lane.b32.xlu2 %v5785_v48, %s5814_s15 }
 0xa55   : > { %v4169_v42 = vpop.permute.xlu0 %4168 }
 0xa56   : > { %v4201_v47 = vmul.f32 %v9674_v61, %v4169_v42 }
 0xa58   : > { %v5790_v33 = vpack.i.bf16 %v4201_v47, %v4204_v12 }
 0xa5a   : > { %5791 = vrot.lane.b32.xlu0 %v5790_v33, %s5814_s15 }
 0xa9c   : > { %v5772_v21 = vpop.permute.xlu2 %5771 }
 0xa9d   : > { %v5773_v49 = vunpack.i.l.bf16 %v5772_v21  ;;  %v5774_v56 = vunpack.i.h.bf16 %v5772_v21 }
 0xa9f   : > { %v4266_v26 = vsel %vm4155_vm13, %v4142_v57, %v5773_v49  ;;  %v4264_v44 = vsel %vm4153_vm11, %v10031_v25, %v5774_v56 }
 0xaa0   : > { %v4273_v51 = vpack.c.bf16 %v4266_v26, %v4266_v26 }
 0xaa2   : > { %v4280_v6 = vsel %vm1081_vm7, %v4273_v51, 0 }
 0xaa3   : > { %4284 = vmatpush.bf16.msrb.mxu0 %v4280_v6 }
 0xaac   : > { %v5782_v35 = vpop.permute.xlu1 %5781  ;;  %v5787_v61 = vpop.permute.xlu2 %5786 }
 0xaad   : > { %v5783_v55 = vunpack.i.l.bf16 %v5782_v35  ;;  %v5788_v11 = vunpack.i.l.bf16 %v5787_v61  ;;  %v5784_v52 = vunpack.i.h.bf16 %v5782_v35  ;;  %v5789_v34 = vunpack.i.h.bf16 %v5787_v61 }
 0xaaf   : > { %v4263_v24 = vsel %vm4152_vm1, %v10041_v58, %v5783_v55  ;;  %v4260_v25 = vsel %vm4149_vm5, %v10058_v2, %v5784_v52  ;;  %v4258_v58 = vsel %vm4147_vm6, %v10060_v10, %v5789_v34  ;;  %v4274_v10 = vld [vmem:[%s10165_s11] sm:$0x3] }
 0xabb   : > { %v4226_v2 = vpop.permute.xlu1 %4225 }
 0xabc   : > { %v5777_v22 = vpop.permute.xlu0 %5776  ;;  %v4257_v15 = vsel %vm4146_vm8, %v10080_v20, %v4226_v2 }
 0xabd   : > { %v5779_v18 = vunpack.i.h.bf16 %v5777_v22  ;;  %v5778_v53 = vunpack.i.l.bf16 %v5777_v22 }
 0xabf   : > { %v4265_v5 = vsel %vm4154_vm2, %v10043_v46, %v5778_v53  ;;  %v4262_v37 = vsel %vm4151_vm9, %v10078_v62, %v5779_v18  ;;  %v4261_v46 = vsel %vm4150_vm0, %v10091_v32, %v5788_v11 }
 0xac0   : > { %v4272_v30 = vpack.c.bf16 %v4265_v5, %v4264_v44  ;;  %v4271_v0 = vpack.c.bf16 %v4263_v24, %v4262_v37  ;;  %v4270_v57 = vpack.c.bf16 %v4261_v46, %v4260_v25 }
 0xac2   : > { %4285 = vmatpush.bf16.msrb.mxu0 %v4272_v30 }
 0xac6   : > { %4286 = vmatpush.bf16.msrb.mxu0 %v4271_v0 }
 0xaca   : > { %4287 = vmatpush.bf16.msrb.mxu0 %v4270_v57 }
 0xacc   : > { %v5792_v31 = vpop.permute.xlu0 %5791 }
 0xacd   : > { %v5794_v16 = vunpack.i.h.bf16 %v5792_v31  ;;  %v5793_v19 = vunpack.i.l.bf16 %v5792_v31 }
 0xacf   : > { %v4259_v62 = vsel %vm4148_vm15, %v10076_v38, %v5793_v19  ;;  %v4256_v32 = vsel %vm4145_vm10, %v10098_v63, %v5794_v16 }
 0xad0   : > { %v4269_v29 = vpack.c.bf16 %v4259_v62, %v4258_v58  ;;  %v4268_v14 = vpack.c.bf16 %v4257_v15, %v4256_v32 }
 0xad2   : > { %4288 = vmatpush.bf16.msrb.mxu0 %v4269_v29 }
 0xad6   : > { %4289 = vmatpush.bf16.msrb.mxu0 %v4268_v14 }
 0xad9   : > { %4530 = vmatmul.msk.bf16.vlgmr.msrb.gmra.mxu0 %vm4275_vm3, %v4267_v45 }
 0xb56   : > { %v4291_v38 = vpop.f32.mrf.mxu0 }
 0xb57   : > { %v4292_v63 = vadd.f32 %v4291_v38, %v4274_v10 }
 0xb59   : > { %v4295_v20 = vsel %vm1081_vm7, %v4292_v63, 0.0 }
 0xb5a   : > { %v4297_v40 = vsel %vm4296_vm14, %v4295_v20, 0.0 }
 0xb5b   : > { %4298 = vst [vmem:[%s411_s20] sm:$0xff] %v4297_v40 }
 0xb5e   : > { %v4293_v13 = vpop.f32.mrf.mxu0 }
 0xb5f PF: > { %s22_s21 = sadd.s32 1, %s5805_s21  }
 0xb60   : > { %p19_p4 = scmp.ge.s32.totalorder %s22_s21, 4  }
 0xb62   :  { %21 = sbr.rel (!%p19_p4) target bundleno = 1 (0x1), region = 101 }

</bundles_post_ra>
